<compile_context>
chip_gen: v7x
topology: tpu7x:2x2x1
jax: 0.10.0
libtpu: 0.0.40
codegen_flags: <defaults>
</compile_context>

<pallas_src>
import functools

import jax
import jax.numpy as jnp
import numpy as np
from jax.experimental import pallas as pl
from jax.experimental.pallas import tpu as pltpu


def _round_up(x, m):
    return ((x + m - 1) // m) * m


# ---------------- in-kernel helpers (value-level, stay in VMEM) ----------------

def _conv3x3_flat(xflat, w_ref, b_ref, H, Wp):
    """3x3 / stride-1 conv on the flat padded-row layout, bf16 MXU / f32 accum.

    xflat: ((H+3)*Wp, Cin) bf16 value; rows of width Wp (sublane aligned): row 0 is
           the top zero pad, column 0 the left zero pad, columns >= W+1 are zero pads,
           the last two rows are zero slack so every tap slice stays in bounds.
    w_ref: (3, 3*Cin, Cout) bf16 ref, BN scale folded in (row dh flattened over
           (dw, cin) to match the lane-concatenated im2col slab below).
    b_ref: (1, Cout) f32 ref, folded BN bias.
    Returns (H*Wp, Cout) f32, post bias + ReLU.  Columns >= W of each output row are
    wrap-around garbage and must be masked / dropped by the caller.
    """
    L = H * Wp
    acc = None
    for dh in range(3):                                   # static unrolled
        base = dh * Wp                                    # sublane-aligned offset
        slab = jnp.concatenate(                           # (L, 3*Cin) im2col slab
            [xflat[base + dw: base + dw + L, :] for dw in range(3)], axis=-1)
        part = jnp.dot(slab, w_ref[dh], preferred_element_type=jnp.float32)
        acc = part if acc is None else acc + part
    return jnp.maximum(acc + b_ref[...].astype(jnp.float32), 0.0)


# ---------------- fused bottleneck kernel ----------------

def _darknet_bottleneck_kernel(x_ref, w1_ref, b1_ref, w2_ref, b2_ref, o_ref, *,
                               add, Wp):
    H, W, Cin = x_ref.shape[1], x_ref.shape[2], x_ref.shape[3]
    Cmid = w1_ref.shape[-1]
    L = H * Wp
    cdt = jnp.bfloat16                                    # MXU operand dtype

    x = x_ref[0]                                          # (H, W, Cin), resident block

    # --- cv1 input: zero-pad to rows of width Wp and flatten (all in VMEM, bf16) ---
    xb = x.astype(cdt)
    xw = jnp.concatenate(                                 # (H, Wp, Cin)
        [jnp.zeros((H, 1, Cin), cdt), xb,
         jnp.zeros((H, Wp - W - 1, Cin), cdt)], axis=1)
    xflat1 = jnp.concatenate(                             # ((H+3)*Wp, Cin)
        [jnp.zeros((Wp, Cin), cdt), xw.reshape(L, Cin),
         jnp.zeros((2 * Wp, Cin), cdt)], axis=0)

    # --- cv1 (stays in VMEM) ---
    y1 = _conv3x3_flat(xflat1, w1_ref, b1_ref, H, Wp)     # (L, Cmid) f32

    # --- zero pad/wrap columns (MUST be zero before cv2) and rebuild the padded flat
    #     layout for cv2: one top-pad row + 1-element shift == left-pad column. ---
    col = jax.lax.broadcasted_iota(jnp.int32, (Wp, Cmid), 0)
    y1m = jnp.where(col < W, y1.reshape(H, Wp, Cmid), 0.0)
    xflat2 = jnp.concatenate(                             # ((H+3)*Wp, Cmid)
        [jnp.zeros((Wp + 1, Cmid), cdt), y1m.reshape(L, Cmid).astype(cdt),
         jnp.zeros((2 * Wp - 1, Cmid), cdt)], axis=0)

    # --- cv2 ---
    y2 = _conv3x3_flat(xflat2, w2_ref, b2_ref, H, Wp)     # (L, Cout) f32

    out = y2.reshape(H, Wp, -1)[:, :W, :]                 # drop pad/wrap columns
    if add:
        out = out + x.astype(jnp.float32)                 # residual from resident block
    o_ref[...] = out.reshape(o_ref.shape).astype(o_ref.dtype)


# ---------------- wrappers ----------------

def _vmem_footprint_bytes(H, W, Cin, Cmid, Cout, Wp, x_bytes, o_bytes):
    """Rough per-grid-step VMEM footprint (pipelined blocks + main intermediates)."""
    L, HP = H * Wp, (H + 3) * Wp
    est = 0
    est += 2 * H * W * Cin * x_bytes                       # x block (double buffered)
    est += 2 * H * W * Cout * o_bytes                      # out block (double buffered)
    est += 2 * 2 * (3 * 3 * Cin * Cmid + 3 * 3 * Cmid * Cout)  # bf16 weights x 2 bufs
    est += 2 * (HP * Cin + HP * Cmid)                      # padded flat inputs (bf16)
    est += 2 * L * 3 * max(Cin, Cmid)                      # largest im2col slab (bf16)
    est += 4 * L * (Cmid + Cout)                           # f32 conv outputs
    est += 4 * H * W * Cout                                # sliced output + residual
    return est


def darknet_bottleneck_nhwc(x_nhwc, params, add=True):
    """Fused DarknetBottleneck forward, NHWC.  params = ((w1,b1),(w2,b2)) from
    prepare_conv_bn: bf16 weights of shape (3, 3*Cin, Cout) with BN scale folded in,
    f32 biases of shape (1, Cout)."""
    (w1, b1), (w2, b2) = params
    N, H, W, Cin = x_nhwc.shape
    Cmid, Cout = w1.shape[-1], w2.shape[-1]
    assert w1.shape == (3, 3 * Cin, Cmid) and w2.shape == (3, 3 * Cmid, Cout)
    if add:
        assert Cout == Cin, "shortcut requires c_out == c_in"

    Wp = _round_up(W + 2, 8)                               # sublane-aligned padded width

    est = _vmem_footprint_bytes(H, W, Cin, Cmid, Cout, Wp,
                                x_nhwc.dtype.itemsize, x_nhwc.dtype.itemsize)
    # v5e scoped default is only 16 MiB; keep headroom but stay well under v7x's
    # 64 MiB physical VMEM (prefer H-tiling -- see TODO -- over pushing this higher).
    vmem_limit = int(max(32 * 1024 * 1024, min(48 * 1024 * 1024, 2 * est)))

    kernel = functools.partial(_darknet_bottleneck_kernel, add=add, Wp=Wp)
    return pl.pallas_call(
        kernel,
        out_shape=jax.ShapeDtypeStruct((N, H, W, Cout), x_nhwc.dtype),
        grid=(N,),
        in_specs=[
            pl.BlockSpec((1, H, W, Cin), lambda n: (n, 0, 0, 0)),
            pl.BlockSpec((3, 3 * Cin, Cmid), lambda n: (0, 0, 0)),
            pl.BlockSpec((1, Cmid), lambda n: (0, 0)),
            pl.BlockSpec((3, 3 * Cmid, Cout), lambda n: (0, 0, 0)),
            pl.BlockSpec((1, Cout), lambda n: (0, 0)),
        ],
        out_specs=pl.BlockSpec((1, H, W, Cout), lambda n: (n, 0, 0, 0)),
        compiler_params=pltpu.CompilerParams(
            dimension_semantics=("parallel",),
            vmem_limit_bytes=vmem_limit,
        ),
    )(x_nhwc, w1, b1, w2, b2)


def darknet_bottleneck(x_nchw, params, add=True):
    """NCHW entry point (PyTorch layout). If the surrounding model runs NHWC,
    call darknet_bottleneck_nhwc directly and skip both transposes."""
    x = jnp.transpose(x_nchw, (0, 2, 3, 1))                # NCHW -> NHWC
    y = darknet_bottleneck_nhwc(x, params, add=add)
    return jnp.transpose(y, (0, 3, 1, 2))                  # NHWC -> NCHW


# ---------------- parameter preparation ----------------

def fold_bn(gamma, beta, mean, var, eps=1e-5):
    scale = gamma / jnp.sqrt(var + eps)
    bias = beta - mean * scale
    return scale, bias


def prepare_conv_bn(w_oihw, gamma, beta, mean, var, eps=1e-5):
    """PyTorch OIHW conv weight + BN stats -> BN-folded, MXU-ready weight/bias.

    Returns (w, b): w of shape (3, 3*Cin, Cout) in bf16 (row dh flattened over
    (dw, cin) to match the kernel's im2col slab), b of shape (1, Cout) in f32.
    """
    scale, bias = fold_bn(gamma, beta, mean, var, eps)
    w_hwio = jnp.transpose(w_oihw, (2, 3, 1, 0))           # (kh, kw, Cin, Cout)
    w_folded = w_hwio * scale[None, None, None, :]
    kh, kw, cin, cout = w_folded.shape
    w_flat = w_folded.reshape(kh, kw * cin, cout).astype(jnp.bfloat16)
    return w_flat, bias.reshape(1, -1).astype(jnp.float32)


# ---------------- reference (pure JAX / XLA) for sanity check ----------------

def _ref_conv_bn_relu(x_nchw, w_oihw, scale, bias):
    y = jax.lax.conv_general_dilated(
        x_nchw, w_oihw, window_strides=(1, 1), padding=((1, 1), (1, 1)),
        dimension_numbers=("NCHW", "OIHW", "NCHW"),
        precision=jax.lax.Precision.HIGHEST)
    y = y * scale[None, :, None, None] + bias[None, :, None, None]
    return jnp.maximum(y, 0.0)


if __name__ == "__main__":
    key = jax.random.PRNGKey(0)
    ks = jax.random.split(key, 11)

    N, C_IN, H, W = 2, 4, 16, 16
    C_OUT = C_IN                       # shortcut=True requires c_out == c_in
    C_MID = int(0.5 * C_IN)

    # deterministic synthetic parameters (PyTorch conv weight layout OIHW)
    w1_oihw = 0.2 * jax.random.normal(ks[0], (C_MID, C_IN, 3, 3), jnp.float32)
    w2_oihw = 0.2 * jax.random.normal(ks[1], (C_OUT, C_MID, 3, 3), jnp.float32)

    g1 = 1.0 + 0.1 * jax.random.normal(ks[2], (C_MID,), jnp.float32)
    be1 = 0.05 * jax.random.normal(ks[3], (C_MID,), jnp.float32)
    m1 = 0.1 * jax.random.normal(ks[4], (C_MID,), jnp.float32)
    v1 = 0.5 + jnp.abs(jax.random.normal(ks[5], (C_MID,), jnp.float32))

    g2 = 1.0 + 0.1 * jax.random.normal(ks[6], (C_OUT,), jnp.float32)
    be2 = 0.05 * jax.random.normal(ks[7], (C_OUT,), jnp.float32)
    m2 = 0.1 * jax.random.normal(ks[8], (C_OUT,), jnp.float32)
    v2 = 0.5 + jnp.abs(jax.random.normal(ks[9], (C_OUT,), jnp.float32))

    # kernel params: BN scale folded into bf16 (3, 3*Cin, Cout) weights, f32 bias
    w1_f, b1_f = prepare_conv_bn(w1_oihw, g1, be1, m1, v1)
    w2_f, b2_f = prepare_conv_bn(w2_oihw, g2, be2, m2, v2)
    params = ((w1_f, b1_f), (w2_f, b2_f))

    x = jax.random.normal(ks[10], (N, C_IN, H, W), jnp.float32)

    out = darknet_bottleneck(x, params, add=True)
    out = jax.block_until_ready(out)

    # --- check 1: apples-to-apples (same bf16-rounded weights/activations, f32 math) ---
    def bf16_round(a):
        return a.astype(jnp.bfloat16).astype(jnp.float32)

    w1_q = jnp.transpose(w1_f.astype(jnp.float32).reshape(3, 3, C_IN, C_MID),
                         (3, 2, 0, 1))
    w2_q = jnp.transpose(w2_f.astype(jnp.float32).reshape(3, 3, C_MID, C_OUT),
                         (3, 2, 0, 1))
    ones_m = jnp.ones((C_MID,), jnp.float32)
    ones_o = jnp.ones((C_OUT,), jnp.float32)
    y1_q = _ref_conv_bn_relu(bf16_round(x), w1_q, ones_m, b1_f.reshape(-1))
    y2_q = _ref_conv_bn_relu(bf16_round(y1_q), w2_q, ones_o, b2_f.reshape(-1))
    ref_q = x + y2_q
    np.testing.assert_allclose(np.asarray(out), np.asarray(ref_q),
                               rtol=2e-2, atol=2e-2)

    # --- check 2: original module semantics in full f32 (looser: kernel uses bf16 MXU) ---
    s1, bb1 = fold_bn(g1, be1, m1, v1)
    s2, bb2 = fold_bn(g2, be2, m2, v2)
    ref = x + _ref_conv_bn_relu(_ref_conv_bn_relu(x, w1_oihw, s1, bb1),
                                w2_oihw, s2, bb2)
    np.testing.assert_allclose(np.asarray(out), np.asarray(ref),
                               rtol=5e-2, atol=5e-2)

    print("KERNEL_OK")
</pallas_src>

<mosaic_0001>
module attributes {stable_mosaic.version = 11 : i64} {
  func.func @_darknet_bottleneck_kernel(%arg0: i32, %arg1: memref<1x16x16x4xf32, #tpu.memory_space<vmem>>, %arg2: memref<3x12x2xbf16, #tpu.memory_space<vmem>>, %arg3: memref<1x2xf32, #tpu.memory_space<vmem>>, %arg4: memref<3x6x4xbf16, #tpu.memory_space<vmem>>, %arg5: memref<1x4xf32, #tpu.memory_space<vmem>>, %arg6: memref<1x16x16x4xf32, #tpu.memory_space<vmem>>) attributes {dimension_semantics = [#tpu.dimension_semantics<parallel>], iteration_bounds = array<i64: 2>, scalar_prefetch = 0 : i64, scratch_operands = 0 : i64, tpu.core_type = #tpu.core_type<tc>, window_params = [{transform_indices = @transform_0, window_bounds = array<i64: 1, 16, 16, 4>}, {pipeline_mode = #tpu.pipeline_mode<synchronous>, transform_indices = @transform_1, window_bounds = array<i64: 3, 12, 2>}, {pipeline_mode = #tpu.pipeline_mode<synchronous>, transform_indices = @transform_2, window_bounds = array<i64: 1, 2>}, {pipeline_mode = #tpu.pipeline_mode<synchronous>, transform_indices = @transform_3, window_bounds = array<i64: 3, 6, 4>}, {pipeline_mode = #tpu.pipeline_mode<synchronous>, transform_indices = @transform_4, window_bounds = array<i64: 1, 4>}, {transform_indices = @transform_5, window_bounds = array<i64: 1, 16, 16, 4>}]} {
    %c0 = arith.constant 0 : index
    %c0_0 = arith.constant 0 : index
    %c0_1 = arith.constant 0 : index
    %c0_2 = arith.constant 0 : index
    %0 = vector.load %arg1[%c0, %c0_0, %c0_1, %c0_2] : memref<1x16x16x4xf32, #tpu.memory_space<vmem>>, vector<1x16x16x4xf32>
    %1 = vector.shape_cast %0 : vector<1x16x16x4xf32> to vector<16x16x4xf32>
    %2 = arith.truncf %1 : vector<16x16x4xf32> to vector<16x16x4xbf16>
    %cst = arith.constant 0.000000e+00 : bf16
    %3 = vector.broadcast %cst : bf16 to vector<16x1x4xbf16>
    %cst_3 = arith.constant 0.000000e+00 : bf16
    %4 = vector.broadcast %cst_3 : bf16 to vector<16x7x4xbf16>
    %5 = tpu.concatenate %3, %2, %4 in 1 : vector<16x1x4xbf16>, vector<16x16x4xbf16>, vector<16x7x4xbf16> -> vector<16x24x4xbf16>
    %cst_4 = arith.constant 0.000000e+00 : bf16
    %6 = vector.broadcast %cst_4 : bf16 to vector<24x4xbf16>
    %7 = vector.shape_cast %5 : vector<16x24x4xbf16> to vector<384x4xbf16>
    %cst_5 = arith.constant 0.000000e+00 : bf16
    %8 = vector.broadcast %cst_5 : bf16 to vector<48x4xbf16>
    %9 = tpu.concatenate %6, %7, %8 in 0 : vector<24x4xbf16>, vector<384x4xbf16>, vector<48x4xbf16> -> vector<456x4xbf16>
    %10 = vector.extract_strided_slice %9 {offsets = [0, 0], sizes = [384, 4], strides = [1, 1]} : vector<456x4xbf16> to vector<384x4xbf16>
    %11 = vector.extract_strided_slice %9 {offsets = [1, 0], sizes = [384, 4], strides = [1, 1]} : vector<456x4xbf16> to vector<384x4xbf16>
    %12 = vector.extract_strided_slice %9 {offsets = [2, 0], sizes = [384, 4], strides = [1, 1]} : vector<456x4xbf16> to vector<384x4xbf16>
    %13 = tpu.concatenate %10, %11, %12 in 1 : vector<384x4xbf16>, vector<384x4xbf16>, vector<384x4xbf16> -> vector<384x12xbf16>
    %c0_6 = arith.constant 0 : index
    %c0_7 = arith.constant 0 : index
    %c0_8 = arith.constant 0 : index
    %14 = vector.load %arg2[%c0_6, %c0_7, %c0_8] : memref<3x12x2xbf16, #tpu.memory_space<vmem>>, vector<1x12x2xbf16>
    %15 = vector.shape_cast %14 : vector<1x12x2xbf16> to vector<12x2xbf16>
    %cst_9 = arith.constant dense<0.000000e+00> : vector<384x2xf32>
    %16 = tpu.matmul %13, %15, %cst_9 {dimension_numbers = #tpu.dot_dimension_numbers<[1], [0], [0], [1], [0, 0, 1, 1], [], []>} : vector<384x12xbf16>, vector<12x2xbf16>, vector<384x2xf32> -> vector<384x2xf32>
    %17 = vector.extract_strided_slice %9 {offsets = [24, 0], sizes = [384, 4], strides = [1, 1]} : vector<456x4xbf16> to vector<384x4xbf16>
    %18 = vector.extract_strided_slice %9 {offsets = [25, 0], sizes = [384, 4], strides = [1, 1]} : vector<456x4xbf16> to vector<384x4xbf16>
    %19 = vector.extract_strided_slice %9 {offsets = [26, 0], sizes = [384, 4], strides = [1, 1]} : vector<456x4xbf16> to vector<384x4xbf16>
    %20 = tpu.concatenate %17, %18, %19 in 1 : vector<384x4xbf16>, vector<384x4xbf16>, vector<384x4xbf16> -> vector<384x12xbf16>
    %c1 = arith.constant 1 : index
    %c0_10 = arith.constant 0 : index
    %c0_11 = arith.constant 0 : index
    %21 = vector.load %arg2[%c1, %c0_10, %c0_11] : memref<3x12x2xbf16, #tpu.memory_space<vmem>>, vector<1x12x2xbf16>
    %22 = vector.shape_cast %21 : vector<1x12x2xbf16> to vector<12x2xbf16>
    %cst_12 = arith.constant dense<0.000000e+00> : vector<384x2xf32>
    %23 = tpu.matmul %20, %22, %cst_12 {dimension_numbers = #tpu.dot_dimension_numbers<[1], [0], [0], [1], [0, 0, 1, 1], [], []>} : vector<384x12xbf16>, vector<12x2xbf16>, vector<384x2xf32> -> vector<384x2xf32>
    %24 = arith.addf %16, %23 : vector<384x2xf32>
    %25 = vector.extract_strided_slice %9 {offsets = [48, 0], sizes = [384, 4], strides = [1, 1]} : vector<456x4xbf16> to vector<384x4xbf16>
    %26 = vector.extract_strided_slice %9 {offsets = [49, 0], sizes = [384, 4], strides = [1, 1]} : vector<456x4xbf16> to vector<384x4xbf16>
    %27 = vector.extract_strided_slice %9 {offsets = [50, 0], sizes = [384, 4], strides = [1, 1]} : vector<456x4xbf16> to vector<384x4xbf16>
    %28 = tpu.concatenate %25, %26, %27 in 1 : vector<384x4xbf16>, vector<384x4xbf16>, vector<384x4xbf16> -> vector<384x12xbf16>
    %c2 = arith.constant 2 : index
    %c0_13 = arith.constant 0 : index
    %c0_14 = arith.constant 0 : index
    %29 = vector.load %arg2[%c2, %c0_13, %c0_14] : memref<3x12x2xbf16, #tpu.memory_space<vmem>>, vector<1x12x2xbf16>
    %30 = vector.shape_cast %29 : vector<1x12x2xbf16> to vector<12x2xbf16>
    %cst_15 = arith.constant dense<0.000000e+00> : vector<384x2xf32>
    %31 = tpu.matmul %28, %30, %cst_15 {dimension_numbers = #tpu.dot_dimension_numbers<[1], [0], [0], [1], [0, 0, 1, 1], [], []>} : vector<384x12xbf16>, vector<12x2xbf16>, vector<384x2xf32> -> vector<384x2xf32>
    %32 = arith.addf %24, %31 : vector<384x2xf32>
    %c0_16 = arith.constant 0 : index
    %c0_17 = arith.constant 0 : index
    %33 = vector.load %arg3[%c0_16, %c0_17] : memref<1x2xf32, #tpu.memory_space<vmem>>, vector<1x2xf32>
    %34 = vector.broadcast %33 : vector<1x2xf32> to vector<384x2xf32>
    %35 = arith.addf %32, %34 : vector<384x2xf32>
    %cst_18 = arith.constant 0.000000e+00 : f32
    %36 = vector.broadcast %cst_18 : f32 to vector<384x2xf32>
    %37 = arith.maximumf %35, %36 : vector<384x2xf32>
    %38 = tpu.iota {dimensions = array<i32: 0>} : vector<24x2xi32>
    %c16_i32 = arith.constant 16 : i32
    %39 = vector.broadcast %c16_i32 : i32 to vector<24x2xi32>
    %40 = arith.cmpi slt, %38, %39 : vector<24x2xi32>
    %41 = vector.shape_cast %37 : vector<384x2xf32> to vector<16x24x2xf32>
    %cst_19 = arith.constant 0.000000e+00 : f32
    %42 = vector.shape_cast %40 : vector<24x2xi1> to vector<1x24x2xi1>
    %43 = vector.broadcast %42 : vector<1x24x2xi1> to vector<16x24x2xi1>
    %44 = vector.broadcast %cst_19 : f32 to vector<16x24x2xf32>
    %45 = arith.select %43, %41, %44 : vector<16x24x2xi1>, vector<16x24x2xf32>
    %cst_20 = arith.constant 0.000000e+00 : bf16
    %46 = vector.broadcast %cst_20 : bf16 to vector<25x2xbf16>
    %47 = vector.shape_cast %45 : vector<16x24x2xf32> to vector<384x2xf32>
    %48 = arith.truncf %47 : vector<384x2xf32> to vector<384x2xbf16>
    %cst_21 = arith.constant 0.000000e+00 : bf16
    %49 = vector.broadcast %cst_21 : bf16 to vector<47x2xbf16>
    %50 = tpu.concatenate %46, %48, %49 in 0 : vector<25x2xbf16>, vector<384x2xbf16>, vector<47x2xbf16> -> vector<456x2xbf16>
    %51 = vector.extract_strided_slice %50 {offsets = [0, 0], sizes = [384, 2], strides = [1, 1]} : vector<456x2xbf16> to vector<384x2xbf16>
    %52 = vector.extract_strided_slice %50 {offsets = [1, 0], sizes = [384, 2], strides = [1, 1]} : vector<456x2xbf16> to vector<384x2xbf16>
    %53 = vector.extract_strided_slice %50 {offsets = [2, 0], sizes = [384, 2], strides = [1, 1]} : vector<456x2xbf16> to vector<384x2xbf16>
    %54 = tpu.concatenate %51, %52, %53 in 1 : vector<384x2xbf16>, vector<384x2xbf16>, vector<384x2xbf16> -> vector<384x6xbf16>
    %c0_22 = arith.constant 0 : index
    %c0_23 = arith.constant 0 : index
    %c0_24 = arith.constant 0 : index
    %55 = vector.load %arg4[%c0_22, %c0_23, %c0_24] : memref<3x6x4xbf16, #tpu.memory_space<vmem>>, vector<1x6x4xbf16>
    %56 = vector.shape_cast %55 : vector<1x6x4xbf16> to vector<6x4xbf16>
    %cst_25 = arith.constant dense<0.000000e+00> : vector<384x4xf32>
    %57 = tpu.matmul %54, %56, %cst_25 {dimension_numbers = #tpu.dot_dimension_numbers<[1], [0], [0], [1], [0, 0, 1, 1], [], []>} : vector<384x6xbf16>, vector<6x4xbf16>, vector<384x4xf32> -> vector<384x4xf32>
    %58 = vector.extract_strided_slice %50 {offsets = [24, 0], sizes = [384, 2], strides = [1, 1]} : vector<456x2xbf16> to vector<384x2xbf16>
    %59 = vector.extract_strided_slice %50 {offsets = [25, 0], sizes = [384, 2], strides = [1, 1]} : vector<456x2xbf16> to vector<384x2xbf16>
    %60 = vector.extract_strided_slice %50 {offsets = [26, 0], sizes = [384, 2], strides = [1, 1]} : vector<456x2xbf16> to vector<384x2xbf16>
    %61 = tpu.concatenate %58, %59, %60 in 1 : vector<384x2xbf16>, vector<384x2xbf16>, vector<384x2xbf16> -> vector<384x6xbf16>
    %c1_26 = arith.constant 1 : index
    %c0_27 = arith.constant 0 : index
    %c0_28 = arith.constant 0 : index
    %62 = vector.load %arg4[%c1_26, %c0_27, %c0_28] : memref<3x6x4xbf16, #tpu.memory_space<vmem>>, vector<1x6x4xbf16>
    %63 = vector.shape_cast %62 : vector<1x6x4xbf16> to vector<6x4xbf16>
    %cst_29 = arith.constant dense<0.000000e+00> : vector<384x4xf32>
    %64 = tpu.matmul %61, %63, %cst_29 {dimension_numbers = #tpu.dot_dimension_numbers<[1], [0], [0], [1], [0, 0, 1, 1], [], []>} : vector<384x6xbf16>, vector<6x4xbf16>, vector<384x4xf32> -> vector<384x4xf32>
    %65 = arith.addf %57, %64 : vector<384x4xf32>
    %66 = vector.extract_strided_slice %50 {offsets = [48, 0], sizes = [384, 2], strides = [1, 1]} : vector<456x2xbf16> to vector<384x2xbf16>
    %67 = vector.extract_strided_slice %50 {offsets = [49, 0], sizes = [384, 2], strides = [1, 1]} : vector<456x2xbf16> to vector<384x2xbf16>
    %68 = vector.extract_strided_slice %50 {offsets = [50, 0], sizes = [384, 2], strides = [1, 1]} : vector<456x2xbf16> to vector<384x2xbf16>
    %69 = tpu.concatenate %66, %67, %68 in 1 : vector<384x2xbf16>, vector<384x2xbf16>, vector<384x2xbf16> -> vector<384x6xbf16>
    %c2_30 = arith.constant 2 : index
    %c0_31 = arith.constant 0 : index
    %c0_32 = arith.constant 0 : index
    %70 = vector.load %arg4[%c2_30, %c0_31, %c0_32] : memref<3x6x4xbf16, #tpu.memory_space<vmem>>, vector<1x6x4xbf16>
    %71 = vector.shape_cast %70 : vector<1x6x4xbf16> to vector<6x4xbf16>
    %cst_33 = arith.constant dense<0.000000e+00> : vector<384x4xf32>
    %72 = tpu.matmul %69, %71, %cst_33 {dimension_numbers = #tpu.dot_dimension_numbers<[1], [0], [0], [1], [0, 0, 1, 1], [], []>} : vector<384x6xbf16>, vector<6x4xbf16>, vector<384x4xf32> -> vector<384x4xf32>
    %73 = arith.addf %65, %72 : vector<384x4xf32>
    %c0_34 = arith.constant 0 : index
    %c0_35 = arith.constant 0 : index
    %74 = vector.load %arg5[%c0_34, %c0_35] : memref<1x4xf32, #tpu.memory_space<vmem>>, vector<1x4xf32>
    %75 = vector.broadcast %74 : vector<1x4xf32> to vector<384x4xf32>
    %76 = arith.addf %73, %75 : vector<384x4xf32>
    %cst_36 = arith.constant 0.000000e+00 : f32
    %77 = vector.broadcast %cst_36 : f32 to vector<384x4xf32>
    %78 = arith.maximumf %76, %77 : vector<384x4xf32>
    %79 = vector.shape_cast %78 : vector<384x4xf32> to vector<16x24x4xf32>
    %80 = vector.extract_strided_slice %79 {offsets = [0, 0, 0], sizes = [16, 16, 4], strides = [1, 1, 1]} : vector<16x24x4xf32> to vector<16x16x4xf32>
    %81 = arith.addf %80, %1 : vector<16x16x4xf32>
    %82 = vector.shape_cast %81 : vector<16x16x4xf32> to vector<1x16x16x4xf32>
    %c0_37 = arith.constant 0 : index
    %c0_38 = arith.constant 0 : index
    %c0_39 = arith.constant 0 : index
    %c0_40 = arith.constant 0 : index
    %83 = vector.load %arg6[%c0_37, %c0_38, %c0_39, %c0_40] : memref<1x16x16x4xf32, #tpu.memory_space<vmem>>, vector<1x16x16x4xf32>
    tpu.vector_store %arg6[%c0_37, %c0_38, %c0_39, %c0_40], %82 {strides = array<i32>} : memref<1x16x16x4xf32, #tpu.memory_space<vmem>>, vector<1x16x16x4xf32>,
    return
  }
  func.func @transform_0(%arg0: i32) -> (i32, i32, i32, i32) {
    %c0_i32 = arith.constant 0 : i32
    %c0_i32_0 = arith.constant 0 : i32
    %c0_i32_1 = arith.constant 0 : i32
    %c0_i32_2 = arith.constant 0 : i32
    return %arg0, %c0_i32, %c0_i32_0, %c0_i32_1 : i32, i32, i32, i32
  }
  func.func @transform_1(%arg0: i32) -> (i32, i32, i32) {
    %c0_i32 = arith.constant 0 : i32
    %c0_i32_0 = arith.constant 0 : i32
    %c0_i32_1 = arith.constant 0 : i32
    %c0_i32_2 = arith.constant 0 : i32
    return %c0_i32, %c0_i32_0, %c0_i32_1 : i32, i32, i32
  }
  func.func @transform_2(%arg0: i32) -> (i32, i32) {
    %c0_i32 = arith.constant 0 : i32
    %c0_i32_0 = arith.constant 0 : i32
    %c0_i32_1 = arith.constant 0 : i32
    return %c0_i32, %c0_i32_0 : i32, i32
  }
  func.func @transform_3(%arg0: i32) -> (i32, i32, i32) {
    %c0_i32 = arith.constant 0 : i32
    %c0_i32_0 = arith.constant 0 : i32
    %c0_i32_1 = arith.constant 0 : i32
    %c0_i32_2 = arith.constant 0 : i32
    return %c0_i32, %c0_i32_0, %c0_i32_1 : i32, i32, i32
  }
  func.func @transform_4(%arg0: i32) -> (i32, i32) {
    %c0_i32 = arith.constant 0 : i32
    %c0_i32_0 = arith.constant 0 : i32
    %c0_i32_1 = arith.constant 0 : i32
    return %c0_i32, %c0_i32_0 : i32, i32
  }
  func.func @transform_5(%arg0: i32) -> (i32, i32, i32, i32) {
    %c0_i32 = arith.constant 0 : i32
    %c0_i32_0 = arith.constant 0 : i32
    %c0_i32_1 = arith.constant 0 : i32
    %c0_i32_2 = arith.constant 0 : i32
    return %arg0, %c0_i32, %c0_i32_0, %c0_i32_1 : i32, i32, i32, i32
  }
}

</mosaic_0001>

<bundles_post_ra>
// kernel: tpu_custom_call.1
= control target key start
LH: loop header
LB: loop body
LE: loop exit
PB: predicated region body
PF: predicated region fallthrough
CT: control target
= control target key end

     0   :  { %s4691_s18 = smov 0   ;;  %s6405_s0 = inlined_call_operand.vmem [shape: f32[2,16,16,4], index: 0, kind: input, shape index: {}]   ;;  %s6406_s1 = inlined_call_operand.vmem [shape: bf16[3,12,2], index: 1, kind: input, shape index: {}]   ;;  %s6407_s2 = inlined_call_operand.vmem [shape: f32[1,2], index: 2, kind: input, shape index: {}]   ;;  %s6408_s3 = inlined_call_operand.vmem [shape: bf16[3,6,4], index: 3, kind: input, shape index: {}]   ;;  %s6409_s4 = inlined_call_operand.vmem [shape: f32[1,4], index: 4, kind: input, shape index: {}]   ;;  %s6410_s5 = inlined_call_operand.vmem [shape: f32[2,16,16,4], index: 5, kind: output, shape index: {}]  }
   0x1 LB: > { %s3966_s19 = sadd.s32 4294967295, %s4654_s18   ;;  %p3970_p0 = scmp.ge.s32.totalorder %s4654_s18, 1  ;;  %s4654_s18 = sphi %s4691_s18, %s15_s18  }
   0x2   : > { %p187_p1 = scmp.lt.s32.totalorder %s4654_s18, 3 }
   0x4   : > { %p188_p2 = pnand %p3970_p0, %p187_p1 }
   0x5   : > { %p215_p3 = scmp.lt.s32.totalorder (!%p188_p2), %s3966_s19, 1  ;;  %vm418_vm0 = vcmask (!%p188_p2), 1040384   ;;  %vm419_vm1 = vsmask.f32 (!%p188_p2), 256  ;;  %vm564_vm3 = vsmask.f32 (!%p188_p2), 7424 }
   0x6   : > { %191 = sbr.rel (%p188_p2) target bundleno = 1057 (0x421), region = 40  ;;  %vm4717_vm2 = vmand (!%p188_p2), %vm418_vm0, %vm419_vm1  ;;  %vm558_vm4 = vcmask (!%p188_p2), 1043456   ;;  %vm809_vm5 = vcmask (!%p188_p2), 1046528   ;;  %s4656_s24 = smov (!%p188_p2), 4   ;;  %vm1192_vm6 = vcmask (!%p188_p2), 1045504   ;;  %vm907_vm7 = vcmask (!%p188_p2), 31744  }
   0x7   : > { %s4657_s25 = smov (!%p188_p2), 8   ;;  %vm956_vm8 = vcmask (!%p188_p2), 64512   ;;  %vm1119_vm9 = vcmask (!%p188_p2), 97280   ;;  %vm3033_vm10 = vcmask (!%p188_p2), 1042432   ;;  %vm2200_vm11 = vsmask.f32 (!%p188_p2), 4352 }
   0x8   : > { %vm2418_vm12 = vcmask (!%p188_p2), 1044480   ;;  %s4660_s11 = smov (!%p188_p2), 2   ;;  %vm2756_vm14 = vcmask (!%p188_p2), 15360   ;;  %vm2960_vm15 = vcmask (!%p188_p2), 48128  }
   0x9   : > { %vm5468_vm13 = vmand (!%p188_p2), %vm2418_vm12, %vm2200_vm11 }
   0xd   : > { %s6416_s19 = smov (!%p215_p3, %s3966_s19), 1 }
   0xe   : > { %s4141_s20 = sshll.u32 %s6416_s19, 8 }
   0xf   : > { %s4707_s23 = scalar_lea.vmem %s6405_s0, %s4141_s20  ;;  %s6249_s26 = scalar_lea.vmem %s6410_s5, %s4141_s20 }
  0x10   : > { %v228_v0 = vld [vmem:[%s4707_s23 + $0x10] sm:$0xff]  ;;  %v229_v1 = vld [vmem:[%s4707_s23 + $0x18] sm:$0xff]  ;;  %v230_v2 = vld [vmem:[%s4707_s23 + $0x20] sm:$0xff] }
  0x11   : > { %v231_v3 = vld [vmem:[%s4707_s23 + $0x28] sm:$0xff]  ;;  %v259_v4 = vpack.c.bf16 %v229_v1, %v228_v0  ;;  %v226_v5 = vld [vmem:[%s4707_s23] sm:$0xff]  ;;  %v232_v9 = vld [vmem:[%s4707_s23 + $0x30] sm:$0xff] }
  0x12   : > { %v227_v6 = vld [vmem:[%s4707_s23 + $0x8] sm:$0xff]  ;;  %v260_v7 = vpack.c.bf16 %v231_v3, %v230_v2  ;;  %v233_v10 = vld [vmem:[%s4707_s23 + $0x38] sm:$0xff]  ;;  %v234_v30 = vld [vmem:[%s4707_s23 + $0x40] sm:$0xff] }
  0x13   : > { %v258_v8 = vpack.c.bf16 %v227_v6, %v226_v5  ;;  %v282_v11 = vshrl.u32 %v259_v4, 16  ;;  %v285_v12 = vshll.u32 %v259_v4, 16  ;;  %v261_v13 = vpack.c.bf16 %v233_v10, %v232_v9  ;;  %v235_v31 = vld [vmem:[%s4707_s23 + $0x48] sm:$0xff]  ;;  %v236_v54 = vld [vmem:[%s4707_s23 + $0x50] sm:$0xff]  ;;  %v237_v55 = vld [vmem:[%s4707_s23 + $0x58] sm:$0xff] }
  0x14   : > { %v289_v14 = vshrl.u32 %v260_v7, 16  ;;  %v292_v15 = vshll.u32 %v260_v7, 16  ;;  %v262_v42 = vpack.c.bf16 %v235_v31, %v234_v30  ;;  %v238_v60 = vld [vmem:[%s4707_s23 + $0x60] sm:$0xff]  ;;  %v239_v61 = vld [vmem:[%s4707_s23 + $0x68] sm:$0xff]  ;;  %v240_v31 = vld [vmem:[%s4707_s23 + $0x70] sm:$0xff] }
  0x15   : > { %v275_v17 = vshrl.u32 %v258_v8, 16  ;;  %v278_v18 = vshll.u32 %v258_v8, 16  ;;  %v284_v19 = vrot.slane %v282_v11, 7  ;;  %v296_v20 = vshrl.u32 %v261_v13, 16 }
  0x16   : > { %v291_v21 = vrot.slane %v289_v14, 7  ;;  %v299_v25 = vshll.u32 %v261_v13, 16  ;;  %v303_v1 = vshrl.u32 %v262_v42, 16  ;;  %v263_v8 = vpack.c.bf16 %v237_v55, %v236_v54 }
  0x17   : > { %v277_v22 = vrot.slane %v275_v17, 7  ;;  %v287_v23 = vor.u32 %v285_v12, %v284_v19  ;;  %v438_v24 = vsel %vm4717_vm2, %v284_v19, 0  ;;  %v4725_v29 = vrot.slane %v296_v20, 7 }
  0x18   : > { %v294_v26 = vor.u32 %v292_v15, %v291_v21  ;;  %v439_v34 = vsel %vm4717_vm2, %v291_v21, 0  ;;  %v264_v9 = vpack.c.bf16 %v239_v61, %v238_v60  ;;  %v305_v17 = vrot.slane %v303_v1, 7 }
  0x19   : > { %v280_v27 = vor.u32 %v278_v18, %v277_v22  ;;  %v437_v28 = vsel %vm4717_vm2, %v277_v22, 0  ;;  %v4731_v32 = vsel %vm4717_vm2, 0, %v287_v23  ;;  %v301_v45 = vor.u32 %v299_v25, %v4725_v29 }
  0x1a   : > { %v487_v33 = vunpack.c.l.b16 %v437_v28  ;;  %v423_v35 = vsel %vm4717_vm2, 0, %v294_v26  ;;  %v587_v36 = vshll.u32 %v4731_v32, 16  ;;  %v591_v37 = vshrl.u32 %v4731_v32, 16 }
  0x1b   : > { %v421_v38 = vsel %vm4717_vm2, 0, %v280_v27  ;;  %v4741_v39 = vcombine.low %v438_v24, %v423_v35  ;;  %v492_v43 = vunpack.c.h.b16 %v423_v35  ;;  %v493_v46 = vunpack.c.l.b16 %v439_v34 }
  0x1c   : > { %v486_v40 = vunpack.c.h.b16 %v421_v38  ;;  %v3975_v41 = vcombine.low %v421_v38, %v421_v38  ;;  %v589_v44 = vrot.slane %v587_v36, 1  ;;  %v4764_v63 = vsel %vm4717_vm2, 0, %v301_v45 }
  0x1d   : > { %v595_v47 = vshll.u32 %v4741_v39, 16  ;;  %v4766_v0 = vpack.c.b16 %v493_v46, %v492_v43  ;;  %v815_v4 = vrot.slane %v4731_v32, 1  ;;  %v817_v5 = vrot.slane %v4741_v39, 1 }
  0x1e   : > { %v4745_v48 = vpack.c.b16 %v487_v33, %v486_v40  ;;  %v4748_v49 = vsel %vm558_vm4, 0, %v3975_v41  ;;  %v593_v50 = vor.u32 %v591_v37, %v589_v44  ;;  %v611_v13 = vshll.u32 %v4764_v63, 16  ;;  %v241_v33 = vld [vmem:[%s4707_s23 + $0x78] sm:$0xff] }
  0x1f   : > { %v571_v51 = vshll.u32 %v4748_v49, 16  ;;  %v575_v52 = vshrl.u32 %v4748_v49, 16  ;;  %v811_v53 = vrot.slane %v4748_v49, 1  ;;  %v597_v56 = vrot.slane %v595_v47, 1 }
  0x20   : > { %v579_v57 = vshll.u32 %v4745_v48, 16  ;;  %v813_v58 = vrot.slane %v4745_v48, 1  ;;  %v583_v59 = vshrl.u32 %v4745_v48, 16  ;;  %v603_v7 = vshll.u32 %v4766_v0, 16 }
  0x21   : > { %v4760_v62 = vrot.slane %v571_v51, 1  ;;  %v598_v2 = vsel %vm564_vm3, %v593_v50, %v597_v56  ;;  %v607_v12 = vshrl.u32 %v4766_v0, 16  ;;  %v306_v18 = vshll.u32 %v262_v42, 16 }
  0x22   : > { %v581_v3 = vrot.slane %v579_v57, 1  ;;  %765 = vrot.lane.b32.xlu1 %v598_v2, %s4656_s24  ;;  %v814_v10 = vsel %vm809_vm5, %v811_v53, %v813_v58  ;;  %v605_v15 = vrot.slane %v603_v7, 1  ;;  %v818_v19 = vsel %vm809_vm5, %v815_v4, %v817_v5  ;;  %v242_v2 = vld [vmem:[%s4707_s23 + $0x80] sm:$0xff] }
  0x23   : > { %v577_v6 = vor.u32 %v575_v52, %v4760_v62  ;;  %v816_v20 = vsel %vm809_vm5, %v813_v58, %v815_v4  ;;  %v440_v21 = vsel %vm4717_vm2, %v4725_v29, 0  ;;  %v599_v23 = vshrl.u32 %v4741_v39, 16 }
  0x24   : > { %v585_v11 = vor.u32 %v583_v59, %v581_v3  ;;  %v308_v24 = vor.u32 %v306_v18, %v305_v17  ;;  %v441_v25 = vsel %vm4717_vm2, %v305_v17, 0  ;;  %v609_v26 = vor.u32 %v607_v12, %v605_v15 }
  0x25   : > { %v582_v14 = vsel %vm564_vm3, %v577_v6, %v581_v3  ;;  %v613_v27 = vrot.slane %v611_v13, 1  ;;  %v499_v28 = vunpack.c.l.b16 %v441_v25  ;;  %v310_v30 = vshrl.u32 %v263_v8, 16  ;;  %v243_v3 = vld [vmem:[%s4707_s23 + $0x88] sm:$0xff] }
  0x26   : > { %761 = vrot.lane.b32.xlu0 %v582_v14, %s4656_s24  ;;  %861 = vrot.lane.b32.xlu1 %v814_v10, %s4657_s25  ;;  %v590_v22 = vsel %vm564_vm3, %v585_v11, %v589_v44  ;;  %v819_v34 = vrot.slane %v4766_v0, 1  ;;  %v425_v29 = vsel %vm4717_vm2, 0, %v308_v24  ;;  %v313_v35 = vshll.u32 %v263_v8, 16 }
  0x27   : > { %v317_v36 = vshrl.u32 %v264_v9, 16  ;;  %v498_v37 = vunpack.c.h.b16 %v425_v29  ;;  %v4799_v38 = vcombine.low %v440_v21, %v425_v29  ;;  %v312_v40 = vrot.slane %v310_v30, 7  ;;  %v244_v21 = vld [vmem:[%s4707_s23 + $0x90] sm:$0xff] }
  0x28   : > { %v320_v41 = vshll.u32 %v264_v9, 16  ;;  %v601_v42 = vor.u32 %v599_v23, %v597_v56  ;;  %v821_v43 = vrot.slane %v4764_v63, 1  ;;  %v265_v45 = vpack.c.bf16 %v241_v33, %v240_v31  ;;  %v246_v31 = vld [vmem:[%s4707_s23 + $0xa0] sm:$0xff]  ;;  %v247_v33 = vld [vmem:[%s4707_s23 + $0xa8] sm:$0xff] }
  0x29   : > { %v319_v44 = vrot.slane %v317_v36, 7  ;;  %v614_v46 = vsel %vm564_vm3, %v609_v26, %v613_v27  ;;  %v4804_v47 = vpack.c.b16 %v499_v28, %v498_v37  ;;  %v619_v50 = vshll.u32 %v4799_v38, 16 }
  0x2a   : > { %763 = vrot.lane.b32.xlu0 %v590_v22, %s4656_s24  ;;  %865 = vrot.lane.b32.xlu1 %v818_v19, %s4657_s25  ;;  %v623_v51 = vshrl.u32 %v4799_v38, 16  ;;  %v615_v52 = vshrl.u32 %v4764_v63, 16  ;;  %v315_v54 = vor.u32 %v313_v35, %v312_v40  ;;  %v324_v57 = vshrl.u32 %v265_v45, 16  ;;  %v245_v22 = vld [vmem:[%s4707_s23 + $0x98] sm:$0xff] }
  0x2b   : > { %v322_v55 = vor.u32 %v320_v41, %v319_v44  ;;  %v621_v56 = vrot.slane %v619_v50, 1  ;;  %v627_v58 = vshll.u32 %v4804_v47, 16  ;;  %v442_v59 = vsel %vm4717_vm2, %v312_v40, 0 }
  0x2c   : > { %v606_v60 = vsel %vm564_vm3, %v601_v42, %v605_v15  ;;  %v4817_v61 = vsel %vm4717_vm2, 0, %v315_v54  ;;  %v822_v4 = vsel %vm809_vm5, %v819_v34, %v821_v43  ;;  %v4824_v8 = vrot.slane %v324_v57, 7 }
  0x2d   : > { %v427_v1 = vsel %vm4717_vm2, 0, %v322_v55  ;;  %v625_v6 = vor.u32 %v623_v51, %v621_v56  ;;  %v629_v7 = vrot.slane %v627_v58, 1  ;;  %v820_v9 = vsel %vm809_vm5, %v817_v5, %v819_v34 }
  0x2e   : > { %863 = vrot.lane.b32.xlu0 %v816_v20, %s4657_s25  ;;  %769 = vrot.lane.b32.xlu1 %v614_v46, %s4656_s24  ;;  %v617_v10 = vor.u32 %v615_v52, %v613_v27  ;;  %v4829_v11 = vcombine.low %v442_v59, %v427_v1  ;;  %v635_v12 = vshll.u32 %v4817_v61, 16  ;;  %v823_v13 = vrot.slane %v4799_v38, 1 }
  0x2f   : > { %v504_v14 = vunpack.c.h.b16 %v427_v1  ;;  %v327_v15 = vshll.u32 %v265_v45, 16  ;;  %v266_v17 = vpack.c.bf16 %v243_v3, %v242_v2  ;;  %v630_v18 = vsel %vm564_vm3, %v625_v6, %v629_v7  ;;  %v249_v6 = vld [vmem:[%s4707_s23 + $0xb8] sm:$0xff] }
  0x30   : > { %v825_v5 = vrot.slane %v4804_v47, 1  ;;  %v639_v19 = vshrl.u32 %v4817_v61, 16  ;;  %v443_v20 = vsel %vm4717_vm2, %v319_v44, 0  ;;  %v637_v23 = vrot.slane %v635_v12, 1 }
  0x31   : > { %v643_v24 = vshll.u32 %v4829_v11, 16  ;;  %v329_v25 = vor.u32 %v327_v15, %v4824_v8  ;;  %v505_v26 = vunpack.c.l.b16 %v443_v20  ;;  %v631_v27 = vshrl.u32 %v4804_v47, 16 }
  0x32   : > { %767 = vrot.lane.b32.xlu0 %v606_v60, %s4656_s24  ;;  %869 = vrot.lane.b32.xlu1 %v822_v4, %s4657_s25  ;;  %v331_v30 = vshrl.u32 %v266_v17, 16  ;;  %v267_v34 = vpack.c.bf16 %v245_v22, %v244_v21  ;;  %v622_v29 = vsel %vm564_vm3, %v617_v10, %v621_v56  ;;  %v824_v35 = vsel %vm809_vm5, %v821_v43, %v823_v13  ;;  %v248_v4 = vld [vmem:[%s4707_s23 + $0xb0] sm:$0xff] }
  0x33   : > { %v4846_v28 = vpack.c.b16 %v505_v26, %v504_v14  ;;  %v4855_v36 = vsel %vm4717_vm2, 0, %v329_v25  ;;  %v334_v37 = vshll.u32 %v266_v17, 16  ;;  %v826_v40 = vsel %vm809_vm5, %v823_v13, %v825_v5 }
  0x34   : > { %v641_v41 = vor.u32 %v639_v19, %v637_v23  ;;  %v645_v42 = vrot.slane %v643_v24, 1  ;;  %v633_v45 = vor.u32 %v631_v27, %v629_v7  ;;  %v827_v46 = vrot.slane %v4817_v61, 1 }
  0x35   : > { %v651_v44 = vshll.u32 %v4846_v28, 16  ;;  %v333_v50 = vrot.slane %v331_v30, 7  ;;  %v268_v51 = vpack.c.bf16 %v247_v33, %v246_v31  ;;  %v829_v43 = vrot.slane %v4829_v11, 1 }
  0x36   : > { %867 = vrot.lane.b32.xlu0 %v820_v9, %s4657_s25  ;;  %773 = vrot.lane.b32.xlu1 %v630_v18, %s4656_s24  ;;  %v444_v52 = vsel %vm4717_vm2, %v4824_v8, 0  ;;  %v659_v54 = vshll.u32 %v4855_v36, 16  ;;  %v338_v55 = vshrl.u32 %v267_v34, 16  ;;  %v655_v56 = vshrl.u32 %v4846_v28, 16 }
  0x37   : > { %v653_v57 = vrot.slane %v651_v44, 1  ;;  %v336_v58 = vor.u32 %v334_v37, %v333_v50  ;;  %v445_v59 = vsel %vm4717_vm2, %v333_v50, 0  ;;  %v646_v60 = vsel %vm564_vm3, %v641_v41, %v645_v42 }
  0x38   : > { %v511_v1 = vunpack.c.l.b16 %v445_v59  ;;  %v340_v2 = vrot.slane %v338_v55, 7  ;;  %v341_v3 = vshll.u32 %v267_v34, 16  ;;  %v345_v8 = vshrl.u32 %v268_v51, 16  ;;  %v251_v55 = vld [vmem:[%s4707_s23 + $0xc8] sm:$0xff] }
  0x39   : > { %v429_v7 = vsel %vm4717_vm2, 0, %v336_v58  ;;  %v348_v9 = vshll.u32 %v268_v51, 16  ;;  %v638_v10 = vsel %vm564_vm3, %v633_v45, %v637_v23  ;;  %v647_v12 = vshrl.u32 %v4829_v11, 16 }
  0x3a   : > { %771 = vrot.lane.b32.xlu0 %v622_v29, %s4656_s24  ;;  %873 = vrot.lane.b32.xlu1 %v826_v40, %s4657_s25  ;;  %v510_v13 = vunpack.c.h.b16 %v429_v7  ;;  %v4880_v14 = vcombine.low %v444_v52, %v429_v7  ;;  %v657_v15 = vor.u32 %v655_v56, %v653_v57  ;;  %v661_v17 = vrot.slane %v659_v54, 1  ;;  %v250_v54 = vld [vmem:[%s4707_s23 + $0xc0] sm:$0xff] }
  0x3b   : > { %v347_v18 = vrot.slane %v345_v8, 7  ;;  %v269_v19 = vpack.c.bf16 %v249_v6, %v248_v4  ;;  %v830_v20 = vsel %vm809_vm5, %v827_v46, %v829_v43  ;;  %v343_v23 = vor.u32 %v341_v3, %v340_v2  ;;  %v254_v8 = vld [vmem:[%s4707_s23 + $0xe0] sm:$0xff] }
  0x3c   : > { %v4886_v21 = vpack.c.b16 %v511_v1, %v510_v13  ;;  %v667_v22 = vshll.u32 %v4880_v14, 16  ;;  %v828_v25 = vsel %vm809_vm5, %v825_v5, %v827_v46  ;;  %v649_v26 = vor.u32 %v647_v12, %v645_v42  ;;  %v252_v1 = vld [vmem:[%s4707_s23 + $0xd0] sm:$0xff] }
  0x3d   : > { %v350_v24 = vor.u32 %v348_v9, %v347_v18  ;;  %v831_v27 = vrot.slane %v4846_v28, 1  ;;  %v833_v30 = vrot.slane %v4855_v36, 1  ;;  %v662_v31 = vsel %vm564_vm3, %v657_v15, %v661_v17  ;;  %v255_v9 = vld [vmem:[%s4707_s23 + $0xe8] sm:$0xff] }
  0x3e   : > { %871 = vrot.lane.b32.xlu0 %v824_v35, %s4657_s25  ;;  %777 = vrot.lane.b32.xlu1 %v646_v60, %s4656_s24  ;;  %v671_v33 = vshrl.u32 %v4880_v14, 16  ;;  %v446_v34 = vsel %vm4717_vm2, %v340_v2, 0  ;;  %v352_v29 = vshrl.u32 %v269_v19, 16  ;;  %v669_v35 = vrot.slane %v667_v22, 1  ;;  %v253_v2 = vld [vmem:[%s4707_s23 + $0xd8] sm:$0xff] }
  0x3f   : > { %v675_v5 = vshll.u32 %v4886_v21, 16  ;;  %v4903_v37 = vsel %vm4717_vm2, 0, %v343_v23  ;;  %v431_v40 = vsel %vm4717_vm2, 0, %v350_v24  ;;  %v447_v41 = vsel %vm4717_vm2, %v347_v18, 0 }
  0x40   : > { %v654_v42 = vsel %vm564_vm3, %v649_v26, %v653_v57  ;;  %v663_v44 = vshrl.u32 %v4855_v36, 16  ;;  %v355_v45 = vshll.u32 %v269_v19, 16  ;;  %v516_v46 = vunpack.c.h.b16 %v431_v40 }
  0x41   : > { %v4913_v50 = vcombine.low %v446_v34, %v431_v40  ;;  %v683_v51 = vshll.u32 %v4903_v37, 16  ;;  %v354_v52 = vrot.slane %v352_v29, 7  ;;  %v834_v56 = vsel %vm809_vm5, %v831_v27, %v833_v30 }
  0x42   : > { %775 = vrot.lane.b32.xlu0 %v638_v10, %s4656_s24  ;;  %877 = vrot.lane.b32.xlu1 %v830_v20, %s4657_s25  ;;  %v673_v58 = vor.u32 %v671_v33, %v669_v35  ;;  %v677_v57 = vrot.slane %v675_v5, 1  ;;  %v517_v59 = vunpack.c.l.b16 %v447_v41  ;;  %v832_v60 = vsel %vm809_vm5, %v829_v43, %v831_v27 }
  0x43   : > { %v665_v3 = vor.u32 %v663_v44, %v661_v17  ;;  %v835_v4 = vrot.slane %v4880_v14, 1  ;;  %v687_v6 = vshrl.u32 %v4903_v37, 16  ;;  %v270_v7 = vpack.c.bf16 %v251_v55, %v250_v54 }
  0x44   : > { %v685_v10 = vrot.slane %v683_v51, 1  ;;  %v691_v12 = vshll.u32 %v4913_v50, 16  ;;  %v357_v13 = vor.u32 %v355_v45, %v354_v52  ;;  %v4931_v15 = vpack.c.b16 %v517_v59, %v516_v46 }
  0x45   : > { %v678_v43 = vsel %vm564_vm3, %v673_v58, %v677_v57  ;;  %v837_v18 = vrot.slane %v4886_v21, 1  ;;  %v359_v17 = vshrl.u32 %v270_v7, 16  ;;  %v271_v19 = vpack.c.bf16 %v253_v2, %v252_v1  ;;  %v256_v1 = vld [vmem:[%s4707_s23 + $0xf0] sm:$0xff]  ;;  %v257_v2 = vld [vmem:[%s4707_s23 + $0xf8] sm:$0xff] }
  0x46   : > { %875 = vrot.lane.b32.xlu0 %v828_v25, %s4657_s25  ;;  %781 = vrot.lane.b32.xlu1 %v662_v31, %s4656_s24  ;;  %v362_v20 = vshll.u32 %v270_v7, 16  ;;  %v272_v22 = vpack.c.bf16 %v255_v9, %v254_v8  ;;  %v670_v23 = vsel %vm564_vm3, %v665_v3, %v669_v35  ;;  %v679_v24 = vshrl.u32 %v4886_v21, 16 }
  0x47   : > { %v361_v25 = vrot.slane %v359_v17, 7  ;;  %v689_v26 = vor.u32 %v687_v6, %v685_v10  ;;  %v693_v27 = vrot.slane %v691_v12, 1  ;;  %v4941_v31 = vsel %vm4717_vm2, 0, %v357_v13 }
  0x48   : > { %v699_v33 = vshll.u32 %v4931_v15, 16  ;;  %v838_v34 = vsel %vm809_vm5, %v835_v4, %v837_v18  ;;  %v836_v29 = vsel %vm809_vm5, %v833_v30, %v835_v4  ;;  %v366_v40 = vshrl.u32 %v271_v19, 16 }
  0x49   : > { %v364_v5 = vor.u32 %v362_v20, %v361_v25  ;;  %v839_v35 = vrot.slane %v4903_v37, 1  ;;  %v448_v41 = vsel %vm4717_vm2, %v354_v52, 0  ;;  %v373_v44 = vshrl.u32 %v272_v22, 16 }
  0x4a   : > { %779 = vrot.lane.b32.xlu0 %v654_v42, %s4656_s24  ;;  %881 = vrot.lane.b32.xlu1 %v834_v56, %s4657_s25  ;;  %v449_v42 = vsel %vm4717_vm2, %v361_v25, 0  ;;  %v681_v45 = vor.u32 %v679_v24, %v677_v57  ;;  %v841_v46 = vrot.slane %v4913_v50, 1  ;;  %v707_v30 = vshll.u32 %v4941_v31, 16 }
  0x4b   : > { %v433_v51 = vsel %vm4717_vm2, 0, %v364_v5  ;;  %v694_v52 = vsel %vm564_vm3, %v689_v26, %v693_v27  ;;  %v701_v54 = vrot.slane %v699_v33, 1  ;;  %v703_v55 = vshrl.u32 %v4931_v15, 16 }
  0x4c   : > { %v369_v56 = vshll.u32 %v271_v19, 16  ;;  %v522_v58 = vunpack.c.h.b16 %v433_v51  ;;  %v523_v59 = vunpack.c.l.b16 %v449_v42  ;;  %v368_v57 = vrot.slane %v366_v40, 7 }
  0x4d   : > { %v375_v3 = vrot.slane %v373_v44, 7  ;;  %v376_v4 = vshll.u32 %v272_v22, 16  ;;  %v695_v6 = vshrl.u32 %v4913_v50, 16  ;;  %v686_v7 = vsel %vm564_vm3, %v681_v45, %v685_v10 }
  0x4e   : > { %879 = vrot.lane.b32.xlu0 %v832_v60, %s4657_s25  ;;  %785 = vrot.lane.b32.xlu1 %v678_v43, %s4656_s24  ;;  %v4959_v60 = vcombine.low %v448_v41, %v433_v51  ;;  %v705_v8 = vor.u32 %v703_v55, %v701_v54  ;;  %v709_v9 = vrot.slane %v707_v30, 1  ;;  %v273_v12 = vpack.c.bf16 %v257_v2, %v256_v1 }
  0x4f   : > { %v842_v13 = vsel %vm809_vm5, %v839_v35, %v841_v46  ;;  %v4968_v43 = vpack.c.b16 %v523_v59, %v522_v58  ;;  %v371_v19 = vor.u32 %v369_v56, %v368_v57  ;;  %v378_v20 = vor.u32 %v376_v4, %v375_v3 }
  0x50   : > { %v715_v17 = vshll.u32 %v4959_v60, 16  ;;  %v697_v22 = vor.u32 %v695_v6, %v693_v27  ;;  %v845_v24 = vrot.slane %v4941_v31, 1  ;;  %v840_v10 = vsel %vm809_vm5, %v837_v18, %v839_v35 }
  0x51   : > { %v710_v25 = vsel %vm564_vm3, %v705_v8, %v709_v9  ;;  %v380_v26 = vshrl.u32 %v273_v12, 16  ;;  %v4981_v5 = vsel %vm4717_vm2, 0, %v371_v19  ;;  %v711_v27 = vshrl.u32 %v4941_v31, 16 }
  0x52   : > { %783 = vrot.lane.b32.xlu0 %v670_v23, %s4656_s24  ;;  %885 = vrot.lane.b32.xlu1 %v838_v34, %s4657_s25  ;;  %v843_v23 = vrot.slane %v4931_v15, 1  ;;  %v717_v33 = vrot.slane %v715_v17, 1  ;;  %v719_v34 = vshrl.u32 %v4959_v60, 16  ;;  %v435_v40 = vsel %vm4717_vm2, 0, %v378_v20 }
  0x53   : > { %v450_v18 = vsel %vm4717_vm2, %v368_v57, 0  ;;  %v451_v35 = vsel %vm4717_vm2, %v375_v3, 0  ;;  %v702_v41 = vsel %vm564_vm3, %v697_v22, %v701_v54  ;;  %v528_v44 = vunpack.c.h.b16 %v435_v40  ;;  %v4613_v54 = vld [vmem:[%s6406_s1 + $0x10] sm:$0x3f]  }
  0x54   : > { %v846_v42 = vsel %vm809_vm5, %v843_v23, %v845_v24  ;;  %v731_v45 = vshll.u32 %v4981_v5, 16  ;;  %v382_v30 = vrot.slane %v380_v26, 7  ;;  %v383_v51 = vshll.u32 %v273_v12, 16 }
  0x55   : > { %v721_v55 = vor.u32 %v719_v34, %v717_v33  ;;  %v4998_v58 = vcombine.low %v450_v18, %v435_v40  ;;  %v529_v59 = vunpack.c.l.b16 %v451_v35  ;;  %v713_v57 = vor.u32 %v711_v27, %v709_v9 }
  0x56   : > { %883 = vrot.lane.b32.xlu0 %v836_v29, %s4657_s25  ;;  %789 = vrot.lane.b32.xlu1 %v694_v52, %s4656_s24  ;;  %v723_v29 = vshll.u32 %v4968_v43, 16  ;;  %v4612_v52 = vld [vmem:[%s6406_s1 + $0x8] sm:$0x3f]   ;;  %v844_v1 = vsel %vm809_vm5, %v841_v46, %v843_v23  ;;  %v847_v2 = vrot.slane %v4959_v60, 1  ;;  %v735_v3 = vshrl.u32 %v4981_v5, 16 }
  0x57   : > { %v849_v4 = vrot.slane %v4968_v43, 1  ;;  %v733_v6 = vrot.slane %v731_v45, 1  ;;  %4593 = vmatprep.subr.msk.bf16.mxu0 %vm1192_vm6, %v4612_v52  ;;  %v1194_v8 = vsel %vm1192_vm6, %v4612_v52, 0  ;;  %v739_v12 = vshll.u32 %v4998_v58, 16 }
  0x58   : > { %v725_v56 = vrot.slane %v723_v29, 1  ;;  %v5013_v46 = vpack.c.b16 %v529_v59, %v528_v44  ;;  %4294 = vmatpush3.bf16.msra.mxu0 %v1194_v8  ;;  %v718_v17 = vsel %vm564_vm3, %v713_v57, %v717_v33  ;;  %v727_v20 = vshrl.u32 %v4968_v43, 16 }
  0x59   : > { %4595 = vmatprep.subr.msk.bf16.mxu0 %vm1192_vm6, %v4613_v54  ;;  %v737_v19 = vor.u32 %v735_v3, %v733_v6  ;;  %v850_v22 = vsel %vm809_vm5, %v847_v2, %v849_v4  ;;  %v741_v23 = vrot.slane %v739_v12, 1  ;;  %v452_v26 = vsel %vm4717_vm2, %v382_v30, 0 }
  0x5a   : > { %787 = vrot.lane.b32.xlu0 %v686_v7, %s4656_s24  ;;  %889 = vrot.lane.b32.xlu1 %v842_v13, %s4657_s25  ;;  %v385_v7 = vor.u32 %v383_v51, %v382_v30  ;;  %v726_v9 = vsel %vm564_vm3, %v721_v55, %v725_v56  ;;  %v5016_v13 = vsel %vm1192_vm6, %v4613_v54, 0  ;;  %v851_v34 = vrot.slane %v4981_v5, 1 }
  0x5b   : > { %v848_v33 = vsel %vm809_vm5, %v845_v24, %v847_v2  ;;  %v729_v29 = vor.u32 %v727_v20, %v725_v56  ;;  %v853_v27 = vrot.slane %v4998_v58, 1  ;;  %v742_v18 = vsel %vm564_vm3, %v737_v19, %v741_v23 }
  0x5c   : > { %v3983_v16 = vcombine.low %v452_v26, %v452_v26  ;;  %v743_v44 = vshrl.u32 %v4998_v58, 16  ;;  %v852_v52 = vsel %vm809_vm5, %v849_v4, %v851_v34  ;;  %v855_v54 = vrot.slane %v5013_v46, 1 }
  0x5d   : > { %v854_v24 = vsel %vm809_vm5, %v851_v34, %v853_v27 }
  0x5e   : > { %887 = vrot.lane.b32.xlu0 %v840_v10, %s4657_s25  ;;  %793 = vrot.lane.b32.xlu1 %v710_v25, %s4656_s24  ;;  %v5026_v10 = vsel %vm4717_vm2, 0, %v385_v7  ;;  %v747_v25 = vshll.u32 %v5013_v46, 16  ;;  %v5045_v51 = vsel %vm558_vm4, %v3983_v16, 0  ;;  %v745_v55 = vor.u32 %v743_v44, %v741_v23  ;;  %v4614_v7 = vld [vmem:[%s6406_s1] sm:$0x3f]  }
  0x5f   : > { %v755_v40 = vshll.u32 %v5026_v10, 16  ;;  %v1010_v56 = vshll.u32 %v5045_v51, 16  ;;  %v857_v57 = vrot.slane %v5026_v10, 1  ;;  %v1014_v3 = vshrl.u32 %v5045_v51, 16  ;;  %4594 = vmatprep.subr.msk.bf16.mxu1 %vm1192_vm6, %v4614_v7 }
  0x60   : > { %v749_v35 = vrot.slane %v747_v25, 1  ;;  %v1007_v4 = vshrl.u32 %v5026_v10, 16  ;;  %v856_v8 = vsel %vm809_vm5, %v853_v27, %v855_v54  ;;  %v1022_v20 = vrot.slane %v5045_v51, 1 }
  0x61   : > { %v757_v30 = vrot.slane %v755_v40, 1  ;;  %v1012_v2 = vrot.slane %v1010_v56, 1 }
  0x62   : > { %791 = vrot.lane.b32.xlu0 %v702_v41, %s4656_s24  ;;  %893 = vrot.lane.b32.xlu1 %v846_v42, %s4657_s25  ;;  %v751_v41 = vshrl.u32 %v5013_v46, 16  ;;  %v734_v42 = vsel %vm564_vm3, %v729_v29, %v733_v6  ;;  %v858_v6 = vsel %vm809_vm5, %v855_v54, %v857_v57  ;;  %v1023_v25 = vsel %vm809_vm5, %v857_v57, %v1022_v20 }
  0x63   : > { %v1009_v12 = vor.u32 %v1007_v4, %v757_v30 }
  0x64   : > { %v753_v45 = vor.u32 %v751_v41, %v749_v35 }
  0x65   : > { %v1013_v19 = vsel %vm564_vm3, %v1009_v12, %v1012_v2 }
  0x66   : > { %891 = vrot.lane.b32.xlu0 %v844_v1, %s4657_s25  ;;  %797 = vrot.lane.b32.xlu1 %v726_v9, %s4656_s24  ;;  %v758_v59 = vsel %vm564_vm3, %v753_v45, %v757_v30  ;;  %v750_v1 = vsel %vm564_vm3, %v745_v55, %v749_v35  ;;  %v1016_v9 = vor.u32 %v1014_v3, %v1012_v2 }
  0x6a   : > { %795 = vrot.lane.b32.xlu0 %v718_v17, %s4656_s24  ;;  %897 = vrot.lane.b32.xlu1 %v850_v22, %s4657_s25  ;;  %v1475_v17 = vsel %vm1192_vm6, %v4614_v7, 0  ;;  %v4658_v22 = vmov 0  }
  0x6b   : > { %4344 = vmatpush3.bf16.msra.mxu1 %v1475_v17  ;;  %v5072_v23 = vrot.slane %v4658_v22, 1 }
  0x6d   : > { %v812_v26 = vsel %vm809_vm5, %v5072_v23, %v811_v53  ;;  %v574_v34 = vsel %vm564_vm3, %v5072_v23, %v4760_v62  ;;  %v1708_v53 = vsel %vm809_vm5, %v1022_v20, %v5072_v23 }
  0x6e   : > { %895 = vrot.lane.b32.xlu0 %v848_v33, %s4657_s25  ;;  %801 = vrot.lane.b32.xlu1 %v742_v18, %s4656_s24  ;;  %v1702_v33 = vsel %vm564_vm3, %v1016_v9, %v5072_v23 }
  0x72   : > { %799 = vrot.lane.b32.xlu0 %v734_v42, %s4656_s24  ;;  %901 = vrot.lane.b32.xlu1 %v854_v24, %s4657_s25 }
  0x76   : > { %899 = vrot.lane.b32.xlu0 %v852_v52, %s4657_s25  ;;  %805 = vrot.lane.b32.xlu1 %v758_v59, %s4656_s24 }
  0x7a   : > { %803 = vrot.lane.b32.xlu0 %v750_v1, %s4656_s24  ;;  %905 = vrot.lane.b32.xlu1 %v858_v6, %s4657_s25 }
  0x7e   : > { %903 = vrot.lane.b32.xlu0 %v856_v8, %s4657_s25  ;;  %1019 = vrot.lane.b32.xlu1 %v1016_v9, %s4656_s24 }
  0x82   : > { %1017 = vrot.lane.b32.xlu0 %v1013_v19, %s4656_s24  ;;  %1026 = vrot.lane.b32.xlu1 %v1022_v20, %s4657_s25 }
  0x86   : > { %1024 = vrot.lane.b32.xlu0 %v1023_v25, %s4657_s25  ;;  %859 = vrot.lane.b32.xlu1 %v812_v26, %s4657_s25 }
  0x8a   : > { %759 = vrot.lane.b32.xlu0 %v574_v34, %s4656_s24  ;;  %1706 = vrot.lane.b32.xlu1 %v5072_v23, %s4656_s24 }
  0x8e   : > { %1704 = vrot.lane.b32.xlu0 %v1702_v33, %s4656_s24  ;;  %1712 = vrot.lane.b32.xlu1 %v5072_v23, %s4657_s25 }
  0x92   : > { %1710 = vrot.lane.b32.xlu0 %v1708_v53, %s4657_s25 }
  0x94   : > { %v766_v62 = vpop.permute.xlu1 %765 }
  0x95   : > { %v915_v41 = vsel %vm907_vm7, %v4731_v32, %v766_v62 }
  0x98   : > { %v762_v29 = vpop.permute.xlu0 %761  ;;  %v862_v27 = vpop.permute.xlu1 %861 }
  0x99   : > { %v911_v40 = vsel %vm907_vm7, %v4748_v49, %v762_v29 }
  0x9a   : > { %v5102_v16 = vsel %vm956_vm8, %v911_v40, %v862_v27 }
  0x9b   : > { %v1065_v30 = vrot.slane %v5102_v16, 4 }
  0x9c   : > { %v764_v18 = vpop.permute.xlu0 %763  ;;  %v866_v35 = vpop.permute.xlu1 %865 }
  0x9d   : > { %v5105_v42 = vsel %vm956_vm8, %v915_v41, %v866_v35  ;;  %v913_v44 = vsel %vm907_vm7, %v4745_v48, %v764_v18 }
  0x9e   : > { %v1068_v52 = vrot.slane %v5105_v42, 4 }
  0xa0   : > { %v864_v24 = vpop.permute.xlu0 %863  ;;  %v770_v49 = vpop.permute.xlu1 %769 }
  0xa1   : > { %v5110_v45 = vsel %vm956_vm8, %v913_v44, %v864_v24  ;;  %v919_v55 = vsel %vm907_vm7, %v4766_v0, %v770_v49 }
  0xa2   : > { %v1066_v32 = vrot.slane %v5110_v45, 4 }
  0xa4   : > { %v768_v56 = vpop.permute.xlu0 %767  ;;  %v1067_v59 = vsel %vm558_vm4, %v1065_v30, %v1066_v32  ;;  %v1069_v48 = vsel %vm558_vm4, %v1066_v32, %v1068_v52  ;;  %v870_v54 = vpop.permute.xlu1 %869 }
  0xa5   : > { %4295 = vmatprep.mubr.msk.bf16.mxu0 %vm1119_vm9, %v1067_v59  ;;  %v5122_v57 = vsel %vm956_vm8, %v919_v55, %v870_v54  ;;  %v917_v1 = vsel %vm907_vm7, %v4741_v39, %v768_v56 }
  0xa6   : > { %4296 = vmatmul.mubr.msk.bf16.vlgmr.msra.gmra.mrb[0].mxu0 %vm1119_vm9, %v1069_v48  ;;  %v1072_v4 = vrot.slane %v5122_v57, 4 }
  0xa7   : > { %4394 = vmatpush3.bf16.msra.mxu0 %v5016_v13 }
  0xa8   : > { %v868_v2 = vpop.permute.xlu0 %867  ;;  %v774_v3 = vpop.permute.xlu1 %773 }
  0xa9   : > { %v5128_v0 = vsel %vm956_vm8, %v917_v1, %v868_v2  ;;  %v923_v7 = vsel %vm907_vm7, %v4799_v38, %v774_v3 }
  0xaa   : > { %v1070_v6 = vrot.slane %v5128_v0, 4 }
  0xac   : > { %v772_v8 = vpop.permute.xlu0 %771  ;;  %v1071_v9 = vsel %vm558_vm4, %v1068_v52, %v1070_v6  ;;  %v1073_v13 = vsel %vm558_vm4, %v1070_v6, %v1072_v4  ;;  %v874_v39 = vpop.permute.xlu1 %873 }
  0xad   : > { %4299 = vmatprep.mubr.msk.bf16.mxu0 %vm1119_vm9, %v1071_v9  ;;  %v5139_v12 = vsel %vm956_vm8, %v923_v7, %v874_v39  ;;  %v921_v17 = vsel %vm907_vm7, %v4764_v63, %v772_v8 }
  0xae   : > { %4300 = vmatmul.mubr.msk.bf16.gmra.mrb[4].mxu0 %vm1119_vm9, %v1073_v13  ;;  %v1076_v22 = vrot.slane %v5139_v12, 4 }
  0xb0   : > { %v872_v19 = vpop.permute.xlu0 %871  ;;  %v778_v38 = vpop.permute.xlu1 %777 }
  0xb1   : > { %v5144_v20 = vsel %vm956_vm8, %v921_v17, %v872_v19  ;;  %v927_v26 = vsel %vm907_vm7, %v4817_v61, %v778_v38 }
  0xb2   : > { %v1074_v25 = vrot.slane %v5144_v20, 4 }
  0xb4   : > { %v776_v34 = vpop.permute.xlu0 %775  ;;  %v1075_v33 = vsel %vm558_vm4, %v1072_v4, %v1074_v25  ;;  %v1077_v53 = vsel %vm558_vm4, %v1074_v25, %v1076_v22  ;;  %v878_v63 = vpop.permute.xlu1 %877 }
  0xb5   : > { %4303 = vmatprep.mubr.msk.bf16.mxu0 %vm1119_vm9, %v1075_v33  ;;  %v5155_v62 = vsel %vm956_vm8, %v927_v26, %v878_v63  ;;  %v925_v29 = vsel %vm907_vm7, %v4804_v47, %v776_v34 }
  0xb6   : > { %4304 = vmatmul.mubr.msk.bf16.gmra.mrb[8].mxu0 %vm1119_vm9, %v1077_v53  ;;  %v1080_v18 = vrot.slane %v5155_v62, 4 }
  0xb8   : > { %v876_v27 = vpop.permute.xlu0 %875  ;;  %v782_v61 = vpop.permute.xlu1 %781 }
  0xb9   : > { %v5160_v40 = vsel %vm956_vm8, %v925_v29, %v876_v27  ;;  %v931_v41 = vsel %vm907_vm7, %v4846_v28, %v782_v61 }
  0xba   : > { %v1078_v35 = vrot.slane %v5160_v40, 4 }
  0xbc   : > { %v780_v44 = vpop.permute.xlu0 %779  ;;  %v1079_v24 = vsel %vm558_vm4, %v1076_v22, %v1078_v35  ;;  %v1081_v49 = vsel %vm558_vm4, %v1078_v35, %v1080_v18  ;;  %v882_v47 = vpop.permute.xlu1 %881 }
  0xbd   : > { %4307 = vmatprep.mubr.msk.bf16.mxu0 %vm1119_vm9, %v1079_v24  ;;  %v5171_v30 = vsel %vm956_vm8, %v931_v41, %v882_v47  ;;  %v929_v52 = vsel %vm907_vm7, %v4829_v11, %v780_v44 }
  0xbe   : > { %4308 = vmatmul.mubr.msk.bf16.gmra.mrb[12].mxu0 %vm1119_vm9, %v1081_v49  ;;  %v1084_v56 = vrot.slane %v5171_v30, 4 }
  0xc0   : > { %v880_v32 = vpop.permute.xlu0 %879  ;;  %v786_v28 = vpop.permute.xlu1 %785 }
  0xc1   : > { %v5176_v55 = vsel %vm956_vm8, %v929_v52, %v880_v32  ;;  %v935_v48 = vsel %vm907_vm7, %v4880_v14, %v786_v28 }
  0xc2   : > { %v1082_v59 = vrot.slane %v5176_v55, 4 }
  0xc4   : > { %v784_v54 = vpop.permute.xlu0 %783  ;;  %v1083_v1 = vsel %vm558_vm4, %v1080_v18, %v1082_v59  ;;  %v1085_v2 = vsel %vm558_vm4, %v1082_v59, %v1084_v56  ;;  %v886_v11 = vpop.permute.xlu1 %885 }
  0xc5   : > { %4311 = vmatprep.mubr.msk.bf16.mxu0 %vm1119_vm9, %v1083_v1  ;;  %v5187_v3 = vsel %vm956_vm8, %v935_v48, %v886_v11  ;;  %v933_v4 = vsel %vm907_vm7, %v4855_v36, %v784_v54 }
  0xc6   : > { %4312 = vmatmul.mubr.msk.bf16.gmra.mrb[16].mxu0 %vm1119_vm9, %v1085_v2  ;;  %v1088_v8 = vrot.slane %v5187_v3, 4 }
  0xc8   : > { %v884_v6 = vpop.permute.xlu0 %883  ;;  %v790_v14 = vpop.permute.xlu1 %789 }
  0xc9   : > { %v5192_v7 = vsel %vm956_vm8, %v933_v4, %v884_v6  ;;  %v939_v13 = vsel %vm907_vm7, %v4903_v37, %v790_v14 }
  0xca   : > { %v1086_v9 = vrot.slane %v5192_v7, 4 }
  0xcc   : > { %v788_v39 = vpop.permute.xlu0 %787  ;;  %v1087_v17 = vsel %vm558_vm4, %v1084_v56, %v1086_v9  ;;  %v1089_v19 = vsel %vm558_vm4, %v1086_v9, %v1088_v8  ;;  %v890_v36 = vpop.permute.xlu1 %889 }
  0xcd   : > { %4315 = vmatprep.mubr.msk.bf16.mxu0 %vm1119_vm9, %v1087_v17  ;;  %v5203_v38 = vsel %vm956_vm8, %v939_v13, %v890_v36  ;;  %v937_v22 = vsel %vm907_vm7, %v4886_v21, %v788_v39 }
  0xce   : > { %4316 = vmatmul.mubr.msk.bf16.gmra.mrb[20].mxu0 %vm1119_vm9, %v1089_v19  ;;  %v1092_v34 = vrot.slane %v5203_v38, 4 }
  0xd0   : > { %v888_v25 = vpop.permute.xlu0 %887  ;;  %v794_v37 = vpop.permute.xlu1 %793 }
  0xd1   : > { %v5208_v26 = vsel %vm956_vm8, %v937_v22, %v888_v25  ;;  %v943_v53 = vsel %vm907_vm7, %v4931_v15, %v794_v37 }
  0xd2   : > { %v1090_v33 = vrot.slane %v5208_v26, 4 }
  0xd4   : > { %v792_v63 = vpop.permute.xlu0 %791  ;;  %v1091_v29 = vsel %vm558_vm4, %v1088_v8, %v1090_v33  ;;  %v1093_v27 = vsel %vm558_vm4, %v1090_v33, %v1092_v34  ;;  %v894_v21 = vpop.permute.xlu1 %893 }
  0xd5   : > { %4319 = vmatprep.mubr.msk.bf16.mxu0 %vm1119_vm9, %v1091_v29  ;;  %v5219_v61 = vsel %vm956_vm8, %v943_v53, %v894_v21  ;;  %v941_v18 = vsel %vm907_vm7, %v4913_v50, %v792_v63 }
  0xd6   : > { %4320 = vmatmul.mubr.msk.bf16.gmra.mrb[24].mxu0 %vm1119_vm9, %v1093_v27  ;;  %v1096_v44 = vrot.slane %v5219_v61, 4 }
  0xd8   : > { %v892_v35 = vpop.permute.xlu0 %891  ;;  %v798_v15 = vpop.permute.xlu1 %797 }
  0xd9   : > { %v5224_v41 = vsel %vm956_vm8, %v941_v18, %v892_v35  ;;  %v947_v49 = vsel %vm907_vm7, %v4959_v60, %v798_v15 }
  0xda   : > { %v1094_v24 = vrot.slane %v5224_v41, 4 }
  0xdc   : > { %v796_v47 = vpop.permute.xlu0 %795  ;;  %v1095_v52 = vsel %vm558_vm4, %v1092_v34, %v1094_v24  ;;  %v1097_v32 = vsel %vm558_vm4, %v1094_v24, %v1096_v44  ;;  %v898_v50 = vpop.permute.xlu1 %897 }
  0xdd   : > { %4323 = vmatprep.mubr.msk.bf16.mxu0 %vm1119_vm9, %v1095_v52  ;;  %v5235_v28 = vsel %vm956_vm8, %v947_v49, %v898_v50  ;;  %v945_v56 = vsel %vm907_vm7, %v4941_v31, %v796_v47 }
  0xde   : > { %4324 = vmatmul.mubr.msk.bf16.gmra.mrb[28].mxu0 %vm1119_vm9, %v1097_v32  ;;  %v1100_v54 = vrot.slane %v5235_v28, 4 }
  0xe0   : > { %v896_v59 = vpop.permute.xlu0 %895  ;;  %v802_v60 = vpop.permute.xlu1 %801 }
  0xe1   : > { %v5240_v48 = vsel %vm956_vm8, %v945_v56, %v896_v59  ;;  %v951_v2 = vsel %vm907_vm7, %v4981_v5, %v802_v60 }
  0xe2   : > { %v1098_v1 = vrot.slane %v5240_v48, 4 }
  0xe4   : > { %v800_v11 = vpop.permute.xlu0 %799  ;;  %v1099_v4 = vsel %vm558_vm4, %v1096_v44, %v1098_v1  ;;  %v1101_v6 = vsel %vm558_vm4, %v1098_v1, %v1100_v54  ;;  %v902_v31 = vpop.permute.xlu1 %901 }
  0xe5   : > { %4327 = vmatprep.mubr.msk.bf16.mxu0 %vm1119_vm9, %v1099_v4  ;;  %v5251_v14 = vsel %vm956_vm8, %v951_v2, %v902_v31  ;;  %v949_v8 = vsel %vm907_vm7, %v4968_v43, %v800_v11 }
  0xe6   : > { %4328 = vmatmul.mubr.msk.bf16.gmra.mrb[32].mxu0 %vm1119_vm9, %v1101_v6  ;;  %v1104_v39 = vrot.slane %v5251_v14, 4 }
  0xe8   : > { %v900_v9 = vpop.permute.xlu0 %899  ;;  %v806_v5 = vpop.permute.xlu1 %805 }
  0xe9   : > { %v5256_v13 = vsel %vm956_vm8, %v949_v8, %v900_v9  ;;  %v955_v19 = vsel %vm907_vm7, %v5013_v46, %v806_v5 }
  0xea   : > { %v1102_v17 = vrot.slane %v5256_v13, 4 }
  0xec   : > { %v804_v36 = vpop.permute.xlu0 %803  ;;  %v1103_v22 = vsel %vm558_vm4, %v1100_v54, %v1102_v17  ;;  %v1105_v25 = vsel %vm558_vm4, %v1102_v17, %v1104_v39  ;;  %v906_v43 = vpop.permute.xlu1 %905 }
  0xed   : > { %4331 = vmatprep.mubr.msk.bf16.mxu0 %vm1119_vm9, %v1103_v22  ;;  %v5267_v37 = vsel %vm956_vm8, %v955_v19, %v906_v43  ;;  %v953_v34 = vsel %vm907_vm7, %v4998_v58, %v804_v36 }
  0xee   : > { %4332 = vmatmul.mubr.msk.bf16.gmra.mrb[36].mxu0 %vm1119_vm9, %v1105_v25  ;;  %v1108_v63 = vrot.slane %v5267_v37, 4 }
  0xf0   : > { %v904_v33 = vpop.permute.xlu0 %903  ;;  %v1020_v46 = vpop.permute.xlu1 %1019 }
  0xf1   : > { %v5272_v53 = vsel %vm956_vm8, %v953_v34, %v904_v33  ;;  %v1031_v27 = vsel %vm907_vm7, %v5045_v51, %v1020_v46 }
  0xf2   : > { %v1106_v29 = vrot.slane %v5272_v53, 4 }
  0xf4   : > { %v1018_v21 = vpop.permute.xlu0 %1017  ;;  %v1107_v18 = vsel %vm558_vm4, %v1104_v39, %v1106_v29  ;;  %v1109_v35 = vsel %vm558_vm4, %v1106_v29, %v1108_v63  ;;  %v1027_v58 = vpop.permute.xlu1 %1026  ;;  %v4064_v39 = vld [vmem:[%s6408_s3 + $0x4] sm:$0x7] }
  0xf5   : > { %4335 = vmatprep.mubr.msk.bf16.mxu0 %vm1119_vm9, %v1107_v18  ;;  %v1035_v15 = vsel %vm956_vm8, %v1031_v27, %v1027_v58  ;;  %v1029_v44 = vsel %vm907_vm7, %v5026_v10, %v1018_v21  ;;  %4596 = vmatprep.subr.msk.bf16.mxu1 %vm3033_vm10, %v4064_v39  ;;  %v3035_v17 = vsel %vm3033_vm10, %v4064_v39, 0 }
  0xf6   : > { %4336 = vmatmul.mubr.msk.bf16.gmra.mrb[40].mxu0 %vm1119_vm9, %v1109_v35  ;;  %v1112_v47 = vrot.slane %v1035_v15, 4 }
  0xf8   : > { %v1025_v24 = vpop.permute.xlu0 %1024  ;;  %v860_v32 = vpop.permute.xlu1 %859 }
  0xf9   : > { %v1033_v49 = vsel %vm956_vm8, %v1029_v44, %v1025_v24 }
  0xfa   : > { %v1110_v52 = vrot.slane %v1033_v49, 4 }
  0xfc   : > { %v760_v50 = vpop.permute.xlu0 %759  ;;  %v1111_v56 = vsel %vm558_vm4, %v1108_v63, %v1110_v52  ;;  %v1113_v59 = vsel %vm558_vm4, %v1110_v52, %v1112_v47 }
  0xfd   : > { %v909_v60 = vsel %vm907_vm7, 0, %v760_v50  ;;  %4339 = vmatprep.mubr.msk.bf16.mxu0 %vm1119_vm9, %v1111_v56 }
  0xfe   : > { %4340 = vmatmul.mubr.msk.bf16.gmra.mrb[44].mxu0 %vm1119_vm9, %v1113_v59  ;;  %v958_v54 = vsel %vm956_vm8, %v909_v60, %v860_v32 }
  0xff   : > { %4345 = vmatprep.mubr.msk.bf16.mxu1 %vm1119_vm9, %v958_v54  ;;  %4395 = vmatprep.mubr.msk.bf16.mxu0 %vm1119_vm9, %v5105_v42 }
 0x100   : > { %4346 = vmatmul.mubr.msk.bf16.vlgmr.msra.gmra.mrb[0].mxu1 %vm1119_vm9, %v5102_v16  ;;  %v1705_v10 = vpop.permute.xlu0 %1704 }
 0x101   : > { %4349 = vmatprep.mubr.msk.bf16.mxu1 %vm1119_vm9, %v5110_v45  ;;  %v1715_v16 = vsel %vm907_vm7, %v5045_v51, %v1705_v10  ;;  %v1707_v45 = vpop.permute.xlu1 %1706  ;;  %4444 = vmatpush3.bf16.msra.mxu1 %v3035_v17 }
 0x106   : > { %4396 = vmatmul.mubr.msk.bf16.vlgmr.msra.gmra.mrb[48].mxu0 %vm1119_vm9, %v5128_v0 }
 0x107   : > { %4399 = vmatprep.mubr.msk.bf16.mxu0 %vm1119_vm9, %v5122_v57 }
 0x108   : > { %4350 = vmatmul.mubr.msk.bf16.gmra.mrb[4].mxu1 %vm1119_vm9, %v5105_v42  ;;  %v1711_v42 = vpop.permute.xlu0 %1710 }
 0x109   : > { %4353 = vmatprep.mubr.msk.bf16.mxu1 %vm1119_vm9, %v5128_v0  ;;  %v1717_v0 = vsel %vm907_vm7, 0, %v1707_v45 }
 0x10e   : > { %4400 = vmatmul.mubr.msk.bf16.gmra.mrb[52].mxu0 %vm1119_vm9, %v5144_v20 }
 0x10f   : > { %4403 = vmatprep.mubr.msk.bf16.mxu0 %vm1119_vm9, %v5139_v12 }
 0x110   : > { %4354 = vmatmul.mubr.msk.bf16.gmra.mrb[8].mxu1 %vm1119_vm9, %v5122_v57  ;;  %v1719_v57 = vsel %vm956_vm8, %v1715_v16, %v1711_v42 }
 0x111   : > { %4357 = vmatprep.mubr.msk.bf16.mxu1 %vm1119_vm9, %v5144_v20 }
 0x116   : > { %4404 = vmatmul.mubr.msk.bf16.gmra.mrb[56].mxu0 %vm1119_vm9, %v5160_v40 }
 0x117   : > { %4407 = vmatprep.mubr.msk.bf16.mxu0 %vm1119_vm9, %v5155_v62 }
 0x118   : > { %4358 = vmatmul.mubr.msk.bf16.gmra.mrb[12].mxu1 %vm1119_vm9, %v5139_v12  ;;  %v1713_v12 = vpop.permute.xlu1 %1712 }
 0x119   : > { %4361 = vmatprep.mubr.msk.bf16.mxu1 %vm1119_vm9, %v5160_v40  ;;  %v1721_v20 = vsel %vm956_vm8, %v1717_v0, %v1713_v12 }
 0x11e   : > { %4408 = vmatmul.mubr.msk.bf16.gmra.mrb[60].mxu0 %vm1119_vm9, %v5176_v55 }
 0x11f   : > { %4411 = vmatprep.mubr.msk.bf16.mxu0 %vm1119_vm9, %v5171_v30 }
 0x120   : > { %4362 = vmatmul.mubr.msk.bf16.gmra.mrb[16].mxu1 %vm1119_vm9, %v5155_v62 }
 0x121   : > { %4365 = vmatprep.mubr.msk.bf16.mxu1 %vm1119_vm9, %v5176_v55 }
 0x126   : > { %4412 = vmatmul.mubr.msk.bf16.gmra.mrb[64].mxu0 %vm1119_vm9, %v5192_v7 }
 0x127   : > { %4415 = vmatprep.mubr.msk.bf16.mxu0 %vm1119_vm9, %v5187_v3 }
 0x128   : > { %4366 = vmatmul.mubr.msk.bf16.gmra.mrb[20].mxu1 %vm1119_vm9, %v5171_v30 }
 0x129   : > { %4369 = vmatprep.mubr.msk.bf16.mxu1 %vm1119_vm9, %v5192_v7 }
 0x12e   : > { %4416 = vmatmul.mubr.msk.bf16.gmra.mrb[68].mxu0 %vm1119_vm9, %v5208_v26 }
 0x12f   : > { %4419 = vmatprep.mubr.msk.bf16.mxu0 %vm1119_vm9, %v5203_v38 }
 0x130   : > { %4370 = vmatmul.mubr.msk.bf16.gmra.mrb[24].mxu1 %vm1119_vm9, %v5187_v3 }
 0x131   : > { %4373 = vmatprep.mubr.msk.bf16.mxu1 %vm1119_vm9, %v5208_v26 }
 0x136   : > { %4420 = vmatmul.mubr.msk.bf16.gmra.mrb[72].mxu0 %vm1119_vm9, %v5224_v41 }
 0x137   : > { %4423 = vmatprep.mubr.msk.bf16.mxu0 %vm1119_vm9, %v5219_v61 }
 0x138   : > { %4374 = vmatmul.mubr.msk.bf16.gmra.mrb[28].mxu1 %vm1119_vm9, %v5203_v38 }
 0x139   : > { %4377 = vmatprep.mubr.msk.bf16.mxu1 %vm1119_vm9, %v5224_v41 }
 0x13e   : > { %4424 = vmatmul.mubr.msk.bf16.gmra.mrb[76].mxu0 %vm1119_vm9, %v5240_v48 }
 0x13f   : > { %4427 = vmatprep.mubr.msk.bf16.mxu0 %vm1119_vm9, %v5235_v28 }
 0x140   : > { %4378 = vmatmul.mubr.msk.bf16.gmra.mrb[32].mxu1 %vm1119_vm9, %v5219_v61 }
 0x141   : > { %4381 = vmatprep.mubr.msk.bf16.mxu1 %vm1119_vm9, %v5240_v48 }
 0x146   : > { %4428 = vmatmul.mubr.msk.bf16.gmra.mrb[80].mxu0 %vm1119_vm9, %v5256_v13 }
 0x147   : > { %4431 = vmatprep.mubr.msk.bf16.mxu0 %vm1119_vm9, %v5251_v14 }
 0x148   : > { %4382 = vmatmul.mubr.msk.bf16.gmra.mrb[36].mxu1 %vm1119_vm9, %v5235_v28 }
 0x149   : > { %4385 = vmatprep.mubr.msk.bf16.mxu1 %vm1119_vm9, %v5256_v13 }
 0x14e   : > { %4432 = vmatmul.mubr.msk.bf16.gmra.mrb[84].mxu0 %vm1119_vm9, %v5272_v53 }
 0x14f   : > { %4435 = vmatprep.mubr.msk.bf16.mxu0 %vm1119_vm9, %v5267_v37 }
 0x150   : > { %4386 = vmatmul.mubr.msk.bf16.gmra.mrb[40].mxu1 %vm1119_vm9, %v5251_v14 }
 0x151   : > { %4389 = vmatprep.mubr.msk.bf16.mxu1 %vm1119_vm9, %v5272_v53 }
 0x156   : > { %4436 = vmatmul.mubr.msk.bf16.gmra.mrb[88].mxu0 %vm1119_vm9, %v1033_v49 }
 0x157   : > { %4439 = vmatprep.mubr.msk.bf16.mxu0 %vm1119_vm9, %v1719_v57  ;;  %v5453_v57 = vld [vmem:[%s6407_s2] ss:$0 sm:$0xff] }
 0x158   : > { %4390 = vmatmul.mubr.msk.bf16.gmra.mrb[44].mxu1 %vm1119_vm9, %v5267_v37 }
 0x15e   : > { %4440 = vmatmul.mubr.msk.bf16.gmra.mrb[92].mxu0 %vm1119_vm9, %v1721_v20 }
 0x179   : > { %v4297_v62 = vpop.f32.mrb[0].mxu0 }
 0x17a   : > { %v1230_v51 = vpop.f32.mrb[1].mxu0 }
 0x17b   : > { %v4298_v40 = vpop.f32.mrb[2].mxu0 }
 0x17c   : > { %v1233_v30 = vpop.f32.mrb[3].mxu0 }
 0x181   : > { %v4301_v55 = vpop.f32.mrb[4].mxu0 }
 0x182   : > { %v5389_v3 = vpop.f32.mrb[5].mxu0 }
 0x183   : > { %v5391_v7 = vpop.f32.mrb[6].mxu0 }
 0x184   : > { %v1249_v38 = vpop.f32.mrb[7].mxu0 }
 0x189   : > { %v5393_v26 = vpop.f32.mrb[8].mxu0 }
 0x18a   : > { %v1262_v61 = vpop.f32.mrb[9].mxu0 }
 0x18b   : > { %v4306_v41 = vpop.f32.mrb[10].mxu0 }
 0x18c   : > { %v5395_v28 = vpop.f32.mrb[11].mxu0 }
 0x191   : > { %v4309_v48 = vpop.f32.mrb[12].mxu0 }
 0x192   : > { %v5397_v1 = vpop.f32.mrb[13].mxu0 }
 0x193   : > { %v5399_v2 = vpop.f32.mrb[14].mxu0 }
 0x194   : > { %v5401_v11 = vpop.f32.mrb[15].mxu0 }
 0x199   : > { %v5403_v4 = vpop.f32.mrb[16].mxu0 }
 0x19a   : > { %v5405_v6 = vpop.f32.mrb[17].mxu0 }
 0x19b   : > { %v5407_v31 = vpop.f32.mrb[18].mxu0 }
 0x19c   : > { %v1297_v14 = vpop.f32.mrb[19].mxu0 }
 0x1a1   : > { %v5409_v8 = vpop.f32.mrb[20].mxu0 }
 0x1a2   : > { %v1310_v9 = vpop.f32.mrb[21].mxu0 }
 0x1a3   : > { %v4318_v13 = vpop.f32.mrb[22].mxu0 }
 0x1a4   : > { %v5411_v5 = vpop.f32.mrb[23].mxu0 }
 0x1a9   : > { %v4321_v19 = vpop.f32.mrb[24].mxu0 }
 0x1aa   : > { %v5418_v36 = vpop.f32.mrb[25].mxu0 }
 0x1ab   : > { %v5420_v22 = vpop.f32.mrb[26].mxu0 }
 0x1ac   : > { %v5422_v25 = vpop.f32.mrb[27].mxu0 }
 0x1b1   : > { %v5424_v43 = vpop.f32.mrb[28].mxu0 }
 0x1b2   : > { %v5426_v37 = vpop.f32.mrb[29].mxu0 }
 0x1b3   : > { %v5428_v34 = vpop.f32.mrb[30].mxu0 }
 0x1b4   : > { %v1345_v33 = vpop.f32.mrb[31].mxu0 }
 0x1b9   : > { %v5430_v53 = vpop.f32.mrb[32].mxu0 }
 0x1ba   : > { %v1358_v46 = vpop.f32.mrb[33].mxu0 }
 0x1bb   : > { %v4330_v63 = vpop.f32.mrb[34].mxu0  ;;  %v4659_v46 = vmov 0.0  }
 0x1bc   : > { %v5432_v29 = vpop.f32.mrb[35].mxu0 }
 0x1c1   : > { %v4333_v27 = vpop.f32.mrb[36].mxu0 }
 0x1c2   : > { %v5434_v21 = vpop.f32.mrb[37].mxu0 }
 0x1c3   : > { %v5436_v18 = vpop.f32.mrb[38].mxu0 }
 0x1c4   : > { %v5438_v35 = vpop.f32.mrb[39].mxu0 }
 0x1c9   : > { %v5440_v58 = vpop.f32.mrb[40].mxu0 }
 0x1ca   : > { %v5442_v15 = vpop.f32.mrb[41].mxu0 }
 0x1cb   : > { %v5444_v44 = vpop.f32.mrb[42].mxu0 }
 0x1cc   : > { %v1393_v24 = vpop.f32.mrb[43].mxu0 }
 0x1d1   : > { %v5446_v49 = vpop.f32.mrb[44].mxu0 }
 0x1d2   : > { %v1406_v47 = vpop.f32.mrb[45].mxu0 }
 0x1d3   : > { %v4342_v52 = vpop.f32.mrb[46].mxu0  ;;  %v4347_v32 = vpop.f32.mrb[0].mxu1 }
 0x1d4   : > { %v5448_v50 = vpop.f32.mrb[47].mxu0  ;;  %v1511_v56 = vpop.f32.mrb[1].mxu1 }
 0x1d5   : > { %v1512_v59 = vadd.f32 %v1511_v56, %v1230_v51  ;;  %v4348_v60 = vpop.f32.mrb[2].mxu1 }
 0x1d6   : > { %v1523_v54 = vadd.f32 %v4348_v60, %v4298_v40  ;;  %v1514_v10 = vpop.f32.mrb[3].mxu1 }
 0x1d7   : > { %v1515_v16 = vadd.f32 %v1514_v10, %v1233_v30 }
 0x1d9   : > { %v4397_v42 = vpop.f32.mrb[48].mxu0 }
 0x1da   : > { %v1773_v45 = vpop.f32.mrb[49].mxu0 }
 0x1db   : > { %v1964_v0 = vadd.f32 %v1773_v45, %v1512_v59  ;;  %v4351_v12 = vpop.f32.mrb[4].mxu1  ;;  %v4398_v20 = vpop.f32.mrb[50].mxu0 }
 0x1dc   : > { %v1536_v62 = vadd.f32 %v4351_v12, %v4301_v55  ;;  %v1967_v38 = vadd.f32 %v4398_v20, %v1523_v54  ;;  %v1527_v61 = vpop.f32.mrb[5].mxu1  ;;  %v1776_v41 = vpop.f32.mrb[51].mxu0 }
 0x1dd   : > { %v2019_v51 = vadd.f32 %v5453_v57, %v1964_v0  ;;  %v1528_v40 = vadd.f32 %v1527_v61, %v5389_v3  ;;  %v1965_v48 = vadd.f32 %v1776_v41, %v1515_v16  ;;  %v4352_v30 = vpop.f32.mrb[6].mxu1 }
 0x1de   : > { %v2022_v14 = vadd.f32 %v5453_v57, %v1967_v38  ;;  %v1539_v9 = vadd.f32 %v4352_v30, %v5391_v7  ;;  %v1530_v13 = vpop.f32.mrb[7].mxu1 }
 0x1df   : > { %v2020_v39 = vadd.f32 %v5453_v57, %v1965_v48  ;;  %v2067_v19 = vmax.f32 %v2019_v51, 0.0 }
 0x1e0   : > { %v2070_v17 = vmax.f32 %v2022_v14, 0.0 }
 0x1e1   : > { %v2068_v33 = vmax.f32 %v2020_v39, 0.0  ;;  %v4401_v55 = vpop.f32.mrb[52].mxu0 }
 0x1e2   : > { %v2177_v63 = vpack.c.bf16 %v2070_v17, %v4659_v46  ;;  %v1970_v27 = vadd.f32 %v4401_v55, %v1536_v62  ;;  %v1789_v24 = vpop.f32.mrb[53].mxu0 }
 0x1e3   : > { %v2176_v47 = vpack.c.bf16 %v2068_v33, %v2067_v19  ;;  %v1968_v3 = vadd.f32 %v1789_v24, %v1528_v40  ;;  %v4355_v52 = vpop.f32.mrb[8].mxu1  ;;  %v4402_v32 = vpop.f32.mrb[54].mxu0 }
 0x1e4   : > { %v2210_v56 = vshrl.u32 %v2177_v63, 16  ;;  %v2213_v59 = vshll.u32 %v2177_v63, 16  ;;  %v2025_v7 = vadd.f32 %v5453_v57, %v1970_v27  ;;  %v1552_v60 = vadd.f32 %v4355_v52, %v5393_v26  ;;  %v1543_v54 = vpop.f32.mrb[9].mxu1  ;;  %v1792_v10 = vpop.f32.mrb[55].mxu0 }
 0x1e5   : > { %v2202_v16 = vshrl.u32 %v2176_v47, 16  ;;  %v2205_v42 = vshll.u32 %v2176_v47, 16  ;;  %v2023_v45 = vadd.f32 %v5453_v57, %v1968_v3  ;;  %v1971_v0 = vadd.f32 %v4402_v32, %v1539_v9  ;;  %v4356_v12 = vpop.f32.mrb[10].mxu1 }
 0x1e6   : > { %v2212_v20 = vrot.slane %v2210_v56, 3  ;;  %v2215_v62 = vrot.slane %v2213_v59, 4  ;;  %v1546_v38 = vpop.f32.mrb[11].mxu1  ;;  %v2073_v14 = vmax.f32 %v2025_v7, 0.0 }
 0x1e7   : > { %v2204_v61 = vrot.slane %v2202_v16, 3  ;;  %v2207_v41 = vrot.slane %v2205_v42, 4  ;;  %v2071_v51 = vmax.f32 %v2023_v45, 0.0  ;;  %v2026_v40 = vadd.f32 %v5453_v57, %v1971_v0 }
 0x1e8   : > { %v2216_v48 = vor.u32 %v2215_v62, %v2212_v20  ;;  %v1547_v26 = vadd.f32 %v1546_v38, %v5395_v28 }
 0x1e9   : > { %v2208_v30 = vor.u32 %v2207_v41, %v2204_v61  ;;  %v2178_v13 = vpack.c.bf16 %v4659_v46, %v2071_v51  ;;  %v2074_v39 = vmax.f32 %v2026_v40, 0.0  ;;  %v4405_v9 = vpop.f32.mrb[56].mxu0 }
 0x1ea   : > { %v1974_v19 = vadd.f32 %v4405_v9, %v1552_v60  ;;  %v1805_v33 = vpop.f32.mrb[57].mxu0 }
 0x1eb   : > { %v2219_v55 = vshrl.u32 %v2178_v13, 16  ;;  %v2222_v63 = vshll.u32 %v2178_v13, 16  ;;  %v2179_v27 = vpack.c.bf16 %v2074_v39, %v2073_v14  ;;  %v4359_v24 = vpop.f32.mrb[12].mxu1  ;;  %v4406_v47 = vpop.f32.mrb[58].mxu0  ;;  %v5473_v28 = vsel %vm2200_vm11, %v2208_v30, %v2216_v48 }
 0x1ec   : > { %v2029_v3 = vadd.f32 %v5453_v57, %v1974_v19  ;;  %v1559_v52 = vpop.f32.mrb[13].mxu1  ;;  %v1808_v32 = vpop.f32.mrb[59].mxu0  ;;  %v5478_v56 = vsel %vm5468_vm13, 0, %v2208_v30  ;;  %v2662_v59 = vrot.slane %v5473_v28, 1  ;;  %v2431_v7 = vshll.u32 %v5473_v28, 16 }
 0x1ed   : > { %v2221_v60 = vrot.slane %v2219_v55, 3  ;;  %v2224_v54 = vrot.slane %v2222_v63, 4  ;;  %v2228_v10 = vshrl.u32 %v2179_v27, 16  ;;  %v2231_v16 = vshll.u32 %v2179_v27, 16  ;;  %v4360_v42 = vpop.f32.mrb[14].mxu1 }
 0x1ee   : > { %v2077_v45 = vmax.f32 %v2029_v3, 0.0  ;;  %v1560_v0 = vadd.f32 %v1559_v52, %v5397_v1  ;;  %v1973_v12 = vadd.f32 %v1808_v32, %v1547_v26  ;;  %v1571_v20 = vadd.f32 %v4360_v42, %v5399_v2  ;;  %v1562_v62 = vpop.f32.mrb[15].mxu1 }
 0x1ef   : > { %v2225_v38 = vor.u32 %v2224_v54, %v2221_v60  ;;  %v2230_v61 = vrot.slane %v2228_v10, 3  ;;  %v2233_v41 = vrot.slane %v2231_v16, 4  ;;  %v1563_v51 = vadd.f32 %v1562_v62, %v5401_v11 }
 0x1f0   : > { %v2181_v40 = vpack.c.bf16 %v4659_v46, %v2077_v45  ;;  %v2028_v30 = vadd.f32 %v5453_v57, %v1973_v12  ;;  %v2660_v14 = vrot.slane %v5478_v56, 1  ;;  %v2423_v13 = vshll.u32 %v5478_v56, 16 }
 0x1f1   : > { %v5489_v39 = vor.u32 %v2233_v41, %v2230_v61  ;;  %v4409_v1 = vpop.f32.mrb[60].mxu0  ;;  %v2427_v26 = vshrl.u32 %v5478_v56, 16  ;;  %v5493_v2 = vsel %vm2200_vm11, %v2216_v48, %v2225_v38  ;;  %v2433_v3 = vrot.slane %v2431_v7, 1 }
 0x1f2   : > { %v2246_v9 = vshrl.u32 %v2181_v40, 16  ;;  %v2249_v19 = vshll.u32 %v2181_v40, 16  ;;  %v2076_v33 = vmax.f32 %v2028_v30, 0.0  ;;  %v2663_v11 = vsel %vm809_vm5, %v2660_v14, %v2662_v59  ;;  %v1821_v55 = vpop.f32.mrb[61].mxu0 }
 0x1f3   : > { %2710 = vrot.lane.b32.xlu1 %v2663_v11, %s4656_s24  ;;  %v1976_v63 = vadd.f32 %v1821_v55, %v1560_v0  ;;  %v4363_v27 = vpop.f32.mrb[16].mxu1  ;;  %v4410_v24 = vpop.f32.mrb[62].mxu0  ;;  %v5501_v47 = vrot.slane %v2423_v13, 1  ;;  %v2439_v48 = vshll.u32 %v5493_v2, 16  ;;  %v2435_v30 = vshrl.u32 %v5473_v28, 16 }
 0x1f4   : > { %v2248_v52 = vrot.slane %v2246_v9, 3  ;;  %v2251_v32 = vrot.slane %v2249_v19, 4  ;;  %v2180_v60 = vpack.c.bf16 %v2076_v33, %v4659_v46  ;;  %v1584_v54 = vadd.f32 %v4363_v27, %v5403_v4  ;;  %v1575_v10 = vpop.f32.mrb[17].mxu1  ;;  %v1824_v16 = vpop.f32.mrb[63].mxu0 }
 0x1f5   : > { %v2031_v42 = vadd.f32 %v5453_v57, %v1976_v63  ;;  %v1979_v45 = vadd.f32 %v4410_v24, %v1571_v20  ;;  %v2429_v0 = vor.u32 %v2427_v26, %v5501_v47  ;;  %v1576_v12 = vadd.f32 %v1575_v10, %v5405_v6  ;;  %v4364_v62 = vpop.f32.mrb[18].mxu1 }
 0x1f6   : > { %v2237_v61 = vshrl.u32 %v2180_v60, 16  ;;  %v2240_v7 = vshll.u32 %v2180_v60, 16  ;;  %v1977_v41 = vadd.f32 %v1824_v16, %v1563_v51  ;;  %v1578_v40 = vpop.f32.mrb[19].mxu1  ;;  %v5510_v13 = vor.u32 %v2251_v32, %v2248_v52 }
 0x1f7   : > { %v2034_v4 = vadd.f32 %v5453_v57, %v1979_v45  ;;  %v2434_v1 = vsel %vm564_vm3, %v2429_v0, %v2433_v3  ;;  %v1587_v9 = vadd.f32 %v4364_v62, %v5407_v31  ;;  %v2079_v19 = vmax.f32 %v2031_v42, 0.0  ;;  %v5537_v40 = vld [vmem:[%s6408_s3] sm:$0x7] }
 0x1f8   : > { %v2239_v20 = vrot.slane %v2237_v61, 3  ;;  %2613 = vrot.lane.b32.xlu0 %v2434_v1, %s4660_s11  ;;  %v2032_v6 = vadd.f32 %v5453_v57, %v1977_v41  ;;  %v2437_v26 = vor.u32 %v2435_v30, %v2433_v3  ;;  %v2441_v33 = vrot.slane %v2439_v48, 1  ;;  %4597 = vmatprep.subr.msk.bf16.mxu0 %vm3033_vm10, %v5537_v40 }
 0x1f9   : > { %v2082_v51 = vmax.f32 %v2034_v4, 0.0  ;;  %v2664_v11 = vrot.slane %v5493_v2, 1  ;;  %v4413_v55 = vpop.f32.mrb[64].mxu0  ;;  %v5520_v63 = vsel %vm2200_vm11, %v2225_v38, %v5489_v39  ;;  %v2242_v27 = vrot.slane %v2240_v7, 4 }
 0x1fa   : > { %v2080_v24 = vmax.f32 %v2032_v6, 0.0  ;;  %v1982_v31 = vadd.f32 %v4413_v55, %v1584_v54  ;;  %v1837_v52 = vpop.f32.mrb[65].mxu0  ;;  %v2666_v32 = vrot.slane %v5520_v63, 1  ;;  %v2442_v10 = vsel %vm564_vm3, %v2437_v26, %v2441_v33 }
 0x1fb   : > { %v2183_v60 = vpack.c.bf16 %v2082_v51, %v4659_v46  ;;  %v2665_v3 = vsel %vm809_vm5, %v2662_v59, %v2664_v11  ;;  %v1980_v48 = vadd.f32 %v1837_v52, %v1576_v12  ;;  %v4367_v16 = vpop.f32.mrb[20].mxu1  ;;  %v4414_v42 = vpop.f32.mrb[66].mxu0  ;;  %2615 = vrot.lane.b32.xlu1 %v2442_v10, %s4660_s11  ;;  %v2443_v59 = vshrl.u32 %v5493_v2, 16 }
 0x1fc   : > { %v2182_v45 = vpack.c.bf16 %v2080_v24, %v2079_v19  ;;  %2712 = vrot.lane.b32.xlu0 %v2665_v3, %s4656_s24  ;;  %v2037_v38 = vadd.f32 %v5453_v57, %v1982_v31  ;;  %v1600_v54 = vadd.f32 %v4367_v16, %v5409_v8  ;;  %v1591_v0 = vpop.f32.mrb[21].mxu1  ;;  %v1840_v62 = vpop.f32.mrb[67].mxu0  ;;  %v1983_v41 = vadd.f32 %v4414_v42, %v1587_v9  ;;  %v5544_v8 = vld [vmem:[%s6408_s3 + $0x8] sm:$0x7] }
 0x1fd   : > { %v2264_v61 = vshrl.u32 %v2183_v60, 16  ;;  %v2035_v7 = vadd.f32 %v5453_v57, %v1980_v48  ;;  %v4368_v12 = vpop.f32.mrb[22].mxu1  ;;  %v2243_v30 = vor.u32 %v2242_v27, %v2239_v20  ;;  %v2267_v4 = vshll.u32 %v2183_v60, 16  ;;  %4598 = vmatprep.subr.msk.bf16.mxu1 %vm3033_vm10, %v5544_v8 }
 0x1fe   : > { %v2255_v1 = vshrl.u32 %v2182_v45, 16  ;;  %v2258_v19 = vshll.u32 %v2182_v45, 16  ;;  %v1594_v6 = vpop.f32.mrb[23].mxu1  ;;  %v2085_v9 = vmax.f32 %v2037_v38, 0.0  ;;  %v2038_v51 = vadd.f32 %v5453_v57, %v1983_v41 }
 0x1ff   : > { %v2083_v26 = vmax.f32 %v2035_v7, 0.0  ;;  %v2667_v20 = vsel %vm809_vm5, %v2664_v11, %v2666_v32  ;;  %v2266_v55 = vrot.slane %v2264_v61, 3  ;;  %v2445_v24 = vor.u32 %v2443_v59, %v2441_v33 }
 0x200   : > { %v2257_v27 = vrot.slane %v2255_v1, 3  ;;  %2714 = vrot.lane.b32.xlu1 %v2667_v20, %s4656_s24  ;;  %v2447_v31 = vshll.u32 %v5520_v63, 16  ;;  %v2260_v52 = vrot.slane %v2258_v19, 4  ;;  %v2086_v10 = vmax.f32 %v2038_v51, 0.0 }
 0x201   : > { %v2184_v60 = vpack.c.bf16 %v4659_v46, %v2083_v26  ;;  %v1595_v3 = vadd.f32 %v1594_v6, %v5411_v5  ;;  %v4417_v48 = vpop.f32.mrb[68].mxu0  ;;  %v2269_v16 = vrot.slane %v2267_v4, 4  ;;  %v5558_v45 = vsel %vm2200_vm11, %v5489_v39, %v2243_v30 }
 0x202   : > { %v2449_v42 = vrot.slane %v2447_v31, 1  ;;  %v1986_v11 = vadd.f32 %v4417_v48, %v1600_v54  ;;  %v1853_v38 = vpop.f32.mrb[69].mxu0  ;;  %v2185_v33 = vpack.c.bf16 %v2086_v10, %v2085_v9  ;;  %v2451_v61 = vshrl.u32 %v5520_v63, 16 }
 0x203   : > { %v2273_v0 = vshrl.u32 %v2184_v60, 16  ;;  %v2276_v62 = vshll.u32 %v2184_v60, 16  ;;  %v4371_v7 = vpop.f32.mrb[24].mxu1  ;;  %v4418_v41 = vpop.f32.mrb[70].mxu0  ;;  %v2455_v12 = vshll.u32 %v5558_v45, 16  ;;  %v5566_v54 = vsel %vm2200_vm11, %v2243_v30, %v5510_v13 }
 0x204   : > { %v2450_v59 = vsel %vm564_vm3, %v2445_v24, %v2449_v42  ;;  %v2041_v5 = vadd.f32 %v5453_v57, %v1986_v11  ;;  %v1607_v39 = vpop.f32.mrb[25].mxu1  ;;  %v1856_v4 = vpop.f32.mrb[71].mxu0  ;;  %v2261_v1 = vor.u32 %v2260_v52, %v2257_v27  ;;  %v2282_v6 = vshrl.u32 %v2185_v33, 16 }
 0x205   : > { %v2275_v19 = vrot.slane %v2273_v0, 3  ;;  %v2285_v9 = vshll.u32 %v2185_v33, 16  ;;  %2617 = vrot.lane.b32.xlu0 %v2450_v59, %s4660_s11  ;;  %v4372_v26 = vpop.f32.mrb[26].mxu1  ;;  %v2453_v20 = vor.u32 %v2451_v61, %v2449_v42  ;;  %v2457_v24 = vrot.slane %v2455_v12, 1 }
 0x206   : > { %v2089_v51 = vmax.f32 %v2041_v5, 0.0  ;;  %v2459_v31 = vshrl.u32 %v5558_v45, 16  ;;  %v1610_v60 = vpop.f32.mrb[27].mxu1  ;;  %v2278_v10 = vrot.slane %v2276_v62, 4  ;;  %v2284_v48 = vrot.slane %v2282_v6, 3 }
 0x207   : > { %v2287_v11 = vrot.slane %v2285_v9, 4  ;;  %v2463_v30 = vshll.u32 %v5566_v54, 16  ;;  %v2458_v27 = vsel %vm564_vm3, %v2453_v20, %v2457_v24  ;;  %v1608_v0 = vadd.f32 %v1607_v39, %v5418_v36 }
 0x208   : > { %v2187_v38 = vpack.c.bf16 %v4659_v46, %v2089_v51  ;;  %v2461_v52 = vor.u32 %v2459_v31, %v2457_v24  ;;  %v5574_v33 = vor.u32 %v2269_v16, %v2266_v55  ;;  %v1985_v61 = vadd.f32 %v1856_v4, %v1595_v3 }
 0x209   : > { %2619 = vrot.lane.b32.xlu0 %v2458_v27, %s4660_s11  ;;  %v2465_v42 = vrot.slane %v2463_v30, 1  ;;  %v1619_v7 = vadd.f32 %v4372_v26, %v5420_v22  ;;  %v4421_v62 = vpop.f32.mrb[72].mxu0  ;;  %v2668_v5 = vrot.slane %v5558_v45, 1  ;;  %v1611_v12 = vadd.f32 %v1610_v60, %v5422_v25 }
 0x20a   : > { %v2300_v41 = vshrl.u32 %v2187_v38, 16  ;;  %v2303_v59 = vshll.u32 %v2187_v38, 16  ;;  %v1869_v6 = vpop.f32.mrb[73].mxu0  ;;  %v2040_v36 = vadd.f32 %v5453_v57, %v1985_v61  ;;  %v2670_v55 = vrot.slane %v5566_v54, 1 }
 0x20b   : > { %v2466_v9 = vsel %vm564_vm3, %v2461_v52, %v2465_v42  ;;  %v5585_v16 = vsel %vm2200_vm11, %v5510_v13, %v2261_v1  ;;  %v4375_v3 = vpop.f32.mrb[28].mxu1  ;;  %v4422_v22 = vpop.f32.mrb[74].mxu0  ;;  %v5587_v39 = vor.u32 %v2278_v10, %v2275_v19  ;;  %v5589_v4 = vor.u32 %v2287_v11, %v2284_v48 }
 0x20c   : > { %v2302_v26 = vrot.slane %v2300_v41, 3  ;;  %2621 = vrot.lane.b32.xlu1 %v2466_v9, %s4660_s11  ;;  %v2669_v25 = vsel %vm809_vm5, %v2666_v32, %v2668_v5  ;;  %v1623_v51 = vpop.f32.mrb[29].mxu1  ;;  %v1872_v20 = vpop.f32.mrb[75].mxu0  ;;  %v2088_v24 = vmax.f32 %v2040_v36, 0.0  ;;  %v2467_v13 = vshrl.u32 %v5566_v54, 16 }
 0x20d   : > { %2716 = vrot.lane.b32.xlu0 %v2669_v25, %s4656_s24  ;;  %v2471_v31 = vshll.u32 %v5585_v16, 16  ;;  %v1988_v19 = vadd.f32 %v1869_v6, %v1608_v0  ;;  %v4376_v60 = vpop.f32.mrb[30].mxu1  ;;  %v2305_v10 = vrot.slane %v2303_v59, 4  ;;  %v2671_v48 = vsel %vm809_vm5, %v2668_v5, %v2670_v55 }
 0x20e   : > { %v1632_v11 = vadd.f32 %v4375_v3, %v5424_v43  ;;  %v1991_v30 = vadd.f32 %v4422_v22, %v1619_v7  ;;  %v1626_v38 = vpop.f32.mrb[31].mxu1  ;;  %v2186_v32 = vpack.c.bf16 %v2088_v24, %v4659_v46  ;;  %v2469_v27 = vor.u32 %v2467_v13, %v2465_v42 }
 0x20f   : > { %v2473_v52 = vrot.slane %v2471_v31, 1  ;;  %v5603_v61 = vsel %vm2200_vm11, %v2261_v1, %v5574_v33  ;;  %v2475_v62 = vshrl.u32 %v5585_v16, 16  ;;  %v1624_v43 = vadd.f32 %v1623_v51, %v5426_v37 }
 0x210   : > { %2718 = vrot.lane.b32.xlu1 %v2671_v48, %s4656_s24  ;;  %v2046_v0 = vadd.f32 %v5453_v57, %v1991_v30  ;;  %v2479_v41 = vshll.u32 %v5603_v61, 16  ;;  %v2291_v7 = vshrl.u32 %v2186_v32, 16  ;;  %v2294_v59 = vshll.u32 %v2186_v32, 16 }
 0x211   : > { %v2474_v5 = vsel %vm564_vm3, %v2469_v27, %v2473_v52  ;;  %v2043_v42 = vadd.f32 %v5453_v57, %v1988_v19  ;;  %v4425_v6 = vpop.f32.mrb[76].mxu0  ;;  %v2477_v9 = vor.u32 %v2475_v62, %v2473_v52  ;;  %v1989_v3 = vadd.f32 %v1872_v20, %v1611_v12 }
 0x212   : > { %2623 = vrot.lane.b32.xlu0 %v2474_v5, %s4660_s11  ;;  %v2094_v1 = vmax.f32 %v2046_v0, 0.0  ;;  %v2481_v36 = vrot.slane %v2479_v41, 1  ;;  %v1885_v22 = vpop.f32.mrb[77].mxu0  ;;  %v2293_v25 = vrot.slane %v2291_v7, 3  ;;  %v2296_v24 = vrot.slane %v2294_v59, 4 }
 0x213   : > { %v1635_v13 = vadd.f32 %v4376_v60, %v5428_v34  ;;  %v2672_v37 = vrot.slane %v5585_v16, 1  ;;  %v4379_v51 = vpop.f32.mrb[32].mxu1  ;;  %v4426_v31 = vpop.f32.mrb[78].mxu0  ;;  %v2044_v30 = vadd.f32 %v5453_v57, %v1989_v3  ;;  %v2674_v38 = vrot.slane %v5603_v61, 1 }
 0x214   : > { %v2189_v48 = vpack.c.bf16 %v2094_v1, %v4659_v46  ;;  %v2482_v19 = vsel %vm564_vm3, %v2477_v9, %v2481_v36  ;;  %v1639_v32 = vpop.f32.mrb[33].mxu1  ;;  %v1888_v27 = vpop.f32.mrb[79].mxu0  ;;  %v5619_v12 = vor.u32 %v2305_v10, %v2302_v26  ;;  %v1994_v20 = vadd.f32 %v4425_v6, %v1632_v11 }
 0x215   : > { %2625 = vrot.lane.b32.xlu1 %v2482_v19, %s4660_s11  ;;  %v2673_v34 = vsel %vm809_vm5, %v2670_v55, %v2672_v37  ;;  %v5626_v60 = vsel %vm2200_vm11, %v5574_v33, %v5587_v39  ;;  %v4380_v52 = vpop.f32.mrb[34].mxu1  ;;  %v2091_v0 = vmax.f32 %v2043_v42, 0.0  ;;  %v2092_v7 = vmax.f32 %v2044_v30, 0.0 }
 0x216   : > { %v2318_v62 = vshrl.u32 %v2189_v48, 16  ;;  %v2321_v41 = vshll.u32 %v2189_v48, 16  ;;  %2720 = vrot.lane.b32.xlu0 %v2673_v34, %s4656_s24  ;;  %v1642_v59 = vpop.f32.mrb[35].mxu1  ;;  %v2297_v26 = vor.u32 %v2296_v24, %v2293_v25  ;;  %v2483_v10 = vshrl.u32 %v5603_v61, 16 }
 0x217   : > { %v2487_v5 = vshll.u32 %v5626_v60, 16  ;;  %v1992_v55 = vadd.f32 %v1885_v22, %v1624_v43  ;;  %v2188_v11 = vpack.c.bf16 %v2092_v7, %v2091_v0  ;;  %v2675_v6 = vsel %vm809_vm5, %v2672_v37, %v2674_v38 }
 0x218   : > { %v2049_v33 = vadd.f32 %v5453_v57, %v1994_v20  ;;  %v1648_v1 = vadd.f32 %v4379_v51, %v5430_v53  ;;  %v2320_v42 = vrot.slane %v2318_v62, 3  ;;  %v2485_v9 = vor.u32 %v2483_v10, %v2481_v36 }
 0x219   : > { %2722 = vrot.lane.b32.xlu1 %v2675_v6, %s4656_s24  ;;  %v2489_v3 = vrot.slane %v2487_v5, 1  ;;  %v2047_v48 = vadd.f32 %v5453_v57, %v1992_v55  ;;  %v4429_v25 = vpop.f32.mrb[80].mxu0  ;;  %v2323_v24 = vrot.slane %v2321_v41, 4  ;;  %v2309_v19 = vshrl.u32 %v2188_v11, 16 }
 0x21a   : > { %v2312_v30 = vshll.u32 %v2188_v11, 16  ;;  %v1995_v32 = vadd.f32 %v4426_v31, %v1635_v13  ;;  %v1901_v43 = vpop.f32.mrb[81].mxu0  ;;  %v5640_v53 = vsel %vm2200_vm11, %v5587_v39, %v5589_v4  ;;  %v2491_v51 = vshrl.u32 %v5626_v60, 16 }
 0x21b   : > { %v2490_v22 = vsel %vm564_vm3, %v2485_v9, %v2489_v3  ;;  %v2095_v37 = vmax.f32 %v2047_v48, 0.0  ;;  %v4383_v36 = vpop.f32.mrb[36].mxu1  ;;  %v4430_v27 = vpop.f32.mrb[82].mxu0  ;;  %v2311_v34 = vrot.slane %v2309_v19, 3  ;;  %v2495_v13 = vshll.u32 %v5640_v53, 16 }
 0x21c   : > { %v2314_v20 = vrot.slane %v2312_v30, 4  ;;  %2627 = vrot.lane.b32.xlu0 %v2490_v22, %s4660_s11  ;;  %v2050_v52 = vadd.f32 %v5453_v57, %v1995_v32  ;;  %v1655_v31 = vpop.f32.mrb[37].mxu1  ;;  %v1904_v0 = vpop.f32.mrb[83].mxu0  ;;  %v2493_v41 = vor.u32 %v2491_v51, %v2489_v3  ;;  %v2676_v39 = vrot.slane %v5626_v60, 1 }
 0x21d   : > { %v2190_v62 = vpack.c.bf16 %v4659_v46, %v2095_v37  ;;  %v1643_v7 = vadd.f32 %v1642_v59, %v5432_v29  ;;  %v4384_v10 = vpop.f32.mrb[38].mxu1  ;;  %v2097_v5 = vmax.f32 %v2049_v33, 0.0  ;;  %v2497_v11 = vrot.slane %v2495_v13, 1 }
 0x21e   : > { %v2098_v55 = vmax.f32 %v2050_v52, 0.0  ;;  %v2678_v6 = vrot.slane %v5640_v53, 1  ;;  %v1658_v9 = vpop.f32.mrb[39].mxu1  ;;  %v2677_v30 = vsel %vm809_vm5, %v2674_v38, %v2676_v39  ;;  %v1998_v32 = vadd.f32 %v4429_v25, %v1648_v1 }
 0x21f   : > { %v2327_v48 = vshrl.u32 %v2190_v62, 16  ;;  %v2330_v19 = vshll.u32 %v2190_v62, 16  ;;  %v5651_v43 = vor.u32 %v2323_v24, %v2320_v42  ;;  %v2498_v3 = vsel %vm564_vm3, %v2493_v41, %v2497_v11 }
 0x220   : > { %v2191_v22 = vpack.c.bf16 %v2098_v55, %v2097_v5  ;;  %2724 = vrot.lane.b32.xlu0 %v2677_v30, %s4656_s24  ;;  %v5657_v29 = vsel %vm2200_vm11, %v5589_v4, %v2297_v26  ;;  %v5659_v59 = vor.u32 %v2314_v20, %v2311_v34  ;;  %2629 = vrot.lane.b32.xlu1 %v2498_v3, %s4660_s11  ;;  %v2499_v25 = vshrl.u32 %v5640_v53, 16 }
 0x221   : > { %v2329_v33 = vrot.slane %v2327_v48, 3  ;;  %v2332_v37 = vrot.slane %v2330_v19, 4  ;;  %v2053_v38 = vadd.f32 %v5453_v57, %v1998_v32  ;;  %v4433_v1 = vpop.f32.mrb[84].mxu0  ;;  %v2503_v24 = vshll.u32 %v5657_v29, 16 }
 0x222   : > { %v2336_v42 = vshrl.u32 %v2191_v22, 16  ;;  %v5667_v51 = vsel %vm2200_vm11, %v2297_v26, %v5619_v12  ;;  %v1917_v4 = vpop.f32.mrb[85].mxu0  ;;  %v2339_v27 = vshll.u32 %v2191_v22, 16  ;;  %v2679_v34 = vsel %vm809_vm5, %v2676_v39, %v2678_v6 }
 0x223   : > { %v5669_v36 = vor.u32 %v2332_v37, %v2329_v33  ;;  %v2101_v20 = vmax.f32 %v2053_v38, 0.0  ;;  %v4387_v52 = vpop.f32.mrb[40].mxu1  ;;  %v4434_v13 = vpop.f32.mrb[86].mxu0  ;;  %v2501_v62 = vor.u32 %v2499_v25, %v2497_v11  ;;  %v2505_v41 = vrot.slane %v2503_v24, 1 }
 0x224   : > { %v2507_v5 = vshrl.u32 %v5657_v29, 16  ;;  %v2511_v55 = vshll.u32 %v5667_v51, 16  ;;  %v1671_v48 = vpop.f32.mrb[41].mxu1  ;;  %v1920_v19 = vpop.f32.mrb[87].mxu0  ;;  %2726 = vrot.lane.b32.xlu1 %v2679_v34, %s4656_s24  ;;  %v1656_v30 = vadd.f32 %v1655_v31, %v5434_v21  ;;  %v1997_v32 = vadd.f32 %v1904_v0, %v1643_v7 }
 0x225   : > { %v2193_v26 = vpack.c.bf16 %v4659_v46, %v2101_v20  ;;  %v1667_v39 = vadd.f32 %v4384_v10, %v5436_v18  ;;  %v4388_v22 = vpop.f32.mrb[42].mxu1  ;;  %v2338_v3 = vrot.slane %v2336_v42, 3  ;;  %v2506_v11 = vsel %vm564_vm3, %v2501_v62, %v2505_v41 }
 0x226   : > { %v2509_v33 = vor.u32 %v2507_v5, %v2505_v41  ;;  %v2513_v37 = vrot.slane %v2511_v55, 1  ;;  %v1674_v38 = vpop.f32.mrb[43].mxu1  ;;  %2631 = vrot.lane.b32.xlu0 %v2506_v11, %s4660_s11  ;;  %v2052_v24 = vadd.f32 %v5453_v57, %v1997_v32  ;;  %v2680_v34 = vrot.slane %v5657_v29, 1 }
 0x227   : > { %v2354_v1 = vshrl.u32 %v2193_v26, 16  ;;  %v2357_v25 = vshll.u32 %v2193_v26, 16  ;;  %v1659_v31 = vadd.f32 %v1658_v9, %v5438_v35  ;;  %v2682_v18 = vrot.slane %v5667_v51, 1 }
 0x228   : > { %v2514_v21 = vsel %vm564_vm3, %v2509_v33, %v2513_v37  ;;  %v5688_v0 = vsel %vm2200_vm11, %v5619_v12, %v5659_v59  ;;  %v2341_v7 = vrot.slane %v2339_v27, 4  ;;  %v2100_v20 = vmax.f32 %v2052_v24, 0.0 }
 0x229   : > { %v2356_v10 = vrot.slane %v2354_v1, 3  ;;  %v2359_v42 = vrot.slane %v2357_v25, 4  ;;  %2633 = vrot.lane.b32.xlu1 %v2514_v21, %s4660_s11  ;;  %v4437_v62 = vpop.f32.mrb[88].mxu0  ;;  %v2681_v41 = vsel %vm809_vm5, %v2678_v6, %v2680_v34  ;;  %v2515_v5 = vshrl.u32 %v5667_v51, 16 }
 0x22a   : > { %v2519_v35 = vshll.u32 %v5688_v0, 16  ;;  %v2000_v9 = vadd.f32 %v1917_v4, %v1656_v30  ;;  %v1933_v55 = vpop.f32.mrb[89].mxu0  ;;  %v2192_v26 = vpack.c.bf16 %v2100_v20, %v4659_v46  ;;  %2728 = vrot.lane.b32.xlu0 %v2681_v41, %s4656_s24  ;;  %v2683_v12 = vsel %vm809_vm5, %v2680_v34, %v2682_v18 }
 0x22b   : > { %v1680_v27 = vadd.f32 %v4387_v52, %v5440_v58  ;;  %v2003_v32 = vadd.f32 %v4434_v13, %v1667_v39  ;;  %v4391_v11 = vpop.f32.mrb[44].mxu1  ;;  %v4438_v33 = vpop.f32.mrb[90].mxu0  ;;  %v2517_v38 = vor.u32 %v2515_v5, %v2513_v37  ;;  %v5702_v4 = vsel %vm2200_vm11, %v5659_v59, %v5651_v43 }
 0x22c   : > { %v2521_v1 = vrot.slane %v2519_v35, 1  ;;  %v2055_v6 = vadd.f32 %v5453_v57, %v2000_v9  ;;  %v1687_v30 = vpop.f32.mrb[45].mxu1  ;;  %v1936_v25 = vpop.f32.mrb[91].mxu0  ;;  %v5704_v24 = vor.u32 %v2341_v7, %v2338_v3  ;;  %v2345_v21 = vshrl.u32 %v2192_v26, 16 }
 0x22d   : > { %2730 = vrot.lane.b32.xlu1 %v2683_v12, %s4656_s24  ;;  %v2058_v58 = vadd.f32 %v5453_v57, %v2003_v32  ;;  %v2523_v52 = vshrl.u32 %v5688_v0, 16  ;;  %v4392_v13 = vpop.f32.mrb[46].mxu1  ;;  %v5709_v39 = vor.u32 %v2359_v42, %v2356_v10  ;;  %v2527_v34 = vshll.u32 %v5702_v4, 16 }
 0x22e   : > { %v2522_v37 = vsel %vm564_vm3, %v2517_v38, %v2521_v1  ;;  %v1672_v59 = vadd.f32 %v1671_v48, %v5442_v15  ;;  %v1690_v20 = vpop.f32.mrb[47].mxu1  ;;  %v2348_v41 = vshll.u32 %v2192_v26, 16  ;;  %v2103_v3 = vmax.f32 %v2055_v6, 0.0 }
 0x22f   : > { %2635 = vrot.lane.b32.xlu0 %v2522_v37, %s4660_s11  ;;  %v2106_v7 = vmax.f32 %v2058_v58, 0.0  ;;  %v2525_v5 = vor.u32 %v2523_v52, %v2521_v1  ;;  %v2529_v35 = vrot.slane %v2527_v34, 1  ;;  %v2001_v9 = vadd.f32 %v1920_v19, %v1659_v31 }
 0x230   : > { %v1683_v12 = vadd.f32 %v4388_v22, %v5444_v44  ;;  %v2684_v10 = vrot.slane %v5688_v0, 1  ;;  %v2347_v42 = vrot.slane %v2345_v21, 3  ;;  %v2686_v38 = vrot.slane %v5702_v4, 1 }
 0x231   : > { %v2195_v32 = vpack.c.bf16 %v2106_v7, %v4659_v46  ;;  %v2006_v30 = vadd.f32 %v4437_v62, %v1680_v27  ;;  %v4441_v15 = vpop.f32.mrb[92].mxu0  ;;  %v2530_v48 = vsel %vm564_vm3, %v2525_v5, %v2529_v35  ;;  %v2056_v26 = vadd.f32 %v5453_v57, %v2001_v9 }
 0x232   : > { %v2685_v6 = vsel %vm809_vm5, %v2682_v18, %v2684_v10  ;;  %v5725_v19 = vsel %vm2200_vm11, %v5651_v43, %v5669_v36  ;;  %v1949_v44 = vpop.f32.mrb[93].mxu0  ;;  %v2350_v22 = vrot.slane %v2348_v41, 4  ;;  %2637 = vrot.lane.b32.xlu1 %v2530_v48, %s4660_s11  ;;  %v2687_v62 = vsel %vm809_vm5, %v2684_v10, %v2686_v38 }
 0x233   : > { %v2372_v31 = vshrl.u32 %v2195_v32, 16  ;;  %v2375_v1 = vshll.u32 %v2195_v32, 16  ;;  %2732 = vrot.lane.b32.xlu0 %v2685_v6, %s4656_s24  ;;  %v4442_v27 = vpop.f32.mrb[94].mxu0  ;;  %v2104_v25 = vmax.f32 %v2056_v26, 0.0  ;;  %v2531_v21 = vshrl.u32 %v5702_v4, 16 }
 0x234   : > { %v2535_v18 = vshll.u32 %v5725_v19, 16  ;;  %v2004_v58 = vadd.f32 %v1933_v55, %v1672_v59  ;;  %v1952_v52 = vpop.f32.mrb[95].mxu0  ;;  %v2061_v37 = vadd.f32 %v5453_v57, %v2006_v30  ;;  %v1696_v34 = vadd.f32 %v4391_v11, %v5446_v49 }
 0x235   : > { %v2374_v43 = vrot.slane %v2372_v31, 3  ;;  %v2377_v13 = vrot.slane %v2375_v1, 4  ;;  %v2194_v41 = vpack.c.bf16 %v2104_v25, %v2103_v3  ;;  %v2533_v7 = vor.u32 %v2531_v21, %v2529_v35 }
 0x236   : > { %v2537_v5 = vrot.slane %v2535_v18, 1  ;;  %v2059_v9 = vadd.f32 %v5453_v57, %v2004_v58  ;;  %v2351_v10 = vor.u32 %v2350_v22, %v2347_v42  ;;  %2734 = vrot.lane.b32.xlu1 %v2687_v62, %s4656_s24  ;;  %v2007_v32 = vadd.f32 %v4438_v33, %v1683_v12 }
 0x237   : > { %v5739_v55 = vsel %vm2200_vm11, %v5669_v36, %v5704_v24  ;;  %v2539_v59 = vshrl.u32 %v5725_v19, 16  ;;  %v2363_v48 = vshrl.u32 %v2194_v41, 16  ;;  %v2366_v30 = vshll.u32 %v2194_v41, 16 }
 0x238   : > { %v2538_v49 = vsel %vm564_vm3, %v2533_v7, %v2537_v5  ;;  %v2107_v11 = vmax.f32 %v2059_v9, 0.0  ;;  %v2062_v3 = vadd.f32 %v5453_v57, %v2007_v32  ;;  %v2543_v42 = vshll.u32 %v5739_v55, 16 }
 0x239   : > { %2639 = vrot.lane.b32.xlu0 %v2538_v49, %s4660_s11  ;;  %v2541_v35 = vor.u32 %v2539_v59, %v2537_v5  ;;  %v2688_v33 = vrot.slane %v5725_v19, 1  ;;  %v5747_v12 = vor.u32 %v2377_v13, %v2374_v43  ;;  %v2109_v36 = vmax.f32 %v2061_v37, 0.0 }
 0x23a   : > { %v2196_v26 = vpack.c.bf16 %v4659_v46, %v2107_v11  ;;  %v1691_v6 = vadd.f32 %v1690_v20, %v5448_v50  ;;  %v2365_v44 = vrot.slane %v2363_v48, 3  ;;  %v2368_v22 = vrot.slane %v2366_v30, 4 }
 0x23b   : > { %v2110_v31 = vmax.f32 %v2062_v3, 0.0  ;;  %v2545_v1 = vrot.slane %v2543_v42, 1  ;;  %v2689_v25 = vsel %vm809_vm5, %v2686_v38, %v2688_v33  ;;  %v5754_v21 = vsel %vm2200_vm11, %v5704_v24, %v2351_v10 }
 0x23c   : > { %v2381_v62 = vshrl.u32 %v2196_v26, 16  ;;  %v2384_v27 = vshll.u32 %v2196_v26, 16  ;;  %v2690_v43 = vrot.slane %v5739_v55, 1  ;;  %v2547_v50 = vshrl.u32 %v5739_v55, 16 }
 0x23d   : > { %v2197_v18 = vpack.c.bf16 %v2110_v31, %v2109_v36  ;;  %v2546_v58 = vsel %vm564_vm3, %v2541_v35, %v2545_v1  ;;  %2736 = vrot.lane.b32.xlu0 %v2689_v25, %s4656_s24  ;;  %v2551_v37 = vshll.u32 %v5754_v21, 16  ;;  %v2010_v38 = vadd.f32 %v4441_v15, %v1696_v34 }
 0x23e   : > { %v2383_v20 = vrot.slane %v2381_v62, 3  ;;  %v2386_v13 = vrot.slane %v2384_v27, 4  ;;  %2641 = vrot.lane.b32.xlu1 %v2546_v58, %s4660_s11  ;;  %v2369_v41 = vor.u32 %v2368_v22, %v2365_v44  ;;  %v5764_v5 = vsel %vm2200_vm11, %v2351_v10, %v5709_v39 }
 0x23f   : > { %v2390_v7 = vshrl.u32 %v2197_v18, 16  ;;  %v2393_v24 = vshll.u32 %v2197_v18, 16  ;;  %v2549_v9 = vor.u32 %v2547_v50, %v2545_v1  ;;  %v2553_v32 = vrot.slane %v2551_v37, 1 }
 0x240   : > { %v2065_v59 = vadd.f32 %v5453_v57, %v2010_v38  ;;  %v2555_v48 = vshrl.u32 %v5754_v21, 16  ;;  %v2387_v30 = vor.u32 %v2386_v13, %v2383_v20  ;;  %v2691_v49 = vsel %vm809_vm5, %v2688_v33, %v2690_v43  ;;  %v4615_v33 = vld [vmem:[%s6407_s2] ss:$0 sm:$0xff] }
 0x241   : > { %v2559_v11 = vshll.u32 %v5764_v5, 16  ;;  %v2009_v3 = vadd.f32 %v1952_v52, %v1691_v6  ;;  %v2554_v15 = vsel %vm564_vm3, %v2549_v9, %v2553_v32  ;;  %v2692_v10 = vrot.slane %v5754_v21, 1 }
 0x242   : > { %2738 = vrot.lane.b32.xlu1 %v2691_v49, %s4656_s24  ;;  %v2113_v34 = vmax.f32 %v2065_v59, 0.0  ;;  %v2557_v35 = vor.u32 %v2555_v48, %v2553_v32  ;;  %v2392_v42 = vrot.slane %v2390_v7, 3  ;;  %v2395_v36 = vrot.slane %v2393_v24, 4  ;;  %2643 = vrot.lane.b32.xlu0 %v2554_v15, %s4660_s11 }
 0x243   : > { %v2561_v57 = vrot.slane %v2559_v11, 1  ;;  %v2064_v26 = vadd.f32 %v4615_v33, %v2009_v3  ;;  %v2694_v6 = vrot.slane %v5764_v5, 1  ;;  %v5781_v44 = vsel %vm2200_vm11, %v5709_v39, %v2369_v41 }
 0x244   : > { %v2199_v52 = vpack.c.bf16 %v4659_v46, %v2113_v34  ;;  %v2563_v22 = vshrl.u32 %v5764_v5, 16  ;;  %v2693_v62 = vsel %vm809_vm5, %v2690_v43, %v2692_v10  ;;  %v2567_v27 = vshll.u32 %v5781_v44, 16 }
 0x245   : > { %v2562_v31 = vsel %vm564_vm3, %v2557_v35, %v2561_v57  ;;  %v2112_v1 = vmax.f32 %v2064_v26, 0.0  ;;  %v5790_v50 = vsel %vm2200_vm11, %v2369_v41, %v5747_v12  ;;  %v2571_v13 = vshrl.u32 %v5781_v44, 16 }
 0x246   : > { %v2408_v25 = vshrl.u32 %v2199_v52, 16  ;;  %v2411_v18 = vshll.u32 %v2199_v52, 16  ;;  %2645 = vrot.lane.b32.xlu1 %v2562_v31, %s4660_s11  ;;  %v2565_v58 = vor.u32 %v2563_v22, %v2561_v57  ;;  %2740 = vrot.lane.b32.xlu0 %v2693_v62, %s4656_s24  ;;  %v2569_v20 = vrot.slane %v2567_v27, 1 }
 0x247   : > { %v2198_v39 = vpack.c.bf16 %v2112_v1, %v4659_v46  ;;  %v2575_v43 = vshll.u32 %v5790_v50, 16  ;;  %v2396_v37 = vor.u32 %v2395_v36, %v2392_v42  ;;  %v2695_v24 = vsel %vm809_vm5, %v2692_v10, %v2694_v6 }
 0x248   : > { %v2410_v38 = vrot.slane %v2408_v25, 3  ;;  %v2413_v7 = vrot.slane %v2411_v18, 4  ;;  %v2570_v59 = vsel %vm564_vm3, %v2565_v58, %v2569_v20  ;;  %v2573_v41 = vor.u32 %v2571_v13, %v2569_v20 }
 0x249   : > { %v2399_v9 = vshrl.u32 %v2198_v39, 16  ;;  %v2402_v32 = vshll.u32 %v2198_v39, 16  ;;  %v2577_v46 = vrot.slane %v2575_v43, 1  ;;  %v2696_v48 = vrot.slane %v5781_v44, 1 }
 0x24a   : > { %2742 = vrot.lane.b32.xlu1 %v2695_v24, %s4656_s24  ;;  %2647 = vrot.lane.b32.xlu0 %v2570_v59, %s4660_s11  ;;  %v5803_v3 = vsel %vm2200_vm11, %v5747_v12, %v2387_v30  ;;  %v5808_v35 = vsel %vm2200_vm11, %v2387_v30, %v2396_v37  ;;  %v2414_v10 = vor.u32 %v2413_v7, %v2410_v38  ;;  %v2698_v36 = vrot.slane %v5790_v50, 1 }
 0x24b   : > { %v2401_v49 = vrot.slane %v2399_v9, 3  ;;  %v2404_v11 = vrot.slane %v2402_v32, 4  ;;  %v2578_v15 = vsel %vm564_vm3, %v2573_v41, %v2577_v46  ;;  %v2583_v34 = vshll.u32 %v5803_v3, 16 }
 0x24c   : > { %v2591_v57 = vshll.u32 %v5808_v35, 16  ;;  %v2697_v33 = vsel %vm809_vm5, %v2694_v6, %v2696_v48  ;;  %v2579_v12 = vshrl.u32 %v5790_v50, 16  ;;  %v2587_v52 = vshrl.u32 %v5803_v3, 16 }
 0x24d   : > { %v2405_v42 = vor.u32 %v2404_v11, %v2401_v49  ;;  %v2585_v26 = vrot.slane %v2583_v34, 1  ;;  %v2699_v1 = vsel %vm809_vm5, %v2696_v48, %v2698_v36  ;;  %v2700_v18 = vrot.slane %v5803_v3, 1 }
 0x24e   : > { %2649 = vrot.lane.b32.xlu1 %v2578_v15, %s4660_s11  ;;  %2744 = vrot.lane.b32.xlu0 %v2697_v33, %s4656_s24  ;;  %v2581_v31 = vor.u32 %v2579_v12, %v2577_v46  ;;  %v2593_v27 = vrot.slane %v2591_v57, 1  ;;  %v2595_v39 = vshrl.u32 %v5808_v35, 16  ;;  %v2702_v13 = vrot.slane %v5808_v35, 1 }
 0x24f   : > { %v5818_v30 = vsel %vm2200_vm11, %v2396_v37, %v2405_v42  ;;  %v5821_v22 = vsel %vm2200_vm11, %v2405_v42, %v2414_v10  ;;  %v2589_v62 = vor.u32 %v2587_v52, %v2585_v26  ;;  %v2701_v38 = vsel %vm809_vm5, %v2698_v36, %v2700_v18 }
 0x250   : > { %v2599_v6 = vshll.u32 %v5818_v30, 16  ;;  %v2586_v25 = vsel %vm564_vm3, %v2581_v31, %v2585_v26  ;;  %v2603_v43 = vshrl.u32 %v5818_v30, 16  ;;  %v2607_v37 = vshll.u32 %v5821_v22, 16 }
 0x251   : > { %v2594_v20 = vsel %vm564_vm3, %v2589_v62, %v2593_v27  ;;  %v2597_v7 = vor.u32 %v2595_v39, %v2593_v27  ;;  %v3295_v32 = vsel %vm3033_vm10, %v5537_v40, 0  ;;  %v5842_v59 = vsel %vm5468_vm13, %v2414_v10, 0 }
 0x252   : > { %2746 = vrot.lane.b32.xlu1 %v2699_v1, %s4656_s24  ;;  %2651 = vrot.lane.b32.xlu0 %v2586_v25, %s4660_s11  ;;  %v2601_v58 = vrot.slane %v2599_v6, 1  ;;  %v2703_v41 = vsel %vm809_vm5, %v2700_v18, %v2702_v13  ;;  %v2609_v46 = vrot.slane %v2607_v37, 1  ;;  %v2704_v48 = vrot.slane %v5818_v30, 1 }
 0x253   : > { %4494 = vmatpush3.bf16.msra.mxu0 %v3295_v32  ;;  %v2854_v11 = vshrl.u32 %v5821_v22, 16  ;;  %v2858_v40 = vshll.u32 %v5842_v59, 16  ;;  %v2706_v17 = vrot.slane %v5821_v22, 1  ;;  %v2862_v57 = vshrl.u32 %v5842_v59, 16 }
 0x254   : > { %v2605_v24 = vor.u32 %v2603_v43, %v2601_v58  ;;  %v2602_v9 = vsel %vm564_vm3, %v2597_v7, %v2601_v58  ;;  %v2705_v15 = vsel %vm809_vm5, %v2702_v13, %v2704_v48  ;;  %v2870_v12 = vrot.slane %v5842_v59, 1 }
 0x255   : > { %v2856_v34 = vor.u32 %v2854_v11, %v2609_v46  ;;  %v2860_v10 = vrot.slane %v2858_v40, 1  ;;  %v2707_v42 = vsel %vm809_vm5, %v2704_v48, %v2706_v17  ;;  %v2426_v52 = vsel %vm564_vm3, %v5072_v23, %v5501_v47 }
 0x256   : > { %2653 = vrot.lane.b32.xlu1 %v2594_v20, %s4660_s11  ;;  %2748 = vrot.lane.b32.xlu0 %v2701_v38, %s4656_s24  ;;  %v2610_v49 = vsel %vm564_vm3, %v2605_v24, %v2609_v46  ;;  %v2871_v26 = vsel %vm809_vm5, %v2706_v17, %v2870_v12  ;;  %v2661_v27 = vsel %vm809_vm5, %v5072_v23, %v2660_v14 }
 0x257   : > { %v2861_v36 = vsel %vm564_vm3, %v2856_v34, %v2860_v10  ;;  %v2864_v33 = vor.u32 %v2862_v57, %v2860_v10  ;;  %v3511_v20 = vsel %vm809_vm5, %v2870_v12, %v5072_v23 }
 0x259   : > { %v3506_v6 = vsel %vm564_vm3, %v2864_v33, %v5072_v23 }
 0x25a   : > { %2750 = vrot.lane.b32.xlu1 %v2703_v41, %s4656_s24  ;;  %2655 = vrot.lane.b32.xlu0 %v2602_v9, %s4660_s11  ;;  %v3533_v9 = vsel %vm3033_vm10, %v5544_v8, 0 }
 0x25e   : > { %2657 = vrot.lane.b32.xlu1 %v2610_v49, %s4660_s11  ;;  %2752 = vrot.lane.b32.xlu0 %v2705_v15, %s4656_s24 }
 0x262   : > { %2754 = vrot.lane.b32.xlu1 %v2707_v42, %s4656_s24  ;;  %2865 = vrot.lane.b32.xlu0 %v2861_v36, %s4660_s11 }
 0x265   : > { %v2711_v31 = vpop.permute.xlu1 %2710 }
 0x266   : > { %2867 = vrot.lane.b32.xlu1 %v2864_v33, %s4660_s11  ;;  %2872 = vrot.lane.b32.xlu0 %v2871_v26, %s4656_s24 }
 0x26a   : > { %2874 = vrot.lane.b32.xlu1 %v2870_v12, %s4656_s24  ;;  %v2614_v1 = vpop.permute.xlu0 %2613  ;;  %2611 = vrot.lane.b32.xlu0 %v2426_v52, %s4660_s11 }
 0x26b   : > { %v2760_v62 = vsel %vm2756_vm14, %v5478_v56, %v2614_v1 }
 0x26c   : > { %v5879_v25 = vsel %vm907_vm7, %v2760_v62, %v2711_v31 }
 0x26d   : > { %v2616_v47 = vpop.permute.xlu1 %2615  ;;  %v2911_v14 = vrot.slane %v5879_v25, 4 }
 0x26e   : > { %2708 = vrot.lane.b32.xlu1 %v2661_v27, %s4656_s24  ;;  %v2713_v18 = vpop.permute.xlu0 %2712  ;;  %3507 = vrot.lane.b32.xlu0 %v3506_v6, %s4660_s11  ;;  %v2762_v58 = vsel %vm2756_vm14, %v5473_v28, %v2616_v47 }
 0x26f   : > { %v5885_v56 = vsel %vm907_vm7, %v2762_v58, %v2713_v18 }
 0x270   : > { %v2912_v39 = vrot.slane %v5885_v56, 4 }
 0x272   : > { %3509 = vrot.lane.b32.xlu1 %v5072_v23, %s4660_s11  ;;  %3512 = vrot.lane.b32.xlu0 %v3511_v20, %s4656_s24  ;;  %v2913_v13 = vsel %vm558_vm4, %v2911_v14, %v2912_v39  ;;  %v2715_v28 = vpop.permute.xlu1 %2714 }
 0x273   : > { %4445 = vmatprep.mubr.msk.bf16.mxu1 %vm2960_vm15, %v2913_v13 }
 0x276   : > { %3514 = vrot.lane.b32.xlu1 %v5072_v23, %s4656_s24 }
 0x277   : > { %v2618_v43 = vpop.permute.xlu0 %2617 }
 0x278   : > { %v2764_v37 = vsel %vm2756_vm14, %v5493_v2, %v2618_v43 }
 0x279   : > { %v5901_v38 = vsel %vm907_vm7, %v2764_v37, %v2715_v28 }
 0x27a   : > { %v2914_v7 = vrot.slane %v5901_v38, 4 }
 0x27b   : > { %v2620_v24 = vpop.permute.xlu0 %2619 }
 0x27c   : > { %v2915_v32 = vsel %vm558_vm4, %v2912_v39, %v2914_v7  ;;  %v2766_v23 = vsel %vm2756_vm14, %v5520_v63, %v2620_v24 }
 0x27d   : > { %4446 = vmatmul.mubr.msk.bf16.vlgmr.msra.gmra.mrb[48].mxu1 %vm2960_vm15, %v2915_v32 }
 0x27e   : > { %v2622_v41 = vpop.permute.xlu1 %2621  ;;  %4544 = vmatpush3.bf16.msra.mxu1 %v3533_v9 }
 0x27f   : > { %v2717_v46 = vpop.permute.xlu0 %2716  ;;  %v2768_v49 = vsel %vm2756_vm14, %v5558_v45, %v2622_v41 }
 0x280   : > { %v5911_v2 = vsel %vm907_vm7, %v2766_v23, %v2717_v46 }
 0x281   : > { %v2916_v48 = vrot.slane %v5911_v2, 4 }
 0x282   : > { %v2719_v11 = vpop.permute.xlu1 %2718 }
 0x283   : > { %v5917_v8 = vsel %vm907_vm7, %v2768_v49, %v2719_v11  ;;  %v2917_v40 = vsel %vm558_vm4, %v2914_v7, %v2916_v48 }
 0x284   : > { %v2918_v17 = vrot.slane %v5917_v8, 4  ;;  %v2624_v15 = vpop.permute.xlu0 %2623  ;;  %4449 = vmatprep.mubr.msk.bf16.mxu1 %vm2960_vm15, %v2917_v40 }
 0x285   : > { %v2770_v10 = vsel %vm2756_vm14, %v5566_v54, %v2624_v15 }
 0x286   : > { %v2919_v63 = vsel %vm558_vm4, %v2916_v48, %v2918_v17 }
 0x287   : > { %v2626_v34 = vpop.permute.xlu1 %2625  ;;  %4450 = vmatmul.mubr.msk.bf16.gmra.mrb[52].mxu1 %vm2960_vm15, %v2919_v63 }
 0x288   : > { %v2721_v45 = vpop.permute.xlu0 %2720  ;;  %v2772_v57 = vsel %vm2756_vm14, %v5585_v16, %v2626_v34 }
 0x289   : > { %v5927_v42 = vsel %vm907_vm7, %v2770_v10, %v2721_v45 }
 0x28a   : > { %v2920_v36 = vrot.slane %v5927_v42, 4 }
 0x28b   : > { %v2723_v33 = vpop.permute.xlu1 %2722 }
 0x28c   : > { %v5933_v12 = vsel %vm907_vm7, %v2772_v57, %v2723_v33  ;;  %v2921_v26 = vsel %vm558_vm4, %v2918_v17, %v2920_v36 }
 0x28d   : > { %v2922_v52 = vrot.slane %v5933_v12, 4  ;;  %4453 = vmatprep.mubr.msk.bf16.mxu1 %vm2960_vm15, %v2921_v26 }
 0x28e   : > { %v2628_v54 = vpop.permute.xlu0 %2627 }
 0x28f   : > { %v2923_v31 = vsel %vm558_vm4, %v2920_v36, %v2922_v52  ;;  %v2774_v1 = vsel %vm2756_vm14, %v5603_v61, %v2628_v54 }
 0x290   : > { %4454 = vmatmul.mubr.msk.bf16.gmra.mrb[56].mxu1 %vm2960_vm15, %v2923_v31 }
 0x292   : > { %v2725_v62 = vpop.permute.xlu0 %2724  ;;  %v2630_v16 = vpop.permute.xlu1 %2629 }
 0x293   : > { %v5943_v27 = vsel %vm907_vm7, %v2774_v1, %v2725_v62  ;;  %v2776_v18 = vsel %vm2756_vm14, %v5626_v60, %v2630_v16 }
 0x294   : > { %v2924_v6 = vrot.slane %v5943_v27, 4 }
 0x296   : > { %v2925_v47 = vsel %vm558_vm4, %v2922_v52, %v2924_v6  ;;  %v2727_v58 = vpop.permute.xlu1 %2726 }
 0x297   : > { %4457 = vmatprep.mubr.msk.bf16.mxu1 %vm2960_vm15, %v2925_v47  ;;  %v5951_v14 = vsel %vm907_vm7, %v2776_v18, %v2727_v58 }
 0x298   : > { %v2926_v61 = vrot.slane %v5951_v14, 4  ;;  %v2632_v39 = vpop.permute.xlu0 %2631 }
 0x299   : > { %v2778_v28 = vsel %vm2756_vm14, %v5640_v53, %v2632_v39 }
 0x29a   : > { %v2927_v13 = vsel %vm558_vm4, %v2924_v6, %v2926_v61 }
 0x29b   : > { %v2634_v20 = vpop.permute.xlu1 %2633  ;;  %4458 = vmatmul.mubr.msk.bf16.gmra.mrb[60].mxu1 %vm2960_vm15, %v2927_v13 }
 0x29c   : > { %v2729_v43 = vpop.permute.xlu0 %2728  ;;  %v2780_v37 = vsel %vm2756_vm14, %v5657_v29, %v2634_v20 }
 0x29d   : > { %v5959_v60 = vsel %vm907_vm7, %v2778_v28, %v2729_v43 }
 0x29e   : > { %v2928_v7 = vrot.slane %v5959_v60, 4 }
 0x29f   : > { %v2731_v24 = vpop.permute.xlu1 %2730 }
 0x2a0   : > { %v5965_v9 = vsel %vm907_vm7, %v2780_v37, %v2731_v24  ;;  %v2929_v23 = vsel %vm558_vm4, %v2926_v61, %v2928_v7 }
 0x2a1   : > { %v2930_v32 = vrot.slane %v5965_v9, 4  ;;  %v2636_v41 = vpop.permute.xlu0 %2635  ;;  %4461 = vmatprep.mubr.msk.bf16.mxu1 %vm2960_vm15, %v2929_v23 }
 0x2a2   : > { %v2782_v29 = vsel %vm2756_vm14, %v5667_v51, %v2636_v41 }
 0x2a3   : > { %v2931_v53 = vsel %vm558_vm4, %v2928_v7, %v2930_v32 }
 0x2a4   : > { %4462 = vmatmul.mubr.msk.bf16.gmra.mrb[64].mxu1 %vm2960_vm15, %v2931_v53  ;;  %v2638_v46 = vpop.permute.xlu1 %2637 }
 0x2a5   : > { %v2733_v48 = vpop.permute.xlu0 %2732  ;;  %v2784_v40 = vsel %vm2756_vm14, %v5688_v0, %v2638_v46 }
 0x2a6   : > { %v5975_v49 = vsel %vm907_vm7, %v2782_v29, %v2733_v48 }
 0x2a7   : > { %v2932_v11 = vrot.slane %v5975_v49, 4 }
 0x2a8   : > { %v2735_v17 = vpop.permute.xlu1 %2734 }
 0x2a9   : > { %v2933_v15 = vsel %vm558_vm4, %v2930_v32, %v2932_v11  ;;  %v5982_v63 = vsel %vm907_vm7, %v2784_v40, %v2735_v17 }
 0x2aa   : > { %4465 = vmatprep.mubr.msk.bf16.mxu1 %vm2960_vm15, %v2933_v15  ;;  %v2934_v51 = vrot.slane %v5982_v63, 4 }
 0x2ab   : > { %v2640_v34 = vpop.permute.xlu0 %2639 }
 0x2ac   : > { %v2935_v10 = vsel %vm558_vm4, %v2932_v11, %v2934_v51  ;;  %v2786_v45 = vsel %vm2756_vm14, %v5702_v4, %v2640_v34 }
 0x2ad   : > { %4466 = vmatmul.mubr.msk.bf16.gmra.mrb[68].mxu1 %vm2960_vm15, %v2935_v10 }
 0x2af   : > { %v2737_v36 = vpop.permute.xlu0 %2736 }
 0x2b0   : > { %v2642_v0 = vpop.permute.xlu1 %2641  ;;  %v5991_v57 = vsel %vm907_vm7, %v2786_v45, %v2737_v36 }
 0x2b1   : > { %v2936_v33 = vrot.slane %v5991_v57, 4  ;;  %v2788_v52 = vsel %vm2756_vm14, %v5725_v19, %v2642_v0 }
 0x2b3   : > { %v2937_v26 = vsel %vm558_vm4, %v2934_v51, %v2936_v33 }
 0x2b4   : > { %v2739_v54 = vpop.permute.xlu1 %2738  ;;  %4469 = vmatprep.mubr.msk.bf16.mxu1 %vm2960_vm15, %v2937_v26  ;;  %v2644_v1 = vpop.permute.xlu0 %2643 }
 0x2b5   : > { %v5999_v31 = vsel %vm907_vm7, %v2788_v52, %v2739_v54  ;;  %v2790_v6 = vsel %vm2756_vm14, %v5739_v55, %v2644_v1 }
 0x2b6   : > { %v2938_v4 = vrot.slane %v5999_v31, 4 }
 0x2b8   : > { %v2646_v62 = vpop.permute.xlu1 %2645  ;;  %v2939_v16 = vsel %vm558_vm4, %v2936_v33, %v2938_v4  ;;  %v2741_v47 = vpop.permute.xlu0 %2740 }
 0x2b9   : > { %4470 = vmatmul.mubr.msk.bf16.gmra.mrb[72].mxu1 %vm2960_vm15, %v2939_v16  ;;  %v6007_v19 = vsel %vm907_vm7, %v2790_v6, %v2741_v47  ;;  %v2792_v58 = vsel %vm2756_vm14, %v5754_v21, %v2646_v62 }
 0x2ba   : > { %v2940_v18 = vrot.slane %v6007_v19, 4 }
 0x2bc   : > { %v2743_v61 = vpop.permute.xlu1 %2742  ;;  %v2648_v20 = vpop.permute.xlu0 %2647  ;;  %v2941_v13 = vsel %vm558_vm4, %v2938_v4, %v2940_v18 }
 0x2bd   : > { %v6013_v39 = vsel %vm907_vm7, %v2792_v58, %v2743_v61  ;;  %4473 = vmatprep.mubr.msk.bf16.mxu1 %vm2960_vm15, %v2941_v13  ;;  %v2794_v37 = vsel %vm2756_vm14, %v5764_v5, %v2648_v20 }
 0x2be   : > { %v2942_v55 = vrot.slane %v6013_v39, 4 }
 0x2c0   : > { %v2650_v28 = vpop.permute.xlu1 %2649  ;;  %v2943_v43 = vsel %vm558_vm4, %v2940_v18, %v2942_v55  ;;  %v2745_v21 = vpop.permute.xlu0 %2744 }
 0x2c1   : > { %4474 = vmatmul.mubr.msk.bf16.gmra.mrb[76].mxu1 %vm2960_vm15, %v2943_v43  ;;  %v6023_v7 = vsel %vm907_vm7, %v2794_v37, %v2745_v21  ;;  %v2796_v32 = vsel %vm2756_vm14, %v5781_v44, %v2650_v28 }
 0x2c2   : > { %v2944_v24 = vrot.slane %v6023_v7, 4 }
 0x2c4   : > { %v2747_v41 = vpop.permute.xlu1 %2746  ;;  %v2652_v53 = vpop.permute.xlu0 %2651  ;;  %v2945_v29 = vsel %vm558_vm4, %v2942_v55, %v2944_v24 }
 0x2c5   : > { %v6029_v23 = vsel %vm907_vm7, %v2796_v32, %v2747_v41  ;;  %4477 = vmatprep.mubr.msk.bf16.mxu1 %vm2960_vm15, %v2945_v29  ;;  %v2798_v11 = vsel %vm2756_vm14, %v5790_v50, %v2652_v53 }
 0x2c6   : > { %v2946_v5 = vrot.slane %v6029_v23, 4 }
 0x2c8   : > { %v2654_v46 = vpop.permute.xlu1 %2653  ;;  %v2947_v48 = vsel %vm558_vm4, %v2944_v24, %v2946_v5  ;;  %v2749_v44 = vpop.permute.xlu0 %2748 }
 0x2c9   : > { %4478 = vmatmul.mubr.msk.bf16.gmra.mrb[80].mxu1 %vm2960_vm15, %v2947_v48  ;;  %v6039_v40 = vsel %vm907_vm7, %v2798_v11, %v2749_v44  ;;  %v2800_v15 = vsel %vm2756_vm14, %v5803_v3, %v2654_v46 }
 0x2ca   : > { %v2948_v17 = vrot.slane %v6039_v40, 4 }
 0x2cc   : > { %v2751_v51 = vpop.permute.xlu1 %2750  ;;  %v2656_v10 = vpop.permute.xlu0 %2655  ;;  %v2949_v45 = vsel %vm558_vm4, %v2946_v5, %v2948_v17 }
 0x2cd   : > { %v6045_v34 = vsel %vm907_vm7, %v2800_v15, %v2751_v51  ;;  %4481 = vmatprep.mubr.msk.bf16.mxu1 %vm2960_vm15, %v2949_v45  ;;  %v2802_v33 = vsel %vm2756_vm14, %v5808_v35, %v2656_v10 }
 0x2ce   : > { %v2950_v50 = vrot.slane %v6045_v34, 4 }
 0x2d0   : > { %v2658_v36 = vpop.permute.xlu1 %2657  ;;  %v2951_v0 = vsel %vm558_vm4, %v2948_v17, %v2950_v50  ;;  %v2753_v3 = vpop.permute.xlu0 %2752 }
 0x2d1   : > { %4482 = vmatmul.mubr.msk.bf16.gmra.mrb[84].mxu1 %vm2960_vm15, %v2951_v0  ;;  %v6055_v26 = vsel %vm907_vm7, %v2802_v33, %v2753_v3  ;;  %v2804_v54 = vsel %vm2756_vm14, %v5818_v30, %v2658_v36 }
 0x2d2   : > { %v2952_v52 = vrot.slane %v6055_v26, 4 }
 0x2d4   : > { %v2755_v1 = vpop.permute.xlu1 %2754  ;;  %v2866_v62 = vpop.permute.xlu0 %2865  ;;  %v2953_v16 = vsel %vm558_vm4, %v2950_v50, %v2952_v52 }
 0x2d5   : > { %v6061_v4 = vsel %vm907_vm7, %v2804_v54, %v2755_v1  ;;  %4485 = vmatprep.mubr.msk.bf16.mxu1 %vm2960_vm15, %v2953_v16  ;;  %v2877_v18 = vsel %vm2756_vm14, %v5821_v22, %v2866_v62 }
 0x2d6   : > { %v2954_v35 = vrot.slane %v6061_v4, 4 }
 0x2d8   : > { %v2868_v6 = vpop.permute.xlu1 %2867  ;;  %v2955_v47 = vsel %vm558_vm4, %v2952_v52, %v2954_v35  ;;  %v2873_v30 = vpop.permute.xlu0 %2872 }
 0x2d9   : > { %4486 = vmatmul.mubr.msk.bf16.gmra.mrb[88].mxu1 %vm2960_vm15, %v2955_v47  ;;  %v6071_v58 = vsel %vm907_vm7, %v2877_v18, %v2873_v30  ;;  %v2879_v20 = vsel %vm2756_vm14, %v5842_v59, %v2868_v6 }
 0x2da   : > { %v2956_v61 = vrot.slane %v6071_v58, 4 }
 0x2dc   : > { %v2875_v13 = vpop.permute.xlu1 %2874  ;;  %v2612_v28 = vpop.permute.xlu0 %2611  ;;  %v2957_v43 = vsel %vm558_vm4, %v2954_v35, %v2956_v61 }
 0x2dd   : > { %v2883_v55 = vsel %vm907_vm7, %v2879_v20, %v2875_v13  ;;  %v2758_v22 = vsel %vm2756_vm14, 0, %v2612_v28  ;;  %4489 = vmatprep.mubr.msk.bf16.mxu1 %vm2960_vm15, %v2957_v43 }
 0x2de   : > { %v2958_v37 = vrot.slane %v2883_v55, 4 }
 0x2e0   : > { %v2709_v21 = vpop.permute.xlu1 %2708  ;;  %v2959_v24 = vsel %vm558_vm4, %v2956_v61, %v2958_v37 }
 0x2e1   : > { %v2806_v32 = vsel %vm907_vm7, %v2758_v22, %v2709_v21  ;;  %4490 = vmatmul.mubr.msk.bf16.gmra.mrb[92].mxu1 %vm2960_vm15, %v2959_v24 }
 0x2e2   : > { %4495 = vmatprep.mubr.msk.bf16.mxu0 %vm2960_vm15, %v2806_v32  ;;  %4545 = vmatprep.mubr.msk.bf16.mxu1 %vm2960_vm15, %v5901_v38 }
 0x2e3   : > { %4496 = vmatmul.mubr.msk.bf16.vlgmr.msra.gmra.mrb[96].mxu0 %vm2960_vm15, %v5879_v25  ;;  %v3508_v25 = vpop.permute.xlu0 %3507 }
 0x2e4   : > { %4499 = vmatprep.mubr.msk.bf16.mxu0 %vm2960_vm15, %v5885_v56 }
 0x2e7   : > { %v3513_v56 = vpop.permute.xlu0 %3512 }
 0x2e9   : > { %4546 = vmatmul.mubr.msk.bf16.vlgmr.msra.gmra.mrb[96].mxu1 %vm2960_vm15, %v5911_v2 }
 0x2ea   : > { %4549 = vmatprep.mubr.msk.bf16.mxu1 %vm2960_vm15, %v5917_v8 }
 0x2eb   : > { %4500 = vmatmul.mubr.msk.bf16.gmra.mrb[100].mxu0 %vm2960_vm15, %v5901_v38  ;;  %v3510_v38 = vpop.permute.xlu1 %3509 }
 0x2ec   : > { %4503 = vmatprep.mubr.msk.bf16.mxu0 %vm2960_vm15, %v5911_v2  ;;  %v3517_v2 = vsel %vm2756_vm14, %v5842_v59, %v3508_v25 }
 0x2f1   : > { %4550 = vmatmul.mubr.msk.bf16.gmra.mrb[100].mxu1 %vm2960_vm15, %v5927_v42 }
 0x2f2   : > { %4553 = vmatprep.mubr.msk.bf16.mxu1 %vm2960_vm15, %v5933_v12 }
 0x2f3   : > { %4504 = vmatmul.mubr.msk.bf16.gmra.mrb[104].mxu0 %vm2960_vm15, %v5917_v8  ;;  %v3521_v8 = vsel %vm907_vm7, %v3517_v2, %v3513_v56  ;;  %v6238_v56 = vld [vmem:[%s6409_s4] ss:$0 sm:$0xff] }
 0x2f4   : > { %4507 = vmatprep.mubr.msk.bf16.mxu0 %vm2960_vm15, %v5927_v42  ;;  %v3519_v42 = vsel %vm2756_vm14, 0, %v3510_v38 }
 0x2f9   : > { %4554 = vmatmul.mubr.msk.bf16.gmra.mrb[104].mxu1 %vm2960_vm15, %v5943_v27 }
 0x2fa   : > { %4557 = vmatprep.mubr.msk.bf16.mxu1 %vm2960_vm15, %v5951_v14 }
 0x2fb   : > { %4508 = vmatmul.mubr.msk.bf16.gmra.mrb[108].mxu0 %vm2960_vm15, %v5933_v12  ;;  %v3515_v12 = vpop.permute.xlu1 %3514 }
 0x2fc   : > { %4511 = vmatprep.mubr.msk.bf16.mxu0 %vm2960_vm15, %v5943_v27  ;;  %v3523_v27 = vsel %vm907_vm7, %v3519_v42, %v3515_v12 }
 0x301   : > { %4558 = vmatmul.mubr.msk.bf16.gmra.mrb[108].mxu1 %vm2960_vm15, %v5959_v60 }
 0x302   : > { %4561 = vmatprep.mubr.msk.bf16.mxu1 %vm2960_vm15, %v5965_v9 }
 0x303   : > { %4512 = vmatmul.mubr.msk.bf16.gmra.mrb[112].mxu0 %vm2960_vm15, %v5951_v14 }
 0x304   : > { %4515 = vmatprep.mubr.msk.bf16.mxu0 %vm2960_vm15, %v5959_v60 }
 0x309   : > { %4562 = vmatmul.mubr.msk.bf16.gmra.mrb[112].mxu1 %vm2960_vm15, %v5975_v49 }
 0x30a   : > { %4565 = vmatprep.mubr.msk.bf16.mxu1 %vm2960_vm15, %v5982_v63 }
 0x30b   : > { %4516 = vmatmul.mubr.msk.bf16.gmra.mrb[116].mxu0 %vm2960_vm15, %v5965_v9 }
 0x30c   : > { %4519 = vmatprep.mubr.msk.bf16.mxu0 %vm2960_vm15, %v5975_v49 }
 0x311   : > { %4566 = vmatmul.mubr.msk.bf16.gmra.mrb[116].mxu1 %vm2960_vm15, %v5991_v57 }
 0x312   : > { %4569 = vmatprep.mubr.msk.bf16.mxu1 %vm2960_vm15, %v5999_v31 }
 0x313   : > { %4520 = vmatmul.mubr.msk.bf16.gmra.mrb[120].mxu0 %vm2960_vm15, %v5982_v63 }
 0x314   : > { %4523 = vmatprep.mubr.msk.bf16.mxu0 %vm2960_vm15, %v5991_v57 }
 0x319   : > { %4570 = vmatmul.mubr.msk.bf16.gmra.mrb[120].mxu1 %vm2960_vm15, %v6007_v19 }
 0x31a   : > { %4573 = vmatprep.mubr.msk.bf16.mxu1 %vm2960_vm15, %v6013_v39 }
 0x31b   : > { %4524 = vmatmul.mubr.msk.bf16.gmra.mrb[124].mxu0 %vm2960_vm15, %v5999_v31 }
 0x31c   : > { %4527 = vmatprep.mubr.msk.bf16.mxu0 %vm2960_vm15, %v6007_v19 }
 0x321   : > { %4574 = vmatmul.mubr.msk.bf16.gmra.mrb[124].mxu1 %vm2960_vm15, %v6023_v7 }
 0x322   : > { %4577 = vmatprep.mubr.msk.bf16.mxu1 %vm2960_vm15, %v6029_v23 }
 0x323   : > { %4528 = vmatmul.mubr.msk.bf16.gmra.mrb[128].mxu0 %vm2960_vm15, %v6013_v39 }
 0x324   : > { %4531 = vmatprep.mubr.msk.bf16.mxu0 %vm2960_vm15, %v6023_v7 }
 0x329   : > { %4578 = vmatmul.mubr.msk.bf16.gmra.mrb[128].mxu1 %vm2960_vm15, %v6039_v40 }
 0x32a   : > { %4581 = vmatprep.mubr.msk.bf16.mxu1 %vm2960_vm15, %v6045_v34 }
 0x32b   : > { %4532 = vmatmul.mubr.msk.bf16.gmra.mrb[132].mxu0 %vm2960_vm15, %v6029_v23 }
 0x32c   : > { %4535 = vmatprep.mubr.msk.bf16.mxu0 %vm2960_vm15, %v6039_v40 }
 0x331   : > { %4582 = vmatmul.mubr.msk.bf16.gmra.mrb[132].mxu1 %vm2960_vm15, %v6055_v26 }
 0x332   : > { %4585 = vmatprep.mubr.msk.bf16.mxu1 %vm2960_vm15, %v6061_v4 }
 0x333   : > { %4536 = vmatmul.mubr.msk.bf16.gmra.mrb[136].mxu0 %vm2960_vm15, %v6045_v34 }
 0x334   : > { %4539 = vmatprep.mubr.msk.bf16.mxu0 %vm2960_vm15, %v6055_v26 }
 0x339   : > { %4586 = vmatmul.mubr.msk.bf16.gmra.mrb[136].mxu1 %vm2960_vm15, %v6071_v58 }
 0x33a   : > { %4589 = vmatprep.mubr.msk.bf16.mxu1 %vm2960_vm15, %v3521_v8 }
 0x33b   : > { %4540 = vmatmul.mubr.msk.bf16.gmra.mrb[140].mxu0 %vm2960_vm15, %v6061_v4 }
 0x341   : > { %4590 = vmatmul.mubr.msk.bf16.gmra.mrb[140].mxu1 %vm2960_vm15, %v3523_v27 }
 0x350   : > { %v4447_v14 = vpop.f32.mrb[48].mxu1 }
 0x351   : > { %v3071_v60 = vpop.f32.mrb[49].mxu1 }
 0x352   : > { %v4448_v59 = vpop.f32.mrb[50].mxu1 }
 0x353   : > { %v3074_v9 = vpop.f32.mrb[51].mxu1 }
 0x35a   : > { %v4451_v49 = vpop.f32.mrb[52].mxu1 }
 0x35b   : > { %v3086_v63 = vpop.f32.mrb[53].mxu1 }
 0x35c   : > { %v6181_v57 = vpop.f32.mrb[54].mxu1 }
 0x35d   : > { %v3089_v31 = vpop.f32.mrb[55].mxu1 }
 0x363   : > { %v6183_v19 = vpop.f32.mrb[56].mxu1 }
 0x364   : > { %v3101_v39 = vpop.f32.mrb[57].mxu1 }
 0x365   : > { %v4456_v7 = vpop.f32.mrb[58].mxu1 }
 0x366   : > { %v6185_v41 = vpop.f32.mrb[59].mxu1 }
 0x36e   : > { %v4459_v23 = vpop.f32.mrb[60].mxu1 }
 0x36f   : > { %v6187_v53 = vpop.f32.mrb[61].mxu1 }
 0x370   : > { %v6189_v29 = vpop.f32.mrb[62].mxu1 }
 0x371   : > { %v6191_v5 = vpop.f32.mrb[63].mxu1 }
 0x377   : > { %v6193_v46 = vpop.f32.mrb[64].mxu1 }
 0x378   : > { %v6195_v48 = vpop.f32.mrb[65].mxu1 }
 0x379   : > { %v6197_v11 = vpop.f32.mrb[66].mxu1 }
 0x37a   : > { %v3133_v44 = vpop.f32.mrb[67].mxu1 }
 0x380   : > { %v6199_v40 = vpop.f32.mrb[68].mxu1 }
 0x381   : > { %v3145_v17 = vpop.f32.mrb[69].mxu1 }
 0x382   : > { %v4468_v15 = vpop.f32.mrb[70].mxu1 }
 0x383   : > { %v6201_v51 = vpop.f32.mrb[71].mxu1 }
 0x38c   : > { %v4471_v34 = vpop.f32.mrb[72].mxu1 }
 0x38d   : > { %v6203_v10 = vpop.f32.mrb[73].mxu1 }
 0x38e   : > { %v6205_v45 = vpop.f32.mrb[74].mxu1 }
 0x38f   : > { %v6207_v50 = vpop.f32.mrb[75].mxu1 }
 0x394   : > { %v6209_v36 = vpop.f32.mrb[76].mxu1 }
 0x395   : > { %v6211_v0 = vpop.f32.mrb[77].mxu1 }
 0x396   : > { %v6213_v33 = vpop.f32.mrb[78].mxu1 }
 0x397   : > { %v3177_v3 = vpop.f32.mrb[79].mxu1 }
 0x39c   : > { %v6215_v26 = vpop.f32.mrb[80].mxu1 }
 0x39d   : > { %v3189_v52 = vpop.f32.mrb[81].mxu1 }
 0x39e   : > { %v4480_v54 = vpop.f32.mrb[82].mxu1  ;;  %v4617_v52 = vld [vmem:[%s4707_s23 + $0x10] sm:$0xff] }
 0x39f   : > { %v6217_v1 = vpop.f32.mrb[83].mxu1 }
 0x3a4   : > { %v4483_v4 = vpop.f32.mrb[84].mxu1 }
 0x3a5   : > { %v6219_v62 = vpop.f32.mrb[85].mxu1 }
 0x3a6   : > { %v6221_v16 = vpop.f32.mrb[86].mxu1 }
 0x3a7   : > { %v6223_v35 = vpop.f32.mrb[87].mxu1 }
 0x3ac   : > { %v6225_v6 = vpop.f32.mrb[88].mxu1 }
 0x3ad   : > { %v6227_v47 = vpop.f32.mrb[89].mxu1 }
 0x3ae   : > { %v6229_v18 = vpop.f32.mrb[90].mxu1 }
 0x3af   : > { %v3221_v30 = vpop.f32.mrb[91].mxu1 }
 0x3b0   : > { %v4618_v30 = vld [vmem:[%s4707_s23 + $0x8] sm:$0xff] }
 0x3b4   : > { %v6231_v58 = vpop.f32.mrb[92].mxu1 }
 0x3b5   : > { %v3233_v61 = vpop.f32.mrb[93].mxu1 }
 0x3b6   : > { %v4492_v20 = vpop.f32.mrb[94].mxu1  ;;  %v4497_v13 = vpop.f32.mrb[96].mxu0 }
 0x3b7   : > { %v6233_v55 = vpop.f32.mrb[95].mxu1  ;;  %v3331_v28 = vpop.f32.mrb[97].mxu0 }
 0x3b8   : > { %v3332_v43 = vadd.f32 %v3331_v28, %v3071_v60  ;;  %v4498_v37 = vpop.f32.mrb[98].mxu0 }
 0x3b9   : > { %v3342_v22 = vadd.f32 %v4498_v37, %v4448_v59  ;;  %v3334_v21 = vpop.f32.mrb[99].mxu0 }
 0x3ba   : > { %v3335_v24 = vadd.f32 %v3334_v21, %v3074_v9 }
 0x3bc   : > { %v4547_v32 = vpop.f32.mrb[96].mxu1 }
 0x3bd   : > { %v3569_v25 = vpop.f32.mrb[97].mxu1 }
 0x3be   : > { %v3744_v38 = vadd.f32 %v3569_v25, %v3332_v43  ;;  %v4501_v2 = vpop.f32.mrb[100].mxu0  ;;  %v4548_v8 = vpop.f32.mrb[98].mxu1 }
 0x3bf   : > { %v3354_v42 = vadd.f32 %v4501_v2, %v4451_v49  ;;  %v3746_v12 = vadd.f32 %v4548_v8, %v3342_v22  ;;  %v3346_v27 = vpop.f32.mrb[101].mxu0  ;;  %v3572_v14 = vpop.f32.mrb[99].mxu1 }
 0x3c0   : > { %v3783_v60 = vadd.f32 %v6238_v56, %v3744_v38  ;;  %v3347_v59 = vadd.f32 %v3346_v27, %v3086_v63  ;;  %v3745_v9 = vadd.f32 %v3572_v14, %v3335_v24  ;;  %v4502_v31 = vpop.f32.mrb[102].mxu0  ;;  %v4616_v63 = vld [vmem:[%s4707_s23] sm:$0xff] }
 0x3c1   : > { %v3785_v39 = vadd.f32 %v6238_v56, %v3746_v12  ;;  %v3357_v7 = vadd.f32 %v4502_v31, %v6181_v57  ;;  %v3349_v23 = vpop.f32.mrb[103].mxu0  ;;  %v4621_v31 = vld [vmem:[%s4707_s23 + $0x28] sm:$0xff] }
 0x3c2   : > { %v3815_v44 = vmax.f32 %v3783_v60, 0.0  ;;  %v3784_v17 = vadd.f32 %v6238_v56, %v3745_v9  ;;  %v4620_v60 = vld [vmem:[%s4707_s23 + $0x18] sm:$0xff] }
 0x3c3   : > { %v3817_v49 = vmax.f32 %v3785_v39, 0.0 }
 0x3c4   : > { %v3847_v15 = vadd.f32 %v4616_v63, %v3815_v44  ;;  %v3816_v34 = vmax.f32 %v3784_v17, 0.0  ;;  %v4551_v3 = vpop.f32.mrb[100].mxu1 }
 0x3c5   : > { %v3849_v57 = vadd.f32 %v4617_v52, %v3817_v49  ;;  %v3748_v54 = vadd.f32 %v4551_v3, %v3354_v42  ;;  %v3584_v4 = vpop.f32.mrb[101].mxu1 }
 0x3c6   : > { %3879 = vst.msk [vmem:[%s6249_s26] sm:$0xff] %vm907_vm7, %v3847_v15  ;;  %v3848_v61 = vadd.f32 %v4618_v30, %v3816_v34  ;;  %v3747_v20 = vadd.f32 %v3584_v4, %v3347_v59  ;;  %v4505_v13 = vpop.f32.mrb[104].mxu0  ;;  %v4552_v28 = vpop.f32.mrb[102].mxu1 }
 0x3c7   : > { %3881 = vst.msk [vmem:[%s6249_s26 + $0x10] sm:$0xff] %vm907_vm7, %v3849_v57  ;;  %v3787_v43 = vadd.f32 %v6238_v56, %v3748_v54  ;;  %v3369_v37 = vadd.f32 %v4505_v13, %v6183_v19  ;;  %v3749_v22 = vadd.f32 %v4552_v28, %v3357_v7  ;;  %v3361_v21 = vpop.f32.mrb[105].mxu0  ;;  %v3587_v24 = vpop.f32.mrb[103].mxu1  ;;  %v4619_v19 = vld [vmem:[%s4707_s23 + $0x20] sm:$0xff] }
 0x3c8   : > { %3880 = vst.msk [vmem:[%s6249_s26 + $0x8] sm:$0xff] %vm907_vm7, %v3848_v61  ;;  %v3786_v32 = vadd.f32 %v6238_v56, %v3747_v20  ;;  %v4506_v25 = vpop.f32.mrb[106].mxu0  ;;  %v4622_v61 = vld [vmem:[%s4707_s23 + $0x38] sm:$0xff] }
 0x3c9   : > { %v3819_v38 = vmax.f32 %v3787_v43, 0.0  ;;  %v3788_v2 = vadd.f32 %v6238_v56, %v3749_v22  ;;  %v3363_v8 = vpop.f32.mrb[107].mxu0 }
 0x3ca   : > { %v3818_v42 = vmax.f32 %v3786_v32, 0.0  ;;  %v3364_v12 = vadd.f32 %v3363_v8, %v6185_v41 }
 0x3cb   : > { %v3851_v27 = vadd.f32 %v4619_v19, %v3819_v38  ;;  %v3820_v14 = vmax.f32 %v3788_v2, 0.0 }
 0x3cc   : > { %v3850_v59 = vadd.f32 %v4620_v60, %v3818_v42  ;;  %v4555_v9 = vpop.f32.mrb[104].mxu1 }
 0x3cd   : > { %3883 = vst.msk [vmem:[%s6249_s26 + $0x20] sm:$0xff] %vm907_vm7, %v3851_v27  ;;  %v3852_v39 = vadd.f32 %v4621_v31, %v3820_v14  ;;  %v3751_v7 = vadd.f32 %v4555_v9, %v3369_v37  ;;  %v3599_v23 = vpop.f32.mrb[105].mxu1  ;;  %v4623_v37 = vld [vmem:[%s4707_s23 + $0x30] sm:$0xff] }
 0x3ce   : > { %3882 = vst.msk [vmem:[%s6249_s26 + $0x18] sm:$0xff] %vm907_vm7, %v3850_v59  ;;  %v4509_v44 = vpop.f32.mrb[108].mxu0  ;;  %v4556_v17 = vpop.f32.mrb[106].mxu1  ;;  %v4624_v59 = vld [vmem:[%s4707_s23 + $0x40] sm:$0xff] }
 0x3cf   : > { %3884 = vst.msk [vmem:[%s6249_s26 + $0x28] sm:$0xff] %vm907_vm7, %v3852_v39  ;;  %v3790_v41 = vadd.f32 %v6238_v56, %v3751_v7  ;;  %v3375_v49 = vpop.f32.mrb[109].mxu0  ;;  %v3601_v63 = vpop.f32.mrb[107].mxu1  ;;  %v4625_v7 = vld [vmem:[%s4707_s23 + $0x50] sm:$0xff]  ;;  %v4626_v17 = vld [vmem:[%s4707_s23 + $0x48] sm:$0xff] }
 0x3d0   : > { %v3376_v15 = vadd.f32 %v3375_v49, %v6187_v53  ;;  %v3750_v34 = vadd.f32 %v3601_v63, %v3364_v12  ;;  %v4510_v3 = vpop.f32.mrb[110].mxu0 }
 0x3d1   : > { %v3822_v52 = vmax.f32 %v3790_v41, 0.0  ;;  %v3386_v57 = vadd.f32 %v4510_v3, %v6189_v29  ;;  %v3378_v54 = vpop.f32.mrb[111].mxu0 }
 0x3d2   : > { %v3789_v4 = vadd.f32 %v6238_v56, %v3750_v34  ;;  %v3379_v30 = vadd.f32 %v3378_v54, %v6191_v5 }
 0x3d3   : > { %v3854_v20 = vadd.f32 %v4622_v61, %v3822_v52 }
 0x3d4   : > { %v3821_v13 = vmax.f32 %v3789_v4, 0.0  ;;  %v4559_v28 = vpop.f32.mrb[108].mxu1 }
 0x3d5   : > { %3886 = vst.msk [vmem:[%s6249_s26 + $0x38] sm:$0xff] %vm907_vm7, %v3854_v20  ;;  %v3613_v43 = vpop.f32.mrb[109].mxu1 }
 0x3d6   : > { %v3853_v53 = vadd.f32 %v4623_v37, %v3821_v13  ;;  %v3752_v22 = vadd.f32 %v3613_v43, %v3376_v15  ;;  %v4513_v21 = vpop.f32.mrb[112].mxu0  ;;  %v4560_v24 = vpop.f32.mrb[110].mxu1 }
 0x3d7   : > { %v3398_v29 = vadd.f32 %v4513_v21, %v6193_v46  ;;  %v3754_v32 = vadd.f32 %v4560_v24, %v3386_v57  ;;  %v3390_v25 = vpop.f32.mrb[113].mxu0  ;;  %v3616_v38 = vpop.f32.mrb[111].mxu1  ;;  %v4629_v24 = vld [vmem:[%s4707_s23 + $0x68] sm:$0xff] }
 0x3d8   : > { %3885 = vst.msk [vmem:[%s6249_s26 + $0x30] sm:$0xff] %vm907_vm7, %v3853_v53  ;;  %v3791_v5 = vadd.f32 %v6238_v56, %v3752_v22  ;;  %v3391_v2 = vadd.f32 %v3390_v25, %v6195_v48  ;;  %v3753_v8 = vadd.f32 %v3616_v38, %v3379_v30  ;;  %v4514_v42 = vpop.f32.mrb[114].mxu0  ;;  %v4628_v53 = vld [vmem:[%s4707_s23 + $0x58] sm:$0xff] }
 0x3d9   : > { %v3793_v12 = vadd.f32 %v6238_v56, %v3754_v32  ;;  %v3401_v19 = vadd.f32 %v4514_v42, %v6197_v11  ;;  %v3393_v27 = vpop.f32.mrb[115].mxu0 }
 0x3da   : > { %v3823_v46 = vmax.f32 %v3791_v5, 0.0  ;;  %v3792_v14 = vadd.f32 %v6238_v56, %v3753_v8 }
 0x3db   : > { %v3825_v60 = vmax.f32 %v3793_v12, 0.0 }
 0x3dc   : > { %v3855_v9 = vadd.f32 %v4624_v59, %v3823_v46  ;;  %v3824_v31 = vmax.f32 %v3792_v14, 0.0  ;;  %v4563_v39 = vpop.f32.mrb[112].mxu1 }
 0x3dd   : > { %v3857_v48 = vadd.f32 %v4625_v7, %v3825_v60  ;;  %v3756_v23 = vadd.f32 %v4563_v39, %v3398_v29  ;;  %v3628_v44 = vpop.f32.mrb[113].mxu1 }
 0x3de   : > { %3887 = vst.msk [vmem:[%s6249_s26 + $0x40] sm:$0xff] %vm907_vm7, %v3855_v9  ;;  %v3856_v41 = vadd.f32 %v4626_v17, %v3824_v31  ;;  %v3755_v11 = vadd.f32 %v3628_v44, %v3391_v2  ;;  %v4517_v49 = vpop.f32.mrb[116].mxu0  ;;  %v4564_v63 = vpop.f32.mrb[114].mxu1  ;;  %v4630_v9 = vld [vmem:[%s4707_s23 + $0x78] sm:$0xff] }
 0x3df   : > { %3889 = vst.msk [vmem:[%s6249_s26 + $0x50] sm:$0xff] %vm907_vm7, %v3857_v48  ;;  %v3795_v15 = vadd.f32 %v6238_v56, %v3756_v23  ;;  %v3413_v34 = vadd.f32 %v4517_v49, %v6199_v40  ;;  %v3757_v3 = vadd.f32 %v4564_v63, %v3401_v19  ;;  %v3405_v52 = vpop.f32.mrb[117].mxu0  ;;  %v3631_v57 = vpop.f32.mrb[115].mxu1  ;;  %v4627_v40 = vld [vmem:[%s4707_s23 + $0x60] sm:$0xff]  ;;  %v4631_v23 = vld [vmem:[%s4707_s23 + $0x70] sm:$0xff] }
 0x3e0   : > { %3888 = vst.msk [vmem:[%s6249_s26 + $0x48] sm:$0xff] %vm907_vm7, %v3856_v41  ;;  %v3794_v54 = vadd.f32 %v6238_v56, %v3755_v11  ;;  %v4518_v4 = vpop.f32.mrb[118].mxu0 }
 0x3e1   : > { %v3827_v30 = vmax.f32 %v3795_v15, 0.0  ;;  %v3796_v61 = vadd.f32 %v6238_v56, %v3757_v3  ;;  %v3407_v20 = vpop.f32.mrb[119].mxu0 }
 0x3e2   : > { %v3826_v13 = vmax.f32 %v3794_v54, 0.0  ;;  %v3408_v28 = vadd.f32 %v3407_v20, %v6201_v51 }
 0x3e3   : > { %v3859_v43 = vadd.f32 %v4627_v40, %v3827_v30  ;;  %v3828_v37 = vmax.f32 %v3796_v61, 0.0  ;;  %v4632_v61 = vld [vmem:[%s4707_s23 + $0x80] sm:$0xff]  ;;  %v4633_v40 = vld [vmem:[%s4707_s23 + $0x90] sm:$0xff] }
 0x3e4   : > { %v3858_v22 = vadd.f32 %v4628_v53, %v3826_v13  ;;  %v4567_v21 = vpop.f32.mrb[116].mxu1  ;;  %v4634_v53 = vld [vmem:[%s4707_s23 + $0x88] sm:$0xff] }
 0x3e5   : > { %3891 = vst.msk [vmem:[%s6249_s26 + $0x60] sm:$0xff] %vm907_vm7, %v3859_v43  ;;  %v3860_v29 = vadd.f32 %v4629_v24, %v3828_v37  ;;  %v3759_v32 = vadd.f32 %v4567_v21, %v3413_v34  ;;  %v3643_v25 = vpop.f32.mrb[117].mxu1 }
 0x3e6   : > { %3890 = vst.msk [vmem:[%s6249_s26 + $0x58] sm:$0xff] %vm907_vm7, %v3858_v22  ;;  %v4521_v38 = vpop.f32.mrb[120].mxu0  ;;  %v4568_v5 = vpop.f32.mrb[118].mxu1 }
 0x3e7   : > { %3892 = vst.msk [vmem:[%s6249_s26 + $0x68] sm:$0xff] %vm907_vm7, %v3860_v29  ;;  %v3798_v51 = vadd.f32 %v6238_v56, %v3759_v32  ;;  %v3419_v2 = vpop.f32.mrb[121].mxu0  ;;  %v3645_v8 = vpop.f32.mrb[119].mxu1 }
 0x3e8   : > { %v3420_v42 = vadd.f32 %v3419_v2, %v6203_v10  ;;  %v3758_v12 = vadd.f32 %v3645_v8, %v3408_v28  ;;  %v4522_v19 = vpop.f32.mrb[122].mxu0 }
 0x3e9   : > { %v3830_v27 = vmax.f32 %v3798_v51, 0.0  ;;  %v3430_v46 = vadd.f32 %v4522_v19, %v6205_v45  ;;  %v3422_v14 = vpop.f32.mrb[123].mxu0 }
 0x3ea   : > { %v3797_v60 = vadd.f32 %v6238_v56, %v3758_v12  ;;  %v3423_v59 = vadd.f32 %v3422_v14, %v6207_v50 }
 0x3eb   : > { %v3862_v31 = vadd.f32 %v4630_v9, %v3830_v27 }
 0x3ec   : > { %v3829_v39 = vmax.f32 %v3797_v60, 0.0  ;;  %v4571_v7 = vpop.f32.mrb[120].mxu1  ;;  %v4636_v60 = vld [vmem:[%s4707_s23 + $0x98] sm:$0xff] }
 0x3ed   : > { %3894 = vst.msk [vmem:[%s6249_s26 + $0x78] sm:$0xff] %vm907_vm7, %v3862_v31  ;;  %v3657_v48 = vpop.f32.mrb[121].mxu1  ;;  %v4637_v31 = vld [vmem:[%s4707_s23 + $0xa8] sm:$0xff] }
 0x3ee   : > { %v3861_v10 = vadd.f32 %v4631_v23, %v3829_v39  ;;  %v3760_v44 = vadd.f32 %v3657_v48, %v3420_v42  ;;  %v4525_v17 = vpop.f32.mrb[124].mxu0  ;;  %v4572_v41 = vpop.f32.mrb[122].mxu1 }
 0x3ef   : > { %v3442_v45 = vadd.f32 %v4525_v17, %v6209_v36  ;;  %v3762_v11 = vadd.f32 %v4572_v41, %v3430_v46  ;;  %v3434_v49 = vpop.f32.mrb[125].mxu0  ;;  %v3660_v63 = vpop.f32.mrb[123].mxu1 }
 0x3f0   : > { %3893 = vst.msk [vmem:[%s6249_s26 + $0x70] sm:$0xff] %vm907_vm7, %v3861_v10  ;;  %v3799_v50 = vadd.f32 %v6238_v56, %v3760_v44  ;;  %v3435_v15 = vadd.f32 %v3434_v49, %v6211_v0  ;;  %v3761_v34 = vadd.f32 %v3660_v63, %v3423_v59  ;;  %v4526_v3 = vpop.f32.mrb[126].mxu0 }
 0x3f1   : > { %v3801_v52 = vadd.f32 %v6238_v56, %v3762_v11  ;;  %v3445_v57 = vadd.f32 %v4526_v3, %v6213_v33  ;;  %v3437_v54 = vpop.f32.mrb[127].mxu0  ;;  %v4638_v3 = vld [vmem:[%s4707_s23 + $0xb8] sm:$0xff] }
 0x3f2   : > { %v3831_v36 = vmax.f32 %v3799_v50, 0.0  ;;  %v3800_v4 = vadd.f32 %v6238_v56, %v3761_v34 }
 0x3f3   : > { %v3833_v30 = vmax.f32 %v3801_v52, 0.0 }
 0x3f4   : > { %v3863_v20 = vadd.f32 %v4632_v61, %v3831_v36  ;;  %v3832_v13 = vmax.f32 %v3800_v4, 0.0  ;;  %v4575_v28 = vpop.f32.mrb[124].mxu1  ;;  %v4639_v4 = vld [vmem:[%s4707_s23 + $0xb0] sm:$0xff] }
 0x3f5   : > { %v3865_v0 = vadd.f32 %v4633_v40, %v3833_v30  ;;  %v3764_v43 = vadd.f32 %v4575_v28, %v3442_v45  ;;  %v3672_v37 = vpop.f32.mrb[125].mxu1 }
 0x3f6   : > { %3895 = vst.msk [vmem:[%s6249_s26 + $0x80] sm:$0xff] %vm907_vm7, %v3863_v20  ;;  %v3864_v22 = vadd.f32 %v4634_v53, %v3832_v13  ;;  %v3763_v33 = vadd.f32 %v3672_v37, %v3435_v15  ;;  %v4529_v21 = vpop.f32.mrb[128].mxu0  ;;  %v4576_v24 = vpop.f32.mrb[126].mxu1 }
 0x3f7   : > { %3897 = vst.msk [vmem:[%s6249_s26 + $0x90] sm:$0xff] %vm907_vm7, %v3865_v0  ;;  %v3803_v29 = vadd.f32 %v6238_v56, %v3764_v43  ;;  %v3457_v32 = vadd.f32 %v4529_v21, %v6215_v26  ;;  %v3765_v25 = vadd.f32 %v4576_v24, %v3445_v57  ;;  %v3449_v38 = vpop.f32.mrb[129].mxu0  ;;  %v3675_v5 = vpop.f32.mrb[127].mxu1  ;;  %v4635_v26 = vld [vmem:[%s4707_s23 + $0xa0] sm:$0xff] }
 0x3f8   : > { %3896 = vst.msk [vmem:[%s6249_s26 + $0x88] sm:$0xff] %vm907_vm7, %v3864_v22  ;;  %v3802_v51 = vadd.f32 %v6238_v56, %v3763_v33  ;;  %v4530_v2 = vpop.f32.mrb[130].mxu0  ;;  %v4641_v5 = vld [vmem:[%s4707_s23 + $0xd0] sm:$0xff] }
 0x3f9   : > { %v3835_v8 = vmax.f32 %v3803_v29, 0.0  ;;  %v3804_v42 = vadd.f32 %v6238_v56, %v3765_v25  ;;  %v3451_v12 = vpop.f32.mrb[131].mxu0  ;;  %v4640_v29 = vld [vmem:[%s4707_s23 + $0xc0] sm:$0xff] }
 0x3fa   : > { %v3834_v19 = vmax.f32 %v3802_v51, 0.0  ;;  %v3452_v27 = vadd.f32 %v3451_v12, %v6217_v1 }
 0x3fb   : > { %v3867_v46 = vadd.f32 %v4635_v26, %v3835_v8  ;;  %v3836_v14 = vmax.f32 %v3804_v42, 0.0  ;;  %v4642_v8 = vld [vmem:[%s4707_s23 + $0xc8] sm:$0xff] }
 0x3fc   : > { %v3866_v59 = vadd.f32 %v4636_v60, %v3834_v19  ;;  %v4579_v9 = vpop.f32.mrb[128].mxu1 }
 0x3fd   : > { %3899 = vst.msk [vmem:[%s6249_s26 + $0xa0] sm:$0xff] %vm907_vm7, %v3867_v46  ;;  %v3868_v39 = vadd.f32 %v4637_v31, %v3836_v14  ;;  %v3767_v7 = vadd.f32 %v4579_v9, %v3457_v32  ;;  %v3687_v48 = vpop.f32.mrb[129].mxu1 }
 0x3fe   : > { %3898 = vst.msk [vmem:[%s6249_s26 + $0x98] sm:$0xff] %vm907_vm7, %v3866_v59  ;;  %v4533_v23 = vpop.f32.mrb[132].mxu0  ;;  %v4580_v10 = vpop.f32.mrb[130].mxu1 }
 0x3ff   : > { %3900 = vst.msk [vmem:[%s6249_s26 + $0xa8] sm:$0xff] %vm907_vm7, %v3868_v39  ;;  %v3806_v1 = vadd.f32 %v6238_v56, %v3767_v7  ;;  %v3463_v44 = vpop.f32.mrb[133].mxu0  ;;  %v3689_v17 = vpop.f32.mrb[131].mxu1 }
 0x400   : > { %v3464_v41 = vadd.f32 %v3463_v44, %v6219_v62  ;;  %v3766_v45 = vadd.f32 %v3689_v17, %v3452_v27  ;;  %v4534_v11 = vpop.f32.mrb[134].mxu0  ;;  %v4644_v44 = vld [vmem:[%s4707_s23 + $0xd8] sm:$0xff] }
 0x401   : > { %v3838_v49 = vmax.f32 %v3806_v1, 0.0  ;;  %v3474_v63 = vadd.f32 %v4534_v11, %v6221_v16  ;;  %v3466_v50 = vpop.f32.mrb[135].mxu0 }
 0x402   : > { %v3805_v15 = vadd.f32 %v6238_v56, %v3766_v45  ;;  %v3467_v34 = vadd.f32 %v3466_v50, %v6223_v35  ;;  %v4645_v45 = vld [vmem:[%s4707_s23 + $0xe8] sm:$0xff] }
 0x403   : > { %v3870_v52 = vadd.f32 %v4638_v3, %v3838_v49 }
 0x404   : > { %v3837_v57 = vmax.f32 %v3805_v15, 0.0  ;;  %v4583_v54 = vpop.f32.mrb[132].mxu1 }
 0x405   : > { %3902 = vst.msk [vmem:[%s6249_s26 + $0xb8] sm:$0xff] %vm907_vm7, %v3870_v52  ;;  %v3701_v36 = vpop.f32.mrb[133].mxu1 }
 0x406   : > { %v3869_v62 = vadd.f32 %v4639_v4, %v3837_v57  ;;  %v3768_v30 = vadd.f32 %v3701_v36, %v3464_v41  ;;  %v4537_v61 = vpop.f32.mrb[136].mxu0  ;;  %v4584_v20 = vpop.f32.mrb[134].mxu1  ;;  %v4646_v57 = vld [vmem:[%s4707_s23 + $0xf8] sm:$0xff]  ;;  %v4647_v4 = vld [vmem:[%s4707_s23 + $0xf0] sm:$0xff] }
 0x407   : > { %v3486_v16 = vadd.f32 %v4537_v61, %v6225_v6  ;;  %v3770_v13 = vadd.f32 %v4584_v20, %v3474_v63  ;;  %v3478_v28 = vpop.f32.mrb[137].mxu0  ;;  %v3704_v40 = vpop.f32.mrb[135].mxu1 }
 0x408   : > { %3901 = vst.msk [vmem:[%s6249_s26 + $0xb0] sm:$0xff] %vm907_vm7, %v3869_v62  ;;  %v3807_v35 = vadd.f32 %v6238_v56, %v3768_v30  ;;  %v3479_v0 = vadd.f32 %v3478_v28, %v6227_v47  ;;  %v3769_v43 = vadd.f32 %v3704_v40, %v3467_v34  ;;  %v4538_v37 = vpop.f32.mrb[138].mxu0 }
 0x409   : > { %v3809_v53 = vadd.f32 %v6238_v56, %v3770_v13  ;;  %v3489_v22 = vadd.f32 %v4538_v37, %v6229_v18  ;;  %v3481_v33 = vpop.f32.mrb[139].mxu0 }
 0x40a   : > { %v3839_v6 = vmax.f32 %v3807_v35, 0.0  ;;  %v3808_v21 = vadd.f32 %v6238_v56, %v3769_v43 }
 0x40b   : > { %v3841_v24 = vmax.f32 %v3809_v53, 0.0 }
 0x40c   : > { %v3871_v32 = vadd.f32 %v4640_v29, %v3839_v6  ;;  %v3840_v25 = vmax.f32 %v3808_v21, 0.0  ;;  %v4587_v38 = vpop.f32.mrb[136].mxu1 }
 0x40d   : > { %v3873_v47 = vadd.f32 %v4641_v5, %v3841_v24  ;;  %v3772_v51 = vadd.f32 %v4587_v38, %v3486_v16  ;;  %v3716_v2 = vpop.f32.mrb[137].mxu1 }
 0x40e   : > { %3903 = vst.msk [vmem:[%s6249_s26 + $0xc0] sm:$0xff] %vm907_vm7, %v3871_v32  ;;  %v3872_v42 = vadd.f32 %v4642_v8, %v3840_v25  ;;  %v3771_v18 = vadd.f32 %v3716_v2, %v3479_v0  ;;  %v4541_v12 = vpop.f32.mrb[140].mxu0  ;;  %v4588_v19 = vpop.f32.mrb[138].mxu1 }
 0x40f   : > { %3905 = vst.msk [vmem:[%s6249_s26 + $0xd0] sm:$0xff] %vm907_vm7, %v3873_v47  ;;  %v3811_v27 = vadd.f32 %v6238_v56, %v3772_v51  ;;  %v3501_v26 = vadd.f32 %v4541_v12, %v6231_v58  ;;  %v3773_v46 = vadd.f32 %v4588_v19, %v3489_v22  ;;  %v3493_v14 = vpop.f32.mrb[141].mxu0  ;;  %v3719_v60 = vpop.f32.mrb[139].mxu1  ;;  %v4643_v58 = vld [vmem:[%s4707_s23 + $0xe0] sm:$0xff] }
 0x410   : > { %3904 = vst.msk [vmem:[%s6249_s26 + $0xc8] sm:$0xff] %vm907_vm7, %v3872_v42  ;;  %v3810_v59 = vadd.f32 %v6238_v56, %v3771_v18  ;;  %v4542_v9 = vpop.f32.mrb[142].mxu0 }
 0x411   : > { %v3843_v31 = vmax.f32 %v3811_v27, 0.0  ;;  %v3812_v39 = vadd.f32 %v6238_v56, %v3773_v46  ;;  %v3495_v7 = vpop.f32.mrb[143].mxu0 }
 0x412   : > { %v3842_v48 = vmax.f32 %v3810_v59, 0.0  ;;  %v3496_v23 = vadd.f32 %v3495_v7, %v6233_v55 }
 0x413   : > { %v3875_v10 = vadd.f32 %v4643_v58, %v3843_v31  ;;  %v3844_v1 = vmax.f32 %v3812_v39, 0.0 }
 0x414   : > { %v3874_v17 = vadd.f32 %v4644_v44, %v3842_v48  ;;  %v4591_v41 = vpop.f32.mrb[140].mxu1 }
 0x415   : > { %3907 = vst.msk [vmem:[%s6249_s26 + $0xe0] sm:$0xff] %vm907_vm7, %v3875_v10  ;;  %v3876_v11 = vadd.f32 %v4645_v45, %v3844_v1  ;;  %v3775_v49 = vadd.f32 %v4591_v41, %v3501_v26  ;;  %v3731_v63 = vpop.f32.mrb[141].mxu1 }
 0x416   : > { %3906 = vst.msk [vmem:[%s6249_s26 + $0xd8] sm:$0xff] %vm907_vm7, %v3874_v17  ;;  %v4592_v50 = vpop.f32.mrb[142].mxu1 }
 0x417   : > { %3908 = vst.msk [vmem:[%s6249_s26 + $0xe8] sm:$0xff] %vm907_vm7, %v3876_v11  ;;  %v3814_v55 = vadd.f32 %v6238_v56, %v3775_v49  ;;  %v3733_v15 = vpop.f32.mrb[143].mxu1 }
 0x418   : > { %v3774_v34 = vadd.f32 %v3733_v15, %v3496_v23 }
 0x419   : > { %v3846_v3 = vmax.f32 %v3814_v55, 0.0 }
 0x41a   : > { %v3813_v52 = vadd.f32 %v6238_v56, %v3774_v34 }
 0x41b   : > { %v3878_v54 = vadd.f32 %v4646_v57, %v3846_v3 }
 0x41c   : > { %v3845_v36 = vmax.f32 %v3813_v52, 0.0 }
 0x41d   : > { %3910 = vst.msk [vmem:[%s6249_s26 + $0xf8] sm:$0xff] %vm907_vm7, %v3878_v54 }
 0x41e   : > { %v3877_v62 = vadd.f32 %v4647_v4, %v3845_v36 }
 0x420   : > { %3909 = vst.msk [vmem:[%s6249_s26 + $0xf0] sm:$0xff] %vm907_vm7, %v3877_v62 }
 0x421 PF: > { %s15_s18 = sadd.s32 1, %s4654_s18  }
 0x422   : > { %p12_p4 = scmp.ge.s32.totalorder %s15_s18, 4  }
 0x424   :  { %14 = sbr.rel (!%p12_p4) target bundleno = 1 (0x1), region = 74 }

</bundles_post_ra>
